<compile_context>
chip_gen: v7x
topology: tpu7x:2x2x1
jax: 0.10.0
libtpu: 0.0.40
codegen_flags: <defaults>
</compile_context>

<pallas_src>
import functools

import jax
import jax.numpy as jnp
from jax import lax
from jax.experimental import pallas as pl
from jax.experimental.pallas import tpu as pltpu

HIDDEN = 512
HEAD_SIZES = {
    "privilege_required": 4,
    "attack_vector": 2,
    "impact_1": 5,
    "impact_2": 7,
    "impact_3": 4,
}
MASK_DIM = 128
OUT_PAD = 128        # lane-dense padded width for the fused heads output
BATCH_PAD = 16       # bf16-packed sublane tile (16 rows / vreg)
MAX_SEQ_TILE = 64    # sequence tile (VMEM-safe on v7x's 64 MiB at B=16)


def _sigmoid(x):
    # sigmoid(x) == 0.5 * tanh(0.5 * x) + 0.5  (one EUP pass per gate)
    return 0.5 * jnp.tanh(0.5 * x) + 0.5


# ----------------------------------------------------------------------------
# Shared LSTM tile body.  Grid = (direction, sequence-tile).  The input
# projection for the whole tile is one hoisted matmul; h/c state lives in
# scratch and persists across sequence tiles.  Padded timesteps (when the
# sequence was rounded up to a tile multiple) freeze h/c so results match the
# un-padded reference.
# ----------------------------------------------------------------------------
def _lstm_tile(x_ref, wih_ref, whh_ref, b_ref, gx_sc, h_sc, c_sc, *,
               input_is_scalar, nt, seq_valid, emit_step, emit_final):
    d = pl.program_id(0)                       # 0 = forward, 1 = backward
    s = pl.program_id(1)                       # direction-local tile index
    tile, B, din = x_ref.shape
    H = h_sc.shape[1]
    masked = (nt * tile != seq_valid)          # static: padding present?

    @pl.when(s == 0)
    def _():
        h_sc[...] = jnp.zeros_like(h_sc)
        c_sc[...] = jnp.zeros_like(c_sc)

    # Hoisted input projection (+ folded bias = b_ih + b_hh) for the tile.
    if input_is_scalar:                        # Din == 1: VPU broadcast
        gx_sc[...] = x_ref[...] * wih_ref[...][None] + b_ref[...][None]
    else:                                      # MXU matmul, M = tile * B
        xt = x_ref[...].reshape(tile * B, din)               # already bf16
        gx = jnp.dot(xt, wih_ref[...], preferred_element_type=jnp.float32)
        gx_sc[...] = gx.reshape(tile, B, 4 * H) + b_ref[...]

    gtile = s + d * (nt - 1 - 2 * s)           # global tile index

    def step(i, carry):
        lt = i + d * (tile - 1 - 2 * i)        # fwd: i, bwd: tile - 1 - i
        gates = gx_sc[lt] + jnp.dot(
            h_sc[...].astype(jnp.bfloat16), whh_ref[...],
            preferred_element_type=jnp.float32)
        i_g = _sigmoid(gates[:, 0 * H:1 * H])
        f_g = _sigmoid(gates[:, 1 * H:2 * H])
        g_g = jnp.tanh(gates[:, 2 * H:3 * H])
        o_g = _sigmoid(gates[:, 3 * H:4 * H])
        c_new = f_g * c_sc[...] + i_g * g_g
        h_new = o_g * jnp.tanh(c_new)
        if masked:                             # freeze state on padded steps
            valid = (gtile * tile + lt) < seq_valid
            c_new = jnp.where(valid, c_new, c_sc[...])
            h_new = jnp.where(valid, h_new, h_sc[...])
        c_sc[...] = c_new
        h_sc[...] = h_new
        emit_step(lt, h_new)
        return carry

    lax.fori_loop(0, tile, step, 0)            # unroll=1 (vreg pressure)
    emit_final(s == nt - 1)


def _lstm_layer1_kernel(x_ref, wih_ref, whh_ref, b_ref, out_ref,
                        gx_sc, h_sc, c_sc, *, nt, seq_valid):
    # Emits the full hidden sequence (bf16) for its direction (layer-2 input).
    def emit_step(lt, h_new):
        out_ref[lt] = h_new.astype(out_ref.dtype)

    _lstm_tile(x_ref, wih_ref, whh_ref, b_ref, gx_sc, h_sc, c_sc,
               input_is_scalar=True, nt=nt, seq_valid=seq_valid,
               emit_step=emit_step, emit_final=lambda _is_last: None)


def _lstm_layer2_kernel(x_ref, wih_ref, whh_ref, b_ref, hcat_ref,
                        gx_sc, h_sc, c_sc, *, nt, seq_valid):
    # Emits only the final hidden state, straight into the concatenated slot.
    def emit_final(is_last):
        @pl.when(is_last)
        def _():
            hcat_ref[...] = h_sc[...]

    _lstm_tile(x_ref, wih_ref, whh_ref, b_ref, gx_sc, h_sc, c_sc,
               input_is_scalar=False, nt=nt, seq_valid=seq_valid,
               emit_step=lambda lt, h: None, emit_final=emit_final)


# ----------------------------------------------------------------------------
# Wrappers (grid / BlockSpec plumbing).
# ----------------------------------------------------------------------------
def _seq_tiling(seq):
    if seq <= MAX_SEQ_TILE:
        return seq, seq                        # single tile, no padding
    seq_pad = ((seq + MAX_SEQ_TILE - 1) // MAX_SEQ_TILE) * MAX_SEQ_TILE
    return MAX_SEQ_TILE, seq_pad


def _lstm_specs(nt, seq_tile, B, din, H):
    def tile_idx(d, s):
        # forward walks tiles 0..nt-1, backward walks nt-1..0
        return s + d * (nt - 1 - 2 * s)

    in_specs = [
        pl.BlockSpec((seq_tile, B, din), lambda d, s: (tile_idx(d, s), 0, 0)),
        pl.BlockSpec((None, din, 4 * H), lambda d, s: (d, 0, 0)),
        pl.BlockSpec((None, H, 4 * H), lambda d, s: (d, 0, 0)),
        pl.BlockSpec((None, 1, 4 * H), lambda d, s: (d, 0, 0)),
    ]
    return tile_idx, in_specs


def run_lstm_layer1(x_tm, wih, whh, b, *, seq_tile, seq_valid):
    """Fused bidirectional layer on scalar input; returns (seq_pad, B, 2H) bf16."""
    seq_pad, B, din = x_tm.shape
    H = whh.shape[1]
    nt = seq_pad // seq_tile
    tile_idx, in_specs = _lstm_specs(nt, seq_tile, B, din, H)
    kernel = functools.partial(_lstm_layer1_kernel, nt=nt, seq_valid=seq_valid)
    return pl.pallas_call(
        kernel,
        out_shape=jax.ShapeDtypeStruct((seq_pad, B, 2 * H), jnp.bfloat16),
        grid_spec=pltpu.PrefetchScalarGridSpec(
            num_scalar_prefetch=0,
            grid=(2, nt),
            in_specs=in_specs,
            out_specs=pl.BlockSpec((seq_tile, B, H),
                                   lambda d, s: (tile_idx(d, s), 0, d)),
            scratch_shapes=[
                pltpu.VMEM((seq_tile, B, 4 * H), jnp.float32),   # hoisted gx
                pltpu.VMEM((B, H), jnp.float32),                 # h state
                pltpu.VMEM((B, H), jnp.float32),                 # c state
            ]),
        compiler_params=pltpu.CompilerParams(
            dimension_semantics=("parallel", "arbitrary"),
            vmem_limit_bytes=40 << 20),
    )(x_tm, wih, whh, b)


def run_lstm_layer2_final(x2, wih, whh, b, *, seq_tile, seq_valid):
    """Fused bidirectional layer; emits only final states as (B, 2H) = [bwd|fwd]."""
    seq_pad, B, din = x2.shape
    H = whh.shape[1]
    nt = seq_pad // seq_tile
    _, in_specs = _lstm_specs(nt, seq_tile, B, din, H)
    kernel = functools.partial(_lstm_layer2_kernel, nt=nt, seq_valid=seq_valid)
    return pl.pallas_call(
        kernel,
        out_shape=jax.ShapeDtypeStruct((B, 2 * H), jnp.float32),
        grid_spec=pltpu.PrefetchScalarGridSpec(
            num_scalar_prefetch=0,
            grid=(2, nt),
            in_specs=in_specs,
            # d=1 (backward, h_n[-1]) -> cols [0:H]; d=0 (forward, h_n[-2]) -> [H:2H]
            out_specs=pl.BlockSpec((B, H), lambda d, s: (0, 1 - d)),
            scratch_shapes=[
                pltpu.VMEM((seq_tile, B, 4 * H), jnp.float32),
                pltpu.VMEM((B, H), jnp.float32),
                pltpu.VMEM((B, H), jnp.float32),
            ]),
        compiler_params=pltpu.CompilerParams(
            dimension_semantics=("parallel", "arbitrary"),
            vmem_limit_bytes=40 << 20),
    )(x2, wih, whh, b)


# ----------------------------------------------------------------------------
# Heads: all 5 (Linear -> ReLU -> Linear) fused into two matmuls with
# concatenated mask weights and a block-diagonal, lane-padded output weight.
# ----------------------------------------------------------------------------
def heads_kernel(x_ref, wm_ref, bm_ref, wo_ref, bo_ref, out_ref):
    h = jnp.dot(x_ref[...].astype(jnp.bfloat16), wm_ref[...],
                preferred_element_type=jnp.float32) + bm_ref[...]
    h = jnp.maximum(h, 0.0)
    out_ref[...] = jnp.dot(h, wo_ref[...],
                           preferred_element_type=jnp.float32) + bo_ref[...]


def run_heads(x, wm, bm, wo, bo):
    B = x.shape[0]
    return pl.pallas_call(
        heads_kernel,
        out_shape=jax.ShapeDtypeStruct((B, wo.shape[1]), jnp.float32),
        in_specs=[pl.BlockSpec(memory_space=pltpu.MemorySpace.VMEM)] * 5,
        out_specs=pl.BlockSpec(memory_space=pltpu.MemorySpace.VMEM),
    )(x, wm, bm, wo, bo)


# ----------------------------------------------------------------------------
# Deterministic parameter initialization (shapes match the nn.Module).
# ----------------------------------------------------------------------------
def init_params(key):
    H = HIDDEN
    keys = iter(jax.random.split(key, 64))

    def unif(shape, scale):
        return jax.random.uniform(next(keys), shape, jnp.float32, -scale, scale)

    k_lstm = 1.0 / jnp.sqrt(H)

    def lstm_layer(din, wih_dtype):
        wih = jnp.stack([unif((din, 4 * H), k_lstm),
                         unif((din, 4 * H), k_lstm)]).astype(wih_dtype)
        whh = jnp.stack([unif((H, 4 * H), k_lstm),
                         unif((H, 4 * H), k_lstm)]).astype(jnp.bfloat16)
        b = jnp.stack([unif((1, 4 * H), k_lstm) + unif((1, 4 * H), k_lstm),
                       unif((1, 4 * H), k_lstm) + unif((1, 4 * H), k_lstm)])
        return {"wih": wih, "whh": whh, "b": b}     # stacked (fwd, bwd)

    # NOTE: W_hh / layer-2 W_ih are bf16 (f32 accumulation) — not bit-exact
    # vs the f32 PyTorch reference; an explicit accuracy/perf tradeoff.
    params = {
        "l0": lstm_layer(1, jnp.float32),           # scalar-input path stays f32
        "l1": lstm_layer(2 * H, jnp.bfloat16),      # MXU path in bf16
    }

    feat = 2 * H
    k_mask = 1.0 / jnp.sqrt(feat)
    k_out = 1.0 / jnp.sqrt(MASK_DIM)
    n_heads = len(HEAD_SIZES)

    wm_parts, bm_parts = [], []
    wo = jnp.zeros((n_heads * MASK_DIM, OUT_PAD), jnp.float32)
    bo = jnp.zeros((1, OUT_PAD), jnp.float32)
    off = 0
    for i, (_, k_sz) in enumerate(HEAD_SIZES.items()):
        wm_parts.append(unif((feat, MASK_DIM), k_mask))
        bm_parts.append(unif((MASK_DIM,), k_mask))
        wo = wo.at[i * MASK_DIM:(i + 1) * MASK_DIM, off:off + k_sz].set(
            unif((MASK_DIM, k_sz), k_out))
        bo = bo.at[0, off:off + k_sz].set(unif((k_sz,), k_out))
        off += k_sz

    params["Wm"] = jnp.concatenate(wm_parts, axis=1).astype(jnp.bfloat16)  # (1024,640)
    params["bm"] = jnp.concatenate(bm_parts)[None, :]   # (1, 640)
    params["Wo"] = wo                                   # (640, 128) padded block-diag
    params["bo"] = bo                                   # (1, 128)
    return params


# ----------------------------------------------------------------------------
# Full forward pass.
# ----------------------------------------------------------------------------
def forward(params, x):
    batch, seq, _ = x.shape
    B = ((batch + BATCH_PAD - 1) // BATCH_PAD) * BATCH_PAD
    seq_tile, seq_pad = _seq_tiling(seq)

    x_pad = jnp.zeros((B, seq_pad, 1), jnp.float32).at[:batch, :seq].set(x)
    x_tm = jnp.transpose(x_pad, (1, 0, 2))                # (seq_pad, B, 1)

    # Layer 1 (bidirectional, fused fwd+bwd): full output sequence in bf16.
    x2 = run_lstm_layer1(x_tm, params["l0"]["wih"], params["l0"]["whh"],
                         params["l0"]["b"], seq_tile=seq_tile,
                         seq_valid=seq)                   # (seq_pad, B, 1024) bf16

    # Layer 2 (bidirectional, fused): final states, already concatenated as
    # cat(h_n[-1] backward, h_n[-2] forward) to match the PyTorch module.
    output = run_lstm_layer2_final(
        x2, params["l1"]["wih"], params["l1"]["whh"], params["l1"]["b"],
        seq_tile=seq_tile, seq_valid=seq)                 # (B, 1024) f32

    logits = run_heads(output, params["Wm"], params["bm"],
                       params["Wo"], params["bo"])        # (B, 128) lane-padded

    result = {}
    off = 0
    for name, k_sz in HEAD_SIZES.items():
        result[name] = logits[:batch, off:off + k_sz]
        off += k_sz
    return result


if __name__ == "__main__":
    key = jax.random.PRNGKey(0)
    batch, seq = 2, 8
    x = jax.random.normal(key, (batch, seq, 1), dtype=jnp.float32)

    params = init_params(jax.random.PRNGKey(42))
    out = forward(params, x)
    out = jax.tree_util.tree_map(jax.block_until_ready, out)

    expected = {"privilege_required": (2, 4), "attack_vector": (2, 2),
                "impact_1": (2, 5), "impact_2": (2, 7), "impact_3": (2, 4)}
    for name, shp in expected.items():
        assert out[name].shape == shp, (name, out[name].shape)
        assert jnp.all(jnp.isfinite(out[name]))
    print("KERNEL_OK")
</pallas_src>

<mosaic_0001>
module attributes {stable_mosaic.version = 11 : i64} {
  func.func @_lstm_layer1_kernel(%arg0: i32, %arg1: i32, %arg2: memref<8x16x1xf32, #tpu.memory_space<vmem>>, %arg3: memref<1x1x2048xf32, #tpu.memory_space<vmem>>, %arg4: memref<1x512x2048xbf16, #tpu.memory_space<vmem>>, %arg5: memref<1x1x2048xf32, #tpu.memory_space<vmem>>, %arg6: memref<8x16x512xbf16, #tpu.memory_space<vmem>>, %arg7: memref<8x16x2048xf32, #tpu.memory_space<vmem>>, %arg8: memref<16x512xf32, #tpu.memory_space<vmem>>, %arg9: memref<16x512xf32, #tpu.memory_space<vmem>>) attributes {dimension_semantics = [#tpu.dimension_semantics<parallel>, #tpu.dimension_semantics<arbitrary>], iteration_bounds = array<i64: 2, 1>, scalar_prefetch = 0 : i64, scratch_operands = 3 : i64, tpu.core_type = #tpu.core_type<tc>, window_params = [{transform_indices = @transform_0, window_bounds = array<i64: 8, 16, 1>}, {transform_indices = @transform_1, window_bounds = array<i64: 1, 1, 2048>}, {transform_indices = @transform_2, window_bounds = array<i64: 1, 512, 2048>}, {transform_indices = @transform_3, window_bounds = array<i64: 1, 1, 2048>}, {transform_indices = @transform_4, window_bounds = array<i64: 8, 16, 512>}]} {
    %c0_i32 = arith.constant 0 : i32
    %0 = arith.cmpi eq, %arg1, %c0_i32 : i32
    %1 = arith.extui %0 : i1 to i32
    %c0_i32_0 = arith.constant 0 : i32
    %2 = arith.cmpi ne, %1, %c0_i32_0 : i32
    scf.if %2 {
      %cst = arith.constant 0.000000e+00 : f32
      %17 = vector.broadcast %cst : f32 to vector<16x512xf32>
      %c0_14 = arith.constant 0 : index
      %c0_15 = arith.constant 0 : index
      %18 = vector.load %arg8[%c0_14, %c0_15] : memref<16x512xf32, #tpu.memory_space<vmem>>, vector<16x512xf32>
      tpu.vector_store %arg8[%c0_14, %c0_15], %17 {strides = array<i32>} : memref<16x512xf32, #tpu.memory_space<vmem>>, vector<16x512xf32>,
      %cst_16 = arith.constant 0.000000e+00 : f32
      %19 = vector.broadcast %cst_16 : f32 to vector<16x512xf32>
      %c0_17 = arith.constant 0 : index
      %c0_18 = arith.constant 0 : index
      %20 = vector.load %arg9[%c0_17, %c0_18] : memref<16x512xf32, #tpu.memory_space<vmem>>, vector<16x512xf32>
      tpu.vector_store %arg9[%c0_17, %c0_18], %19 {strides = array<i32>} : memref<16x512xf32, #tpu.memory_space<vmem>>, vector<16x512xf32>,
    } else {
    }
    %c0 = arith.constant 0 : index
    %c0_1 = arith.constant 0 : index
    %c0_2 = arith.constant 0 : index
    %3 = vector.load %arg2[%c0, %c0_1, %c0_2] : memref<8x16x1xf32, #tpu.memory_space<vmem>>, vector<8x16x1xf32>
    %c0_3 = arith.constant 0 : index
    %c0_4 = arith.constant 0 : index
    %c0_5 = arith.constant 0 : index
    %4 = vector.load %arg3[%c0_3, %c0_4, %c0_5] : memref<1x1x2048xf32, #tpu.memory_space<vmem>>, vector<1x1x2048xf32>
    %5 = vector.shape_cast %4 : vector<1x1x2048xf32> to vector<1x2048xf32>
    %6 = vector.shape_cast %5 : vector<1x2048xf32> to vector<1x1x2048xf32>
    %7 = vector.broadcast %3 : vector<8x16x1xf32> to vector<8x16x2048xf32>
    %8 = vector.broadcast %6 : vector<1x1x2048xf32> to vector<8x16x2048xf32>
    %9 = arith.mulf %7, %8 : vector<8x16x2048xf32>
    %c0_6 = arith.constant 0 : index
    %c0_7 = arith.constant 0 : index
    %c0_8 = arith.constant 0 : index
    %10 = vector.load %arg5[%c0_6, %c0_7, %c0_8] : memref<1x1x2048xf32, #tpu.memory_space<vmem>>, vector<1x1x2048xf32>
    %11 = vector.shape_cast %10 : vector<1x1x2048xf32> to vector<1x2048xf32>
    %12 = vector.shape_cast %11 : vector<1x2048xf32> to vector<1x1x2048xf32>
    %13 = vector.broadcast %12 : vector<1x1x2048xf32> to vector<8x16x2048xf32>
    %14 = arith.addf %9, %13 : vector<8x16x2048xf32>
    %c0_9 = arith.constant 0 : index
    %c0_10 = arith.constant 0 : index
    %c0_11 = arith.constant 0 : index
    %15 = vector.load %arg7[%c0_9, %c0_10, %c0_11] : memref<8x16x2048xf32, #tpu.memory_space<vmem>>, vector<8x16x2048xf32>
    tpu.vector_store %arg7[%c0_9, %c0_10, %c0_11], %14 {strides = array<i32>} : memref<8x16x2048xf32, #tpu.memory_space<vmem>>, vector<8x16x2048xf32>,
    %c0_i32_12 = arith.constant 0 : i32
    %c8_i32 = arith.constant 8 : i32
    %16 = arith.addi %c0_i32_12, %c8_i32 : i32
    %c1_i32 = arith.constant 1 : i32
    scf.for %arg10 = %c0_i32_12 to %16 step %c1_i32  : i32 {
      %c2_i32 = arith.constant 2 : i32
      %17 = arith.muli %c2_i32, %arg10 : i32
      %c7_i32 = arith.constant 7 : i32
      %18 = arith.subi %c7_i32, %17 : i32
      %19 = arith.muli %arg0, %18 : i32
      %20 = arith.addi %arg10, %19 : i32
      %21 = arith.index_cast %20 : i32 to index
      %c0_14 = arith.constant 0 : index
      %c0_15 = arith.constant 0 : index
      %22 = vector.load %arg7[%21, %c0_14, %c0_15] : memref<8x16x2048xf32, #tpu.memory_space<vmem>>, vector<1x16x2048xf32>
      %23 = vector.shape_cast %22 : vector<1x16x2048xf32> to vector<16x2048xf32>
      %c0_16 = arith.constant 0 : index
      %c0_17 = arith.constant 0 : index
      %24 = vector.load %arg8[%c0_16, %c0_17] : memref<16x512xf32, #tpu.memory_space<vmem>>, vector<16x512xf32>
      %25 = arith.truncf %24 : vector<16x512xf32> to vector<16x512xbf16>
      %c0_18 = arith.constant 0 : index
      %c0_19 = arith.constant 0 : index
      %c0_20 = arith.constant 0 : index
      %26 = vector.load %arg4[%c0_18, %c0_19, %c0_20] : memref<1x512x2048xbf16, #tpu.memory_space<vmem>>, vector<1x512x2048xbf16>
      %27 = vector.shape_cast %26 : vector<1x512x2048xbf16> to vector<512x2048xbf16>
      %cst = arith.constant dense<0.000000e+00> : vector<16x2048xf32>
      %28 = tpu.matmul %25, %27, %cst {dimension_numbers = #tpu.dot_dimension_numbers<[1], [0], [0], [1], [0, 0, 1, 1], [], []>} : vector<16x512xbf16>, vector<512x2048xbf16>, vector<16x2048xf32> -> vector<16x2048xf32>
      %29 = arith.addf %23, %28 : vector<16x2048xf32>
      %30 = vector.extract_strided_slice %29 {offsets = [0, 0], sizes = [16, 512], strides = [1, 1]} : vector<16x2048xf32> to vector<16x512xf32>
      %cst_21 = arith.constant 5.000000e-01 : f32
      %31 = vector.broadcast %cst_21 : f32 to vector<16x512xf32>
      %32 = arith.mulf %31, %30 : vector<16x512xf32>
      %33 = math.tanh %32 : vector<16x512xf32>
      %cst_22 = arith.constant 5.000000e-01 : f32
      %34 = vector.broadcast %cst_22 : f32 to vector<16x512xf32>
      %35 = arith.mulf %34, %33 : vector<16x512xf32>
      %cst_23 = arith.constant 5.000000e-01 : f32
      %36 = vector.broadcast %cst_23 : f32 to vector<16x512xf32>
      %37 = arith.addf %35, %36 : vector<16x512xf32>
      %38 = vector.extract_strided_slice %29 {offsets = [0, 512], sizes = [16, 512], strides = [1, 1]} : vector<16x2048xf32> to vector<16x512xf32>
      %cst_24 = arith.constant 5.000000e-01 : f32
      %39 = vector.broadcast %cst_24 : f32 to vector<16x512xf32>
      %40 = arith.mulf %39, %38 : vector<16x512xf32>
      %41 = math.tanh %40 : vector<16x512xf32>
      %cst_25 = arith.constant 5.000000e-01 : f32
      %42 = vector.broadcast %cst_25 : f32 to vector<16x512xf32>
      %43 = arith.mulf %42, %41 : vector<16x512xf32>
      %cst_26 = arith.constant 5.000000e-01 : f32
      %44 = vector.broadcast %cst_26 : f32 to vector<16x512xf32>
      %45 = arith.addf %43, %44 : vector<16x512xf32>
      %46 = vector.extract_strided_slice %29 {offsets = [0, 1024], sizes = [16, 512], strides = [1, 1]} : vector<16x2048xf32> to vector<16x512xf32>
      %47 = math.tanh %46 : vector<16x512xf32>
      %48 = vector.extract_strided_slice %29 {offsets = [0, 1536], sizes = [16, 512], strides = [1, 1]} : vector<16x2048xf32> to vector<16x512xf32>
      %cst_27 = arith.constant 5.000000e-01 : f32
      %49 = vector.broadcast %cst_27 : f32 to vector<16x512xf32>
      %50 = arith.mulf %49, %48 : vector<16x512xf32>
      %51 = math.tanh %50 : vector<16x512xf32>
      %cst_28 = arith.constant 5.000000e-01 : f32
      %52 = vector.broadcast %cst_28 : f32 to vector<16x512xf32>
      %53 = arith.mulf %52, %51 : vector<16x512xf32>
      %cst_29 = arith.constant 5.000000e-01 : f32
      %54 = vector.broadcast %cst_29 : f32 to vector<16x512xf32>
      %55 = arith.addf %53, %54 : vector<16x512xf32>
      %c0_30 = arith.constant 0 : index
      %c0_31 = arith.constant 0 : index
      %56 = vector.load %arg9[%c0_30, %c0_31] : memref<16x512xf32, #tpu.memory_space<vmem>>, vector<16x512xf32>
      %57 = arith.mulf %45, %56 : vector<16x512xf32>
      %58 = arith.mulf %37, %47 : vector<16x512xf32>
      %59 = arith.addf %57, %58 : vector<16x512xf32>
      %60 = math.tanh %59 : vector<16x512xf32>
      %61 = arith.mulf %55, %60 : vector<16x512xf32>
      %c0_32 = arith.constant 0 : index
      %c0_33 = arith.constant 0 : index
      %62 = vector.load %arg9[%c0_32, %c0_33] : memref<16x512xf32, #tpu.memory_space<vmem>>, vector<16x512xf32>
      tpu.vector_store %arg9[%c0_32, %c0_33], %59 {strides = array<i32>} : memref<16x512xf32, #tpu.memory_space<vmem>>, vector<16x512xf32>,
      %c0_34 = arith.constant 0 : index
      %c0_35 = arith.constant 0 : index
      %63 = vector.load %arg8[%c0_34, %c0_35] : memref<16x512xf32, #tpu.memory_space<vmem>>, vector<16x512xf32>
      tpu.vector_store %arg8[%c0_34, %c0_35], %61 {strides = array<i32>} : memref<16x512xf32, #tpu.memory_space<vmem>>, vector<16x512xf32>,
      %64 = arith.truncf %61 : vector<16x512xf32> to vector<16x512xbf16>
      %65 = arith.index_cast %20 : i32 to index
      %c0_36 = arith.constant 0 : index
      %c0_37 = arith.constant 0 : index
      %66 = vector.load %arg6[%65, %c0_36, %c0_37] : memref<8x16x512xbf16, #tpu.memory_space<vmem>>, vector<1x16x512xbf16>
      %67 = vector.shape_cast %66 : vector<1x16x512xbf16> to vector<16x512xbf16>
      %68 = vector.shape_cast %64 : vector<16x512xbf16> to vector<1x16x512xbf16>
      tpu.vector_store %arg6[%65, %c0_36, %c0_37], %68 {strides = array<i32>} : memref<8x16x512xbf16, #tpu.memory_space<vmem>>, vector<1x16x512xbf16>,
    }
    %c8_i32_13 = arith.constant 8 : i32
    return
  }
  func.func @transform_0(%arg0: i32, %arg1: i32) -> (i32, i32, i32) {
    %c2_i32 = arith.constant 2 : i32
    %0 = arith.muli %c2_i32, %arg1 : i32
    %c0_i32 = arith.constant 0 : i32
    %1 = arith.subi %c0_i32, %0 : i32
    %2 = arith.muli %arg0, %1 : i32
    %3 = arith.addi %arg1, %2 : i32
    %c0_i32_0 = arith.constant 0 : i32
    %c0_i32_1 = arith.constant 0 : i32
    %c0_i32_2 = arith.constant 0 : i32
    return %3, %c0_i32_0, %c0_i32_1 : i32, i32, i32
  }
  func.func @transform_1(%arg0: i32, %arg1: i32) -> (i32, i32, i32) {
    %c0_i32 = arith.constant 0 : i32
    %c0_i32_0 = arith.constant 0 : i32
    %c0_i32_1 = arith.constant 0 : i32
    return %arg0, %c0_i32, %c0_i32_0 : i32, i32, i32
  }
  func.func @transform_2(%arg0: i32, %arg1: i32) -> (i32, i32, i32) {
    %c0_i32 = arith.constant 0 : i32
    %c0_i32_0 = arith.constant 0 : i32
    %c0_i32_1 = arith.constant 0 : i32
    return %arg0, %c0_i32, %c0_i32_0 : i32, i32, i32
  }
  func.func @transform_3(%arg0: i32, %arg1: i32) -> (i32, i32, i32) {
    %c0_i32 = arith.constant 0 : i32
    %c0_i32_0 = arith.constant 0 : i32
    %c0_i32_1 = arith.constant 0 : i32
    return %arg0, %c0_i32, %c0_i32_0 : i32, i32, i32
  }
  func.func @transform_4(%arg0: i32, %arg1: i32) -> (i32, i32, i32) {
    %c2_i32 = arith.constant 2 : i32
    %0 = arith.muli %c2_i32, %arg1 : i32
    %c0_i32 = arith.constant 0 : i32
    %1 = arith.subi %c0_i32, %0 : i32
    %2 = arith.muli %arg0, %1 : i32
    %3 = arith.addi %arg1, %2 : i32
    %c0_i32_0 = arith.constant 0 : i32
    %c0_i32_1 = arith.constant 0 : i32
    return %3, %c0_i32_0, %arg0 : i32, i32, i32
  }
}

</mosaic_0001>

<bundles_post_ra>
// kernel: tpu_custom_call.1
= control target key start
LH: loop header
LB: loop body
LE: loop exit
PB: predicated region body
PF: predicated region fallthrough
CT: control target
= control target key end

     0   :  { %s8163_s0 = inlined_call_operand.vmem [shape: f32[8,16,1], index: 0, kind: input, shape index: {}]   ;;  %s8164_s1 = inlined_call_operand.hbm [shape: f32[2,1,2048], index: 1, kind: input, shape index: {}]   ;;  %s8165_s2 = inlined_call_operand.hbm [shape: bf16[2,512,2048], index: 2, kind: input, shape index: {}]   ;;  %s8166_s3 = inlined_call_operand.hbm [shape: f32[2,1,2048], index: 3, kind: input, shape index: {}]   ;;  %s8167_s4 = inlined_call_operand.hbm [shape: bf16[8,16,1024], index: 4, kind: output, shape index: {}]  }
   0x1   :  { %8175 = sst [smem:[#allocation19_spill]] %s8165_s2 }
   0x2   :  { %9 = vsyncpa [#allocation6], 0 }
   0x3   :  { %11 = vsyncpa [#allocation6 + $0x1], 0 }
   0x4   :  { %12 = vsyncpa [#allocation9], 0 }
   0x5   :  { %14 = vsyncpa [#allocation9 + $0x1], 0 }
   0x6   :  { %15 = vsyncpa [#allocation7], 0 }
   0x7   :  { %17 = vsyncpa [#allocation7 + $0x1], 0  ;;  %s6620_s15 = smov 0   ;;  %s6622_s16 = smov 0  }
   0x8   :  { %s6624_s17 = smov 0   ;;  %s6626_s18 = smov 0  }
   0x9   :  { %s6628_s19 = smov 0   ;;  %s6630_s20 = smov 0  }
   0xa LB: > { %8176 = sst [smem:[#allocation15_spill]] %s6566_s17  ;;  %s6651_s21 = sadd.s32 4294967295, %s6578_s20   ;;  %s6578_s20 = sphi %s6630_s20, %s23_s20   ;;  %s6574_s19 = sphi %s6628_s19, %s8198_s19   ;;  %s6570_s18 = sphi %s6626_s18, %s8197_s18   ;;  %s6566_s17 = sphi %s6624_s17, %s8196_s17   ;;  %s6562_s16 = sphi %s6622_s16, %s8200_s16   ;;  %s6558_s15 = sphi %s6620_s15, %s8199_s15  }
   0xb   : > { %8177 = sst [smem:[#allocation16_spill]] %s6574_s19  ;;  %s5643_s22 = sadd.s32 4294967294, %s6578_s20  }
   0xc   : > { %s35_s23 = sadd.s32 1, %s6574_s19  ;;  %s76_s24 = sadd.s32 1, %s6566_s17 }
   0xd   : > { %p37_p0 = scmp.ge.s32.totalorder %s35_s23, 2  ;;  %p83_p1 = scmp.ne.s32.totalorder %s6566_s17, %s6562_s16 }
   0xe   : > { %p84_p2 = scmp.eq.s32.totalorder %s6578_s20, 0  ;;  %p89_p3 = scmp.ne.s32.totalorder %s6562_s16, %s6558_s15 }
   0xf   : > { %s8202_s23 = smov (%p37_p0, %s35_s23), 0  ;;  %p90_p5 = scmp.eq.s32.totalorder %s6651_s21, 0 }
  0x10   : > { %8178 = sst [smem:[#allocation17_spill]] %s8202_s23  ;;  %p6663_p4 = por %p84_p2, %p83_p1 }
  0x11   : > { %s73_s26 = ssub.s32 %s6574_s19, %s8202_s23  ;;  %p175_p6 = scmp.eq.s32.totalorder %s6651_s21, 1 }
  0x12   : > { %p74_p7 = scmp.eq.s32.totalorder %s73_s26, 0  ;;  %p6671_p8 = por %p90_p5, %p89_p3 }
  0x13   : > { %p6675_p9 = por %p175_p6, %p83_p1  ;;  %p181_p10 = scmp.eq.s32.totalorder %s5643_s22, 1 }
  0x14   : > { %s8180_s27 = scalar_select %p6671_p8, 1, 0 }
  0x15   : > { %s8181_s28 = scalar_select %p6675_p9, 1, 0 }
  0x16   : > { %s6680_s29 = scalar_select %p74_p7, %s6566_s17, %s76_s24  }
  0x17   : > { %p6682_p11 = por %p181_p10, %p89_p3  ;;  %p6251_p13 = scmp.lt.s32.totalorder %s6578_s20, 2 }
  0x18   : > { %8182 = sst [smem:[#allocation18_spill]] %s6680_s29  ;;  %s6689_s5 = sand.u32 1, %s6566_s17  }
  0x19   : > { %s8183_s30 = scalar_select %p6682_p11, 1, 0 }
  0x1a   : > { %s238_s6 = sand.u32 1, %s6578_s20   ;;  %s5650_s7 = sshll.u32 %s6689_s5, 12 }
  0x1b   : > { %p6695_p0 = pnand %p6251_p13, %p6663_p4  ;;  %s6188_s9 = sshll.u32 %s6574_s19, 16 }
  0x1c   : > { %s8185_s2 = sld [smem:[#allocation19_spill]]  ;;  %s242_s13 = scalar_lea.vmem [#allocation8], %s5650_s7 }
  0x1d   : > { %s8184_s8 = scalar_select %p6695_p0, 1, 0 }
  0x1e   : > { %s249_s14 = sshll.u32 %s242_s13, 4  ;;  %s6707_s22 = scalar_lea.sflag [#allocation9], %s238_s6  ;;  %s6705_s14 = int_to_ptr.vmem [resolvable:$true] %s249_s14 }
  0x1f   : > { %p6713_p2 = pneg %p6695_p0 }
  0x22   : > { %s6703_s12 = scalar_lea.hbm %s8185_s2, %s6188_s9  ;;  %s6403_s7 = scalar_lea.hbm %s8185_s2, 131072 }
  0x23   : > { %s6398_s24 = scalar_lea.hbm %s6703_s12, 65536  ;;  %p6404_p5 = scmp.lt.u32.totalorder %s6703_s12, %s8185_s2 }
  0x24   : > { %p6399_p1 = scmp.ne.s32.totalorder %s6703_s12, %s6398_s24  ;;  %p6405_p6 = scmp.lt.u32.totalorder %s6403_s7, %s6398_s24 }
  0x25   : > { %p6407_p10 = scmp.lt.u32.totalorder %s6398_s24, %s6703_s12 }
  0x26   : > { %p6401_p3 = pnand %p6713_p2, %p6399_p1  ;;  %p6406_p7 = por %p6405_p6, %p6404_p5 }
  0x28   : > { %p6402_p4 = pneg %p6401_p3  ;;  %p6408_p13 = por %p6407_p10, %p6406_p7 }
  0x2a   : > { %p6409_p12 = pnand %p6408_p13, %p6402_p4 }
  0x2c   : > { %6412 = shalt.err (!%p6409_p12)
}
  0x2d   : > { %s6413_s6 = scalar_lea.vmem %s6705_s14, 65536  ;;  %s6584_s13 = smov [#allocation8]  }
  0x2e   : > { %p6414_p1 = scmp.ne.s32.totalorder %s6705_s14, %s6413_s6  ;;  %s6418_s26 = sshll.u32 %s6584_s13, 4  ;;  %s6419_s26 = int_to_ptr.vmem [resolvable:$false] %s6418_s26 }
  0x2f   : > { %s6420_s9 = scalar_lea.vmem %s6419_s26, 131072  ;;  %p6421_p9 = scmp.lt.s32.totalorder %s6705_s14, %s6419_s26 }
  0x30   : > { %p6416_p3 = pnand %p6414_p1, %p6713_p2  ;;  %p6422_p8 = scmp.lt.s32.totalorder %s6420_s9, %s6413_s6 }
  0x32   : > { %p6417_p11 = pneg %p6416_p3  ;;  %p6423_p5 = por %p6422_p8, %p6421_p9 }
  0x34   : > { %p6424_p6 = pnand %p6423_p5, %p6417_p11 }
  0x36   : > { %6427 = shalt.err (!%p6424_p6)
}
  0x37   : > { %s6585_s24 = smov 1024   ;;  %s6586_s7 = smov 64  }
  0x38   : > { %6243 = dma.hbm_to_vmem [thread:$0]  (!%p6695_p0), %s6703_s12, 65536, %s6705_s14, %s6707_s22, %s6585_s24, %s6585_s24, %s6586_s7  }
  0x39   : > { %p5656_p12 = scmp.ge.s32.totalorder %s6578_s20, 1  ;;  %p276_p4 = scmp.lt.s32.totalorder %s6578_s20, 3 }
  0x3a   : > { %s8173_s11 = sshll.u32 %s6689_s5, 4  ;;  %s6187_s6 = sshll.u32 %s6574_s19, 8 }
  0x3b   : > { %p6739_p8 = pnand %p5656_p12, %p276_p4  ;;  %s6748_s9 = scalar_lea.hbm %s8164_s1, %s6187_s6 }
  0x3c   : > { %s223_s2 = scalar_lea.vmem [#allocation5], %s8173_s11  ;;  %s6757_s7 = scalar_lea.hbm %s8166_s3, %s6187_s6 }
  0x3d   : > { %s8187_s10 = scalar_select %p6739_p8, 1, 0 }
  0x3e   : > { %s231_s12 = sshll.u32 %s223_s2, 4  ;;  %s220_s23 = scalar_lea.sflag [#allocation6], %s6689_s5  ;;  %s6752_s12 = int_to_ptr.vmem [resolvable:$true] %s231_s12 }
  0x3f   : > { %s6428_s19 = scalar_lea.hbm %s6748_s9, 256  ;;  %s6433_s29 = scalar_lea.hbm %s8164_s1, 512 }
  0x40   : > { %p6429_p9 = scmp.ne.s32.totalorder %s6748_s9, %s6428_s19  ;;  %p6434_p10 = scmp.lt.u32.totalorder %s6748_s9, %s8164_s1 }
  0x41   : > { %p6435_p13 = scmp.lt.u32.totalorder %s6433_s29, %s6428_s19  ;;  %p6437_p3 = scmp.lt.u32.totalorder %s6428_s19, %s6748_s9 }
  0x42   : > { %p6431_p11 = pnand %p6429_p9, %p6713_p2 }
  0x43   : > { %p6436_p1 = por %p6435_p13, %p6434_p10 }
  0x44   : > { %p6432_p7 = pneg %p6431_p11 }
  0x45   : > { %p6438_p5 = por %p6437_p3, %p6436_p1 }
  0x47   : > { %p6439_p6 = pnand %p6438_p5, %p6432_p7 }
  0x49   : > { %6442 = shalt.err (!%p6439_p6)
}
  0x4a   : > { %s6443_s2 = scalar_lea.vmem %s6752_s12, 256  ;;  %s6587_s6 = smov [#allocation5]  }
  0x4b   : > { %p6444_p12 = scmp.ne.s32.totalorder %s6752_s12, %s6443_s2  ;;  %s6448_s14 = sshll.u32 %s6587_s6, 4  ;;  %s6449_s14 = int_to_ptr.vmem [resolvable:$false] %s6448_s14 }
  0x4c   : > { %s6450_s17 = scalar_lea.vmem %s6449_s14, 512  ;;  %p6451_p11 = scmp.lt.s32.totalorder %s6752_s12, %s6449_s14 }
  0x4d   : > { %p6446_p4 = pnand %p6444_p12, %p6713_p2  ;;  %p6452_p8 = scmp.lt.s32.totalorder %s6450_s17, %s6443_s2 }
  0x4f   : > { %p6447_p9 = pneg %p6446_p4  ;;  %p6453_p10 = por %p6452_p8, %p6451_p11 }
  0x51   : > { %p6454_p13 = pnand %p6453_p10, %p6447_p9 }
  0x53   : > { %6457 = shalt.err (!%p6454_p13)
}
  0x54   : > { %6240 = dma.hbm_to_vmem [thread:$0]  (!%p6695_p0), %s6748_s9, 256, %s6752_s12, %s220_s23  }
  0x55   : > { %s8188_s19 = sshll.u32 %s6689_s5, 4  ;;  %s6458_s24 = scalar_lea.hbm %s6757_s7, 256 }
  0x56   : > { %s263_s29 = scalar_lea.vmem [#allocation10], %s8188_s19  ;;  %p6459_p7 = scmp.ne.s32.totalorder %s6757_s7, %s6458_s24 }
  0x57   : > { %s271_s11 = sshll.u32 %s263_s29, 4  ;;  %s6463_s2 = scalar_lea.hbm %s8166_s3, 512  ;;  %s272_s11 = int_to_ptr.vmem [resolvable:$true] %s271_s11 }
  0x58   : > { %p6461_p8 = pnand %p6459_p7, %p6713_p2  ;;  %p6464_p3 = scmp.lt.u32.totalorder %s6757_s7, %s8166_s3 }
  0x59   : > { %p6465_p5 = scmp.lt.u32.totalorder %s6463_s2, %s6458_s24  ;;  %p6467_p12 = scmp.lt.u32.totalorder %s6458_s24, %s6757_s7 }
  0x5a   : > { %p6462_p1 = pneg %p6461_p8 }
  0x5b   : > { %p6466_p6 = por %p6465_p5, %p6464_p3 }
  0x5d   : > { %p6468_p4 = por %p6467_p12, %p6466_p6 }
  0x5f   : > { %p6469_p9 = pnand %p6468_p4, %p6462_p1 }
  0x61   : > { %6472 = shalt.err (!%p6469_p9)
}
  0x62   : > { %s6473_s23 = scalar_lea.vmem %s272_s11, 256  ;;  %s6588_s5 = smov [#allocation10]  }
  0x63   : > { %p6474_p11 = scmp.ne.s32.totalorder %s272_s11, %s6473_s23  ;;  %s6478_s9 = sshll.u32 %s6588_s5, 4  ;;  %s6479_s9 = int_to_ptr.vmem [resolvable:$false] %s6478_s9 }
  0x64   : > { %s6480_s12 = scalar_lea.vmem %s6479_s9, 512  ;;  %p6481_p7 = scmp.lt.s32.totalorder %s272_s11, %s6479_s9 }
  0x65   : > { %p6476_p10 = pnand %p6474_p11, %p6713_p2  ;;  %p6482_p8 = scmp.lt.s32.totalorder %s6480_s12, %s6473_s23 }
  0x67   : > { %p6477_p13 = pneg %p6476_p10  ;;  %p6483_p0 = por %p6482_p8, %p6481_p7 }
  0x69   : > { %p6484_p3 = pnand %p6483_p0, %p6477_p13 }
  0x6b   : > { %6487 = shalt.err (!%p6484_p3)
}
  0x6c   : > { %p8189_p5 = scmp.ne.s32.totalorder %s8184_s8, 0  ;;  %p8190_p1 = scmp.ne.s32.totalorder %s8187_s10, 0 }
  0x6d   : > { %s6804_s25 = sand.u32 (!%p8190_p1), 1, %s6562_s16   ;;  %p8191_p0 = scmp.ne.s32.totalorder (!%p8190_p1), %s8180_s27, 0 }
  0x6e   : > { %6246 = dma.hbm_to_vmem [thread:$0]  (!%p8189_p5), %s6757_s7, 256, %s272_s11, %s6707_s22  }
  0x6f   : > { %280 = sbr.rel (%p8190_p1) target bundleno = 1187 (0x4a3), region = 36  ;;  %s5657_s17 = sshll.u32 (!%p8190_p1), %s6804_s25, 4 }
  0x70   : > { %s283_s19 = scalar_lea.sflag (!%p8190_p1), [#allocation6], %s6804_s25  ;;  %s6810_s29 = scalar_lea.vmem (!%p8190_p1), [#allocation5], %s5657_s17 }
  0x76   : > { %6545 = dma.done.wait (%p8191_p0), %s283_s19, 256  }
  0x77   : > { %6547 = vsyncadd (%p8191_p0), %s283_s19, 4294967040  ;;  %s291_s8 = sand.u32 1, %s6651_s21   ;;  %s5658_s22 = sshll.u32 %s6804_s25, 12 }
  0x78   : > { %s292_s10 = scalar_lea.sflag [#allocation9], %s291_s8  ;;  %s6818_s7 = scalar_lea.vmem [#allocation8], %s5658_s22 }
  0x79   : > { %6549 = dma.done.wait (%p8191_p0), %s292_s10, 65792  }
  0x7a   : > { %6551 = vsyncadd (%p8191_p0), %s292_s10, 4294901504  ;;  %v6589_v0 = vmov 0.0   ;;  %v6590_v1 = vmov 0   ;;  %v392_v2 = vld [vmem:[%s8163_s0 + $0x10] sm:$0xff]  ;;  %v390_v3 = vld [vmem:[%s8163_s0] sm:$0xff]  ;;  %v490_v18 = vlaneseq  ;;  %s304_s22 = scalar_lea.vmem [#allocation10], %s5657_s17 }
  0x7b   : > { %374 = vst [vmem:[#allocation3] sm:$0xff] %v6589_v0  ;;  %375 = vst [vmem:[#allocation3 + $0x8] sm:$0xff] %v6589_v0  ;;  %6317 = vset.pattern.permute.xlu1 %v6590_v1  ;;  %6316 = vset.pattern.permute.xlu0 %v6590_v1  ;;  %v393_v4 = vld [vmem:[%s8163_s0 + $0x18] sm:$0xff]  ;;  %v391_v5 = vld [vmem:[%s8163_s0 + $0x8] sm:$0xff]  ;;  %s5660_s17 = sshll.u32 %s6804_s25, 8  ;;  %s7457_s10 = smov 0  }
  0x7c   : > { %376 = vst [vmem:[#allocation3 + $0x10] sm:$0xff] %v6589_v0  ;;  %377 = vst [vmem:[#allocation3 + $0x18] sm:$0xff] %v6589_v0  ;;  %420 = vperm.xlu1 %6317, %v392_v2   ;;  %410 = vperm.xlu0 %6316, %v390_v3   ;;  %v395_v6 = vld [vmem:[%s8163_s0 + $0x28] sm:$0xff]  ;;  %v394_v7 = vld [vmem:[%s8163_s0 + $0x20] sm:$0xff]  ;;  %v491_v19 = vshrl.u32 %v490_v18, 7 }
  0x7d   : > { %378 = vst [vmem:[#allocation3 + $0x20] sm:$0xff] %v6589_v0  ;;  %379 = vst [vmem:[#allocation3 + $0x28] sm:$0xff] %v6589_v0  ;;  %v397_v8 = vld [vmem:[%s8163_s0 + $0x38] sm:$0xff]  ;;  %v396_v9 = vld [vmem:[%s8163_s0 + $0x30] sm:$0xff] }
  0x7e   : > { %380 = vst [vmem:[#allocation3 + $0x30] sm:$0xff] %v6589_v0  ;;  %381 = vst [vmem:[#allocation3 + $0x38] sm:$0xff] %v6589_v0  ;;  %v399_v10 = vld [vmem:[%s8163_s0 + $0x48] sm:$0xff]  ;;  %v398_v11 = vld [vmem:[%s8163_s0 + $0x40] sm:$0xff]  ;;  %v492_v20 = vsub.s32 0, %v491_v19  ;;  %v496_v21 = vsub.s32 1, %v491_v19 }
  0x7f   : > { %382 = vst [vmem:[#allocation4] sm:$0xff] %v6589_v0  ;;  %383 = vst [vmem:[#allocation4 + $0x8] sm:$0xff] %v6589_v0  ;;  %v401_v12 = vld [vmem:[%s8163_s0 + $0x58] sm:$0xff]  ;;  %v400_v13 = vld [vmem:[%s8163_s0 + $0x50] sm:$0xff]  ;;  %v500_v22 = vsub.s32 2, %v491_v19  ;;  %v504_v23 = vsub.s32 3, %v491_v19 }
  0x80   : > { %384 = vst [vmem:[#allocation4 + $0x10] sm:$0xff] %v6589_v0  ;;  %385 = vst [vmem:[#allocation4 + $0x18] sm:$0xff] %v6589_v0  ;;  %425 = vperm.xlu1 %6317, %v393_v4   ;;  %415 = vperm.xlu0 %6316, %v391_v5   ;;  %v403_v14 = vld [vmem:[%s8163_s0 + $0x68] sm:$0xff]  ;;  %v402_v15 = vld [vmem:[%s8163_s0 + $0x60] sm:$0xff]  ;;  %v508_v25 = vsub.s32 4, %v491_v19  ;;  %v512_v26 = vsub.s32 5, %v491_v19 }
  0x81   : > { %386 = vst [vmem:[#allocation4 + $0x20] sm:$0xff] %v6589_v0  ;;  %387 = vst [vmem:[#allocation4 + $0x28] sm:$0xff] %v6589_v0  ;;  %v405_v16 = vld [vmem:[%s8163_s0 + $0x78] sm:$0xff]  ;;  %v404_v17 = vld [vmem:[%s8163_s0 + $0x70] sm:$0xff]  ;;  %v516_v27 = vsub.s32 6, %v491_v19  ;;  %v520_v28 = vsub.s32 7, %v491_v19 }
  0x82   : > { %388 = vst [vmem:[#allocation4 + $0x30] sm:$0xff] %v6589_v0  ;;  %389 = vst [vmem:[#allocation4 + $0x38] sm:$0xff] %v6589_v0  ;;  %v406_v24 = vld [vmem:[%s6810_s29] sm:$0xff]  ;;  %v407_v29 = vld [vmem:[%s6810_s29 + $0x8] sm:$0xff]  ;;  %s7455_s29 = scalar_lea.vmem [#allocation11], %s5660_s17 }
  0x83   : > { %v6874_v30 = vrot.slane %v406_v24, %v492_v20  ;;  %v6876_v31 = vrot.slane %v406_v24, %v496_v21  ;;  %v6878_v32 = vrot.slane %v406_v24, %v500_v22  ;;  %v6880_v33 = vrot.slane %v406_v24, %v504_v23  ;;  %v826_v38 = vld [vmem:[%s304_s22] sm:$0xff]  ;;  %v827_v47 = vld [vmem:[%s304_s22 + $0x8] sm:$0xff] }
  0x84   : > { %435 = vperm.xlu1 %6317, %v395_v6   ;;  %430 = vperm.xlu0 %6316, %v394_v7   ;;  %v6882_v34 = vrot.slane %v406_v24, %v508_v25  ;;  %v6884_v35 = vrot.slane %v406_v24, %v512_v26  ;;  %v6886_v36 = vrot.slane %v406_v24, %v516_v27 }
  0x85   : > { %v6888_v37 = vrot.slane %v406_v24, %v520_v28  ;;  %v6892_v39 = vrot.slane %v407_v29, %v492_v20  ;;  %v6894_v40 = vrot.slane %v407_v29, %v496_v21  ;;  %v6896_v41 = vrot.slane %v407_v29, %v500_v22 }
  0x86   : > { %v6898_v42 = vrot.slane %v407_v29, %v504_v23  ;;  %v6900_v43 = vrot.slane %v407_v29, %v508_v25  ;;  %v6902_v44 = vrot.slane %v407_v29, %v512_v26  ;;  %v6904_v45 = vrot.slane %v407_v29, %v516_v27 }
  0x87   : > { %v6906_v46 = vrot.slane %v407_v29, %v520_v28  ;;  %v6908_v48 = vrot.slane %v826_v38, %v492_v20  ;;  %v6910_v49 = vrot.slane %v826_v38, %v496_v21  ;;  %v6912_v50 = vrot.slane %v826_v38, %v500_v22 }
  0x88   : > { %445 = vperm.xlu1 %6317, %v397_v8   ;;  %440 = vperm.xlu0 %6316, %v396_v9   ;;  %v6914_v51 = vrot.slane %v826_v38, %v504_v23  ;;  %v6916_v52 = vrot.slane %v826_v38, %v508_v25  ;;  %v6918_v53 = vrot.slane %v826_v38, %v512_v26 }
  0x89   : > { %v6920_v54 = vrot.slane %v826_v38, %v516_v27  ;;  %v6922_v55 = vrot.slane %v826_v38, %v520_v28  ;;  %v6924_v56 = vrot.slane %v827_v47, %v492_v20  ;;  %v6926_v57 = vrot.slane %v827_v47, %v496_v21 }
  0x8a   : > { %v6928_v58 = vrot.slane %v827_v47, %v500_v22  ;;  %v6930_v59 = vrot.slane %v827_v47, %v504_v23  ;;  %v6932_v60 = vrot.slane %v827_v47, %v508_v25  ;;  %v6934_v61 = vrot.slane %v827_v47, %v512_v26 }
  0x8b   : > { %v6936_v62 = vrot.slane %v827_v47, %v516_v27  ;;  %v6938_v63 = vrot.slane %v827_v47, %v520_v28 }
  0x8c   : > { %455 = vperm.xlu1 %6317, %v399_v10   ;;  %450 = vperm.xlu0 %6316, %v398_v11  }
  0x90   : > { %465 = vperm.xlu1 %6317, %v401_v12   ;;  %460 = vperm.xlu0 %6316, %v400_v13  }
  0x94   : > { %475 = vperm.xlu1 %6317, %v403_v14   ;;  %470 = vperm.xlu0 %6316, %v402_v15  }
  0x98   : > { %485 = vperm.xlu1 %6317, %v405_v16   ;;  %480 = vperm.xlu0 %6316, %v404_v17  }
  0xfb   : > { %v421_v0 = vpop.permute.xlu1 %420  ;;  %v411_v25 = vpop.permute.xlu0 %410 }
  0xfc   : > { %v602_v1 = vmul.f32 %v6874_v30, %v421_v0  ;;  %v603_v2 = vmul.f32 %v6876_v31, %v421_v0  ;;  %v604_v3 = vmul.f32 %v6878_v32, %v421_v0  ;;  %v605_v4 = vmul.f32 %v6880_v33, %v421_v0 }
  0xfd   : > { %v606_v5 = vmul.f32 %v6882_v34, %v421_v0  ;;  %v607_v6 = vmul.f32 %v6884_v35, %v421_v0  ;;  %v608_v7 = vmul.f32 %v6886_v36, %v421_v0  ;;  %v609_v8 = vmul.f32 %v6888_v37, %v421_v0 }
  0xfe   : > { %v610_v9 = vmul.f32 %v6892_v39, %v421_v0  ;;  %v611_v10 = vmul.f32 %v6894_v40, %v421_v0  ;;  %v612_v11 = vmul.f32 %v6896_v41, %v421_v0  ;;  %v613_v12 = vmul.f32 %v6898_v42, %v421_v0 }
  0xff   : > { %v614_v13 = vmul.f32 %v6900_v43, %v421_v0  ;;  %v615_v14 = vmul.f32 %v6902_v44, %v421_v0  ;;  %v616_v15 = vmul.f32 %v6904_v45, %v421_v0  ;;  %v617_v16 = vmul.f32 %v6906_v46, %v421_v0 }
 0x100   : > { %v942_v17 = vadd.f32 %v6908_v48, %v602_v1  ;;  %v943_v18 = vadd.f32 %v6910_v49, %v603_v2  ;;  %v944_v19 = vadd.f32 %v6912_v50, %v604_v3  ;;  %v945_v20 = vadd.f32 %v6914_v51, %v605_v4 }
 0x101   : > { %v946_v21 = vadd.f32 %v6916_v52, %v606_v5  ;;  %v947_v22 = vadd.f32 %v6918_v53, %v607_v6  ;;  %v948_v23 = vadd.f32 %v6920_v54, %v608_v7  ;;  %v949_v24 = vadd.f32 %v6922_v55, %v609_v8 }
 0x102   : > { %v950_v26 = vadd.f32 %v6924_v56, %v610_v9  ;;  %v951_v27 = vadd.f32 %v6926_v57, %v611_v10  ;;  %v952_v28 = vadd.f32 %v6928_v58, %v612_v11  ;;  %v953_v29 = vadd.f32 %v6930_v59, %v613_v12  ;;  %1198 = vst [vmem:[#allocation2 + $0x100] sm:$0xff] %v942_v17 }
 0x103   : > { %1199 = vst [vmem:[#allocation2 + $0x108] sm:$0xff] %v943_v18  ;;  %1200 = vst [vmem:[#allocation2 + $0x110] sm:$0xff] %v944_v19  ;;  %v954_v38 = vadd.f32 %v6932_v60, %v614_v13  ;;  %v955_v47 = vadd.f32 %v6934_v61, %v615_v14  ;;  %v956_v0 = vadd.f32 %v6936_v62, %v616_v15 }
 0x104   : > { %1201 = vst [vmem:[#allocation2 + $0x118] sm:$0xff] %v945_v20  ;;  %v957_v1 = vadd.f32 %v6938_v63, %v617_v16  ;;  %1202 = vst [vmem:[#allocation2 + $0x120] sm:$0xff] %v946_v21  ;;  %v570_v2 = vmul.f32 %v6874_v30, %v411_v25  ;;  %v571_v3 = vmul.f32 %v6876_v31, %v411_v25 }
 0x105   : > { %1203 = vst [vmem:[#allocation2 + $0x128] sm:$0xff] %v947_v22  ;;  %1204 = vst [vmem:[#allocation2 + $0x130] sm:$0xff] %v948_v23  ;;  %v572_v4 = vmul.f32 %v6878_v32, %v411_v25  ;;  %v573_v5 = vmul.f32 %v6880_v33, %v411_v25  ;;  %v574_v6 = vmul.f32 %v6882_v34, %v411_v25 }
 0x106   : > { %1205 = vst [vmem:[#allocation2 + $0x138] sm:$0xff] %v949_v24  ;;  %1206 = vst [vmem:[#allocation2 + $0x140] sm:$0xff] %v950_v26  ;;  %v575_v7 = vmul.f32 %v6884_v35, %v411_v25  ;;  %v576_v8 = vmul.f32 %v6886_v36, %v411_v25  ;;  %v577_v9 = vmul.f32 %v6888_v37, %v411_v25 }
 0x107   : > { %1207 = vst [vmem:[#allocation2 + $0x148] sm:$0xff] %v951_v27  ;;  %1208 = vst [vmem:[#allocation2 + $0x150] sm:$0xff] %v952_v28  ;;  %v578_v10 = vmul.f32 %v6892_v39, %v411_v25  ;;  %v579_v11 = vmul.f32 %v6894_v40, %v411_v25  ;;  %v580_v12 = vmul.f32 %v6896_v41, %v411_v25  ;;  %v426_v27 = vpop.permute.xlu1 %425 }
 0x108   : > { %1209 = vst [vmem:[#allocation2 + $0x158] sm:$0xff] %v953_v29  ;;  %1210 = vst [vmem:[#allocation2 + $0x160] sm:$0xff] %v954_v38  ;;  %v581_v13 = vmul.f32 %v6898_v42, %v411_v25  ;;  %v582_v14 = vmul.f32 %v6900_v43, %v411_v25  ;;  %v583_v15 = vmul.f32 %v6902_v44, %v411_v25 }
 0x109   : > { %1211 = vst [vmem:[#allocation2 + $0x168] sm:$0xff] %v955_v47  ;;  %1212 = vst [vmem:[#allocation2 + $0x170] sm:$0xff] %v956_v0  ;;  %v584_v16 = vmul.f32 %v6904_v45, %v411_v25  ;;  %v585_v17 = vmul.f32 %v6906_v46, %v411_v25  ;;  %v910_v18 = vadd.f32 %v6908_v48, %v570_v2 }
 0x10a   : > { %1213 = vst [vmem:[#allocation2 + $0x178] sm:$0xff] %v957_v1  ;;  %v911_v19 = vadd.f32 %v6910_v49, %v571_v3  ;;  %v912_v20 = vadd.f32 %v6912_v50, %v572_v4  ;;  %v913_v21 = vadd.f32 %v6914_v51, %v573_v5  ;;  %v914_v22 = vadd.f32 %v6916_v52, %v574_v6 }
 0x10b   : > { %v915_v23 = vadd.f32 %v6918_v53, %v575_v7  ;;  %v916_v24 = vadd.f32 %v6920_v54, %v576_v8  ;;  %v917_v26 = vadd.f32 %v6922_v55, %v577_v9  ;;  %v918_v28 = vadd.f32 %v6924_v56, %v578_v10  ;;  %1166 = vst [vmem:[#allocation2] sm:$0xff] %v910_v18 }
 0x10c   : > { %v919_v25 = vadd.f32 %v6926_v57, %v579_v11  ;;  %v920_v29 = vadd.f32 %v6928_v58, %v580_v12  ;;  %v921_v38 = vadd.f32 %v6930_v59, %v581_v13  ;;  %1167 = vst [vmem:[#allocation2 + $0x8] sm:$0xff] %v911_v19  ;;  %1168 = vst [vmem:[#allocation2 + $0x10] sm:$0xff] %v912_v20 }
 0x10d   : > { %1169 = vst [vmem:[#allocation2 + $0x18] sm:$0xff] %v913_v21  ;;  %v922_v47 = vadd.f32 %v6932_v60, %v582_v14  ;;  %v923_v0 = vadd.f32 %v6934_v61, %v583_v15  ;;  %v924_v1 = vadd.f32 %v6936_v62, %v584_v16  ;;  %v925_v2 = vadd.f32 %v6938_v63, %v585_v17 }
 0x10e   : > { %1170 = vst [vmem:[#allocation2 + $0x20] sm:$0xff] %v914_v22  ;;  %1171 = vst [vmem:[#allocation2 + $0x28] sm:$0xff] %v915_v23  ;;  %v618_v3 = vmul.f32 %v6874_v30, %v426_v27  ;;  %v619_v4 = vmul.f32 %v6876_v31, %v426_v27  ;;  %v620_v5 = vmul.f32 %v6878_v32, %v426_v27 }
 0x10f   : > { %1172 = vst [vmem:[#allocation2 + $0x30] sm:$0xff] %v916_v24  ;;  %1173 = vst [vmem:[#allocation2 + $0x38] sm:$0xff] %v917_v26  ;;  %v621_v6 = vmul.f32 %v6880_v33, %v426_v27  ;;  %v622_v7 = vmul.f32 %v6882_v34, %v426_v27  ;;  %v623_v8 = vmul.f32 %v6884_v35, %v426_v27 }
 0x110   : > { %1174 = vst [vmem:[#allocation2 + $0x40] sm:$0xff] %v918_v28  ;;  %1175 = vst [vmem:[#allocation2 + $0x48] sm:$0xff] %v919_v25  ;;  %v624_v9 = vmul.f32 %v6886_v36, %v426_v27  ;;  %v625_v10 = vmul.f32 %v6888_v37, %v426_v27  ;;  %v626_v11 = vmul.f32 %v6892_v39, %v426_v27  ;;  %v416_v25 = vpop.permute.xlu0 %415 }
 0x111   : > { %1176 = vst [vmem:[#allocation2 + $0x50] sm:$0xff] %v920_v29  ;;  %1177 = vst [vmem:[#allocation2 + $0x58] sm:$0xff] %v921_v38  ;;  %v627_v12 = vmul.f32 %v6894_v40, %v426_v27  ;;  %v628_v13 = vmul.f32 %v6896_v41, %v426_v27  ;;  %v629_v14 = vmul.f32 %v6898_v42, %v426_v27 }
 0x112   : > { %1178 = vst [vmem:[#allocation2 + $0x60] sm:$0xff] %v922_v47  ;;  %1179 = vst [vmem:[#allocation2 + $0x68] sm:$0xff] %v923_v0  ;;  %v630_v15 = vmul.f32 %v6900_v43, %v426_v27  ;;  %v631_v16 = vmul.f32 %v6902_v44, %v426_v27  ;;  %v632_v17 = vmul.f32 %v6904_v45, %v426_v27 }
 0x113   : > { %1180 = vst [vmem:[#allocation2 + $0x70] sm:$0xff] %v924_v1  ;;  %1181 = vst [vmem:[#allocation2 + $0x78] sm:$0xff] %v925_v2  ;;  %v633_v18 = vmul.f32 %v6906_v46, %v426_v27  ;;  %v958_v19 = vadd.f32 %v6908_v48, %v618_v3  ;;  %v959_v20 = vadd.f32 %v6910_v49, %v619_v4 }
 0x114   : > { %v960_v21 = vadd.f32 %v6912_v50, %v620_v5  ;;  %v961_v22 = vadd.f32 %v6914_v51, %v621_v6  ;;  %v962_v23 = vadd.f32 %v6916_v52, %v622_v7  ;;  %v963_v24 = vadd.f32 %v6918_v53, %v623_v8 }
 0x115   : > { %v964_v26 = vadd.f32 %v6920_v54, %v624_v9  ;;  %v965_v28 = vadd.f32 %v6922_v55, %v625_v10  ;;  %v966_v29 = vadd.f32 %v6924_v56, %v626_v11  ;;  %v967_v27 = vadd.f32 %v6926_v57, %v627_v12  ;;  %1214 = vst [vmem:[#allocation2 + $0x180] sm:$0xff] %v958_v19 }
 0x116   : > { %v968_v38 = vadd.f32 %v6928_v58, %v628_v13  ;;  %v969_v47 = vadd.f32 %v6930_v59, %v629_v14  ;;  %1215 = vst [vmem:[#allocation2 + $0x188] sm:$0xff] %v959_v20  ;;  %1216 = vst [vmem:[#allocation2 + $0x190] sm:$0xff] %v960_v21  ;;  %v970_v0 = vadd.f32 %v6932_v60, %v630_v15 }
 0x117   : > { %1217 = vst [vmem:[#allocation2 + $0x198] sm:$0xff] %v961_v22  ;;  %v971_v1 = vadd.f32 %v6934_v61, %v631_v16  ;;  %v972_v2 = vadd.f32 %v6936_v62, %v632_v17  ;;  %v973_v3 = vadd.f32 %v6938_v63, %v633_v18  ;;  %1218 = vst [vmem:[#allocation2 + $0x1a0] sm:$0xff] %v962_v23 }
 0x118   : > { %1219 = vst [vmem:[#allocation2 + $0x1a8] sm:$0xff] %v963_v24  ;;  %1220 = vst [vmem:[#allocation2 + $0x1b0] sm:$0xff] %v964_v26  ;;  %v586_v4 = vmul.f32 %v6874_v30, %v416_v25  ;;  %v587_v5 = vmul.f32 %v6876_v31, %v416_v25  ;;  %v588_v6 = vmul.f32 %v6878_v32, %v416_v25 }
 0x119   : > { %1221 = vst [vmem:[#allocation2 + $0x1b8] sm:$0xff] %v965_v28  ;;  %1222 = vst [vmem:[#allocation2 + $0x1c0] sm:$0xff] %v966_v29  ;;  %v589_v7 = vmul.f32 %v6880_v33, %v416_v25  ;;  %v590_v8 = vmul.f32 %v6882_v34, %v416_v25  ;;  %v591_v9 = vmul.f32 %v6884_v35, %v416_v25 }
 0x11a   : > { %1223 = vst [vmem:[#allocation2 + $0x1c8] sm:$0xff] %v967_v27  ;;  %1224 = vst [vmem:[#allocation2 + $0x1d0] sm:$0xff] %v968_v38  ;;  %v592_v10 = vmul.f32 %v6886_v36, %v416_v25  ;;  %v593_v11 = vmul.f32 %v6888_v37, %v416_v25  ;;  %v594_v12 = vmul.f32 %v6892_v39, %v416_v25  ;;  %v436_v27 = vpop.permute.xlu1 %435 }
 0x11b   : > { %1225 = vst [vmem:[#allocation2 + $0x1d8] sm:$0xff] %v969_v47  ;;  %1226 = vst [vmem:[#allocation2 + $0x1e0] sm:$0xff] %v970_v0  ;;  %v595_v13 = vmul.f32 %v6894_v40, %v416_v25  ;;  %v596_v14 = vmul.f32 %v6896_v41, %v416_v25  ;;  %v597_v15 = vmul.f32 %v6898_v42, %v416_v25 }
 0x11c   : > { %1227 = vst [vmem:[#allocation2 + $0x1e8] sm:$0xff] %v971_v1  ;;  %1228 = vst [vmem:[#allocation2 + $0x1f0] sm:$0xff] %v972_v2  ;;  %v598_v16 = vmul.f32 %v6900_v43, %v416_v25  ;;  %v599_v17 = vmul.f32 %v6902_v44, %v416_v25  ;;  %v600_v18 = vmul.f32 %v6904_v45, %v416_v25 }
 0x11d   : > { %1229 = vst [vmem:[#allocation2 + $0x1f8] sm:$0xff] %v973_v3  ;;  %v601_v19 = vmul.f32 %v6906_v46, %v416_v25  ;;  %v926_v20 = vadd.f32 %v6908_v48, %v586_v4  ;;  %v927_v21 = vadd.f32 %v6910_v49, %v587_v5  ;;  %v928_v22 = vadd.f32 %v6912_v50, %v588_v6 }
 0x11e   : > { %v929_v23 = vadd.f32 %v6914_v51, %v589_v7  ;;  %v930_v24 = vadd.f32 %v6916_v52, %v590_v8  ;;  %v931_v26 = vadd.f32 %v6918_v53, %v591_v9  ;;  %v932_v28 = vadd.f32 %v6920_v54, %v592_v10 }
 0x11f   : > { %v933_v29 = vadd.f32 %v6922_v55, %v593_v11  ;;  %v934_v38 = vadd.f32 %v6924_v56, %v594_v12  ;;  %v935_v25 = vadd.f32 %v6926_v57, %v595_v13  ;;  %v936_v47 = vadd.f32 %v6928_v58, %v596_v14  ;;  %1182 = vst [vmem:[#allocation2 + $0x80] sm:$0xff] %v926_v20 }
 0x120   : > { %v937_v0 = vadd.f32 %v6930_v59, %v597_v15  ;;  %1183 = vst [vmem:[#allocation2 + $0x88] sm:$0xff] %v927_v21  ;;  %1184 = vst [vmem:[#allocation2 + $0x90] sm:$0xff] %v928_v22  ;;  %v938_v1 = vadd.f32 %v6932_v60, %v598_v16  ;;  %v939_v2 = vadd.f32 %v6934_v61, %v599_v17 }
 0x121   : > { %1185 = vst [vmem:[#allocation2 + $0x98] sm:$0xff] %v929_v23  ;;  %v940_v3 = vadd.f32 %v6936_v62, %v600_v18  ;;  %v941_v4 = vadd.f32 %v6938_v63, %v601_v19  ;;  %1186 = vst [vmem:[#allocation2 + $0xa0] sm:$0xff] %v930_v24  ;;  %v650_v5 = vmul.f32 %v6874_v30, %v436_v27 }
 0x122   : > { %1187 = vst [vmem:[#allocation2 + $0xa8] sm:$0xff] %v931_v26  ;;  %1188 = vst [vmem:[#allocation2 + $0xb0] sm:$0xff] %v932_v28  ;;  %v651_v6 = vmul.f32 %v6876_v31, %v436_v27  ;;  %v652_v7 = vmul.f32 %v6878_v32, %v436_v27  ;;  %v653_v8 = vmul.f32 %v6880_v33, %v436_v27 }
 0x123   : > { %1189 = vst [vmem:[#allocation2 + $0xb8] sm:$0xff] %v933_v29  ;;  %1190 = vst [vmem:[#allocation2 + $0xc0] sm:$0xff] %v934_v38  ;;  %v654_v9 = vmul.f32 %v6882_v34, %v436_v27  ;;  %v655_v10 = vmul.f32 %v6884_v35, %v436_v27  ;;  %v656_v11 = vmul.f32 %v6886_v36, %v436_v27 }
 0x124   : > { %1191 = vst [vmem:[#allocation2 + $0xc8] sm:$0xff] %v935_v25  ;;  %1192 = vst [vmem:[#allocation2 + $0xd0] sm:$0xff] %v936_v47  ;;  %v657_v12 = vmul.f32 %v6888_v37, %v436_v27  ;;  %v658_v13 = vmul.f32 %v6892_v39, %v436_v27  ;;  %v659_v14 = vmul.f32 %v6894_v40, %v436_v27  ;;  %v431_v25 = vpop.permute.xlu0 %430 }
 0x125   : > { %1193 = vst [vmem:[#allocation2 + $0xd8] sm:$0xff] %v937_v0  ;;  %1194 = vst [vmem:[#allocation2 + $0xe0] sm:$0xff] %v938_v1  ;;  %v660_v15 = vmul.f32 %v6896_v41, %v436_v27  ;;  %v661_v16 = vmul.f32 %v6898_v42, %v436_v27  ;;  %v662_v17 = vmul.f32 %v6900_v43, %v436_v27 }
 0x126   : > { %1195 = vst [vmem:[#allocation2 + $0xe8] sm:$0xff] %v939_v2  ;;  %1196 = vst [vmem:[#allocation2 + $0xf0] sm:$0xff] %v940_v3  ;;  %v663_v18 = vmul.f32 %v6902_v44, %v436_v27  ;;  %v664_v19 = vmul.f32 %v6904_v45, %v436_v27  ;;  %v665_v20 = vmul.f32 %v6906_v46, %v436_v27 }
 0x127   : > { %1197 = vst [vmem:[#allocation2 + $0xf8] sm:$0xff] %v941_v4  ;;  %v990_v21 = vadd.f32 %v6908_v48, %v650_v5  ;;  %v991_v22 = vadd.f32 %v6910_v49, %v651_v6  ;;  %v992_v23 = vadd.f32 %v6912_v50, %v652_v7  ;;  %v993_v24 = vadd.f32 %v6914_v51, %v653_v8 }
 0x128   : > { %v994_v26 = vadd.f32 %v6916_v52, %v654_v9  ;;  %v995_v28 = vadd.f32 %v6918_v53, %v655_v10  ;;  %v996_v29 = vadd.f32 %v6920_v54, %v656_v11  ;;  %v997_v38 = vadd.f32 %v6922_v55, %v657_v12 }
 0x129   : > { %v998_v47 = vadd.f32 %v6924_v56, %v658_v13  ;;  %v999_v27 = vadd.f32 %v6926_v57, %v659_v14  ;;  %v1000_v0 = vadd.f32 %v6928_v58, %v660_v15  ;;  %v1001_v1 = vadd.f32 %v6930_v59, %v661_v16  ;;  %1246 = vst [vmem:[#allocation2 + $0x280] sm:$0xff] %v990_v21 }
 0x12a   : > { %1247 = vst [vmem:[#allocation2 + $0x288] sm:$0xff] %v991_v22  ;;  %1248 = vst [vmem:[#allocation2 + $0x290] sm:$0xff] %v992_v23  ;;  %v1002_v2 = vadd.f32 %v6932_v60, %v662_v17  ;;  %v1003_v3 = vadd.f32 %v6934_v61, %v663_v18  ;;  %v1004_v4 = vadd.f32 %v6936_v62, %v664_v19 }
 0x12b   : > { %1249 = vst [vmem:[#allocation2 + $0x298] sm:$0xff] %v993_v24  ;;  %v1005_v5 = vadd.f32 %v6938_v63, %v665_v20  ;;  %1250 = vst [vmem:[#allocation2 + $0x2a0] sm:$0xff] %v994_v26  ;;  %v634_v6 = vmul.f32 %v6874_v30, %v431_v25  ;;  %v635_v7 = vmul.f32 %v6876_v31, %v431_v25 }
 0x12c   : > { %1251 = vst [vmem:[#allocation2 + $0x2a8] sm:$0xff] %v995_v28  ;;  %1252 = vst [vmem:[#allocation2 + $0x2b0] sm:$0xff] %v996_v29  ;;  %v636_v8 = vmul.f32 %v6878_v32, %v431_v25  ;;  %v637_v9 = vmul.f32 %v6880_v33, %v431_v25  ;;  %v638_v10 = vmul.f32 %v6882_v34, %v431_v25 }
 0x12d   : > { %1253 = vst [vmem:[#allocation2 + $0x2b8] sm:$0xff] %v997_v38  ;;  %1254 = vst [vmem:[#allocation2 + $0x2c0] sm:$0xff] %v998_v47  ;;  %v639_v11 = vmul.f32 %v6884_v35, %v431_v25  ;;  %v640_v12 = vmul.f32 %v6886_v36, %v431_v25  ;;  %v641_v13 = vmul.f32 %v6888_v37, %v431_v25 }
 0x12e   : > { %1255 = vst [vmem:[#allocation2 + $0x2c8] sm:$0xff] %v999_v27  ;;  %1256 = vst [vmem:[#allocation2 + $0x2d0] sm:$0xff] %v1000_v0  ;;  %v642_v14 = vmul.f32 %v6892_v39, %v431_v25  ;;  %v643_v15 = vmul.f32 %v6894_v40, %v431_v25  ;;  %v644_v16 = vmul.f32 %v6896_v41, %v431_v25  ;;  %v446_v27 = vpop.permute.xlu1 %445 }
 0x12f   : > { %1257 = vst [vmem:[#allocation2 + $0x2d8] sm:$0xff] %v1001_v1  ;;  %1258 = vst [vmem:[#allocation2 + $0x2e0] sm:$0xff] %v1002_v2  ;;  %v645_v17 = vmul.f32 %v6898_v42, %v431_v25  ;;  %v646_v18 = vmul.f32 %v6900_v43, %v431_v25  ;;  %v647_v19 = vmul.f32 %v6902_v44, %v431_v25 }
 0x130   : > { %1259 = vst [vmem:[#allocation2 + $0x2e8] sm:$0xff] %v1003_v3  ;;  %1260 = vst [vmem:[#allocation2 + $0x2f0] sm:$0xff] %v1004_v4  ;;  %v648_v20 = vmul.f32 %v6904_v45, %v431_v25  ;;  %v649_v21 = vmul.f32 %v6906_v46, %v431_v25  ;;  %v974_v22 = vadd.f32 %v6908_v48, %v634_v6 }
 0x131   : > { %1261 = vst [vmem:[#allocation2 + $0x2f8] sm:$0xff] %v1005_v5  ;;  %v975_v23 = vadd.f32 %v6910_v49, %v635_v7  ;;  %v976_v24 = vadd.f32 %v6912_v50, %v636_v8  ;;  %v977_v26 = vadd.f32 %v6914_v51, %v637_v9  ;;  %v978_v28 = vadd.f32 %v6916_v52, %v638_v10 }
 0x132   : > { %v979_v29 = vadd.f32 %v6918_v53, %v639_v11  ;;  %v980_v38 = vadd.f32 %v6920_v54, %v640_v12  ;;  %v981_v47 = vadd.f32 %v6922_v55, %v641_v13  ;;  %v982_v0 = vadd.f32 %v6924_v56, %v642_v14  ;;  %1230 = vst [vmem:[#allocation2 + $0x200] sm:$0xff] %v974_v22 }
 0x133   : > { %v983_v25 = vadd.f32 %v6926_v57, %v643_v15  ;;  %v984_v1 = vadd.f32 %v6928_v58, %v644_v16  ;;  %v985_v2 = vadd.f32 %v6930_v59, %v645_v17  ;;  %1231 = vst [vmem:[#allocation2 + $0x208] sm:$0xff] %v975_v23  ;;  %1232 = vst [vmem:[#allocation2 + $0x210] sm:$0xff] %v976_v24 }
 0x134   : > { %1233 = vst [vmem:[#allocation2 + $0x218] sm:$0xff] %v977_v26  ;;  %v986_v3 = vadd.f32 %v6932_v60, %v646_v18  ;;  %v987_v4 = vadd.f32 %v6934_v61, %v647_v19  ;;  %v988_v5 = vadd.f32 %v6936_v62, %v648_v20  ;;  %v989_v6 = vadd.f32 %v6938_v63, %v649_v21 }
 0x135   : > { %1234 = vst [vmem:[#allocation2 + $0x220] sm:$0xff] %v978_v28  ;;  %1235 = vst [vmem:[#allocation2 + $0x228] sm:$0xff] %v979_v29  ;;  %v682_v7 = vmul.f32 %v6874_v30, %v446_v27  ;;  %v683_v8 = vmul.f32 %v6876_v31, %v446_v27  ;;  %v684_v9 = vmul.f32 %v6878_v32, %v446_v27 }
 0x136   : > { %1236 = vst [vmem:[#allocation2 + $0x230] sm:$0xff] %v980_v38  ;;  %1237 = vst [vmem:[#allocation2 + $0x238] sm:$0xff] %v981_v47  ;;  %v685_v10 = vmul.f32 %v6880_v33, %v446_v27  ;;  %v686_v11 = vmul.f32 %v6882_v34, %v446_v27  ;;  %v687_v12 = vmul.f32 %v6884_v35, %v446_v27 }
 0x137   : > { %1238 = vst [vmem:[#allocation2 + $0x240] sm:$0xff] %v982_v0  ;;  %1239 = vst [vmem:[#allocation2 + $0x248] sm:$0xff] %v983_v25  ;;  %v688_v13 = vmul.f32 %v6886_v36, %v446_v27  ;;  %v689_v14 = vmul.f32 %v6888_v37, %v446_v27  ;;  %v690_v15 = vmul.f32 %v6892_v39, %v446_v27  ;;  %v441_v25 = vpop.permute.xlu0 %440 }
 0x138   : > { %1240 = vst [vmem:[#allocation2 + $0x250] sm:$0xff] %v984_v1  ;;  %1241 = vst [vmem:[#allocation2 + $0x258] sm:$0xff] %v985_v2  ;;  %v691_v16 = vmul.f32 %v6894_v40, %v446_v27  ;;  %v692_v17 = vmul.f32 %v6896_v41, %v446_v27  ;;  %v693_v18 = vmul.f32 %v6898_v42, %v446_v27 }
 0x139   : > { %1242 = vst [vmem:[#allocation2 + $0x260] sm:$0xff] %v986_v3  ;;  %1243 = vst [vmem:[#allocation2 + $0x268] sm:$0xff] %v987_v4  ;;  %v694_v19 = vmul.f32 %v6900_v43, %v446_v27  ;;  %v695_v20 = vmul.f32 %v6902_v44, %v446_v27  ;;  %v696_v21 = vmul.f32 %v6904_v45, %v446_v27 }
 0x13a   : > { %1244 = vst [vmem:[#allocation2 + $0x270] sm:$0xff] %v988_v5  ;;  %1245 = vst [vmem:[#allocation2 + $0x278] sm:$0xff] %v989_v6  ;;  %v697_v22 = vmul.f32 %v6906_v46, %v446_v27  ;;  %v1022_v23 = vadd.f32 %v6908_v48, %v682_v7  ;;  %v1023_v24 = vadd.f32 %v6910_v49, %v683_v8 }
 0x13b   : > { %v1024_v26 = vadd.f32 %v6912_v50, %v684_v9  ;;  %v1025_v28 = vadd.f32 %v6914_v51, %v685_v10  ;;  %v1026_v29 = vadd.f32 %v6916_v52, %v686_v11  ;;  %v1027_v38 = vadd.f32 %v6918_v53, %v687_v12 }
 0x13c   : > { %v1028_v47 = vadd.f32 %v6920_v54, %v688_v13  ;;  %v1029_v0 = vadd.f32 %v6922_v55, %v689_v14  ;;  %v1030_v1 = vadd.f32 %v6924_v56, %v690_v15  ;;  %v1031_v27 = vadd.f32 %v6926_v57, %v691_v16  ;;  %1278 = vst [vmem:[#allocation2 + $0x380] sm:$0xff] %v1022_v23 }
 0x13d   : > { %v1032_v2 = vadd.f32 %v6928_v58, %v692_v17  ;;  %v1033_v3 = vadd.f32 %v6930_v59, %v693_v18  ;;  %1279 = vst [vmem:[#allocation2 + $0x388] sm:$0xff] %v1023_v24  ;;  %1280 = vst [vmem:[#allocation2 + $0x390] sm:$0xff] %v1024_v26  ;;  %v1034_v4 = vadd.f32 %v6932_v60, %v694_v19 }
 0x13e   : > { %1281 = vst [vmem:[#allocation2 + $0x398] sm:$0xff] %v1025_v28  ;;  %v1035_v5 = vadd.f32 %v6934_v61, %v695_v20  ;;  %v1036_v6 = vadd.f32 %v6936_v62, %v696_v21  ;;  %v1037_v7 = vadd.f32 %v6938_v63, %v697_v22  ;;  %1282 = vst [vmem:[#allocation2 + $0x3a0] sm:$0xff] %v1026_v29 }
 0x13f   : > { %1283 = vst [vmem:[#allocation2 + $0x3a8] sm:$0xff] %v1027_v38  ;;  %1284 = vst [vmem:[#allocation2 + $0x3b0] sm:$0xff] %v1028_v47  ;;  %v666_v8 = vmul.f32 %v6874_v30, %v441_v25  ;;  %v667_v9 = vmul.f32 %v6876_v31, %v441_v25  ;;  %v668_v10 = vmul.f32 %v6878_v32, %v441_v25 }
 0x140   : > { %1285 = vst [vmem:[#allocation2 + $0x3b8] sm:$0xff] %v1029_v0  ;;  %1286 = vst [vmem:[#allocation2 + $0x3c0] sm:$0xff] %v1030_v1  ;;  %v669_v11 = vmul.f32 %v6880_v33, %v441_v25  ;;  %v670_v12 = vmul.f32 %v6882_v34, %v441_v25  ;;  %v671_v13 = vmul.f32 %v6884_v35, %v441_v25 }
 0x141   : > { %1287 = vst [vmem:[#allocation2 + $0x3c8] sm:$0xff] %v1031_v27  ;;  %1288 = vst [vmem:[#allocation2 + $0x3d0] sm:$0xff] %v1032_v2  ;;  %v672_v14 = vmul.f32 %v6886_v36, %v441_v25  ;;  %v673_v15 = vmul.f32 %v6888_v37, %v441_v25  ;;  %v674_v16 = vmul.f32 %v6892_v39, %v441_v25  ;;  %v456_v27 = vpop.permute.xlu1 %455 }
 0x142   : > { %1289 = vst [vmem:[#allocation2 + $0x3d8] sm:$0xff] %v1033_v3  ;;  %1290 = vst [vmem:[#allocation2 + $0x3e0] sm:$0xff] %v1034_v4  ;;  %v675_v17 = vmul.f32 %v6894_v40, %v441_v25  ;;  %v676_v18 = vmul.f32 %v6896_v41, %v441_v25  ;;  %v677_v19 = vmul.f32 %v6898_v42, %v441_v25 }
 0x143   : > { %1291 = vst [vmem:[#allocation2 + $0x3e8] sm:$0xff] %v1035_v5  ;;  %1292 = vst [vmem:[#allocation2 + $0x3f0] sm:$0xff] %v1036_v6  ;;  %v678_v20 = vmul.f32 %v6900_v43, %v441_v25  ;;  %v679_v21 = vmul.f32 %v6902_v44, %v441_v25  ;;  %v680_v22 = vmul.f32 %v6904_v45, %v441_v25 }
 0x144   : > { %1293 = vst [vmem:[#allocation2 + $0x3f8] sm:$0xff] %v1037_v7  ;;  %v681_v23 = vmul.f32 %v6906_v46, %v441_v25  ;;  %v1006_v24 = vadd.f32 %v6908_v48, %v666_v8  ;;  %v1007_v26 = vadd.f32 %v6910_v49, %v667_v9  ;;  %v1008_v28 = vadd.f32 %v6912_v50, %v668_v10 }
 0x145   : > { %v1009_v29 = vadd.f32 %v6914_v51, %v669_v11  ;;  %v1010_v38 = vadd.f32 %v6916_v52, %v670_v12  ;;  %v1011_v47 = vadd.f32 %v6918_v53, %v671_v13  ;;  %v1012_v0 = vadd.f32 %v6920_v54, %v672_v14 }
 0x146   : > { %v1013_v1 = vadd.f32 %v6922_v55, %v673_v15  ;;  %v1014_v2 = vadd.f32 %v6924_v56, %v674_v16  ;;  %v1015_v25 = vadd.f32 %v6926_v57, %v675_v17  ;;  %v1016_v3 = vadd.f32 %v6928_v58, %v676_v18  ;;  %1262 = vst [vmem:[#allocation2 + $0x300] sm:$0xff] %v1006_v24 }
 0x147   : > { %v1017_v4 = vadd.f32 %v6930_v59, %v677_v19  ;;  %1263 = vst [vmem:[#allocation2 + $0x308] sm:$0xff] %v1007_v26  ;;  %1264 = vst [vmem:[#allocation2 + $0x310] sm:$0xff] %v1008_v28  ;;  %v1018_v5 = vadd.f32 %v6932_v60, %v678_v20  ;;  %v1019_v6 = vadd.f32 %v6934_v61, %v679_v21 }
 0x148   : > { %1265 = vst [vmem:[#allocation2 + $0x318] sm:$0xff] %v1009_v29  ;;  %v1020_v7 = vadd.f32 %v6936_v62, %v680_v22  ;;  %v1021_v8 = vadd.f32 %v6938_v63, %v681_v23  ;;  %1266 = vst [vmem:[#allocation2 + $0x320] sm:$0xff] %v1010_v38  ;;  %v714_v9 = vmul.f32 %v6874_v30, %v456_v27 }
 0x149   : > { %1267 = vst [vmem:[#allocation2 + $0x328] sm:$0xff] %v1011_v47  ;;  %1268 = vst [vmem:[#allocation2 + $0x330] sm:$0xff] %v1012_v0  ;;  %v715_v10 = vmul.f32 %v6876_v31, %v456_v27  ;;  %v716_v11 = vmul.f32 %v6878_v32, %v456_v27  ;;  %v717_v12 = vmul.f32 %v6880_v33, %v456_v27 }
 0x14a   : > { %1269 = vst [vmem:[#allocation2 + $0x338] sm:$0xff] %v1013_v1  ;;  %1270 = vst [vmem:[#allocation2 + $0x340] sm:$0xff] %v1014_v2  ;;  %v718_v13 = vmul.f32 %v6882_v34, %v456_v27  ;;  %v719_v14 = vmul.f32 %v6884_v35, %v456_v27  ;;  %v720_v15 = vmul.f32 %v6886_v36, %v456_v27 }
 0x14b   : > { %1271 = vst [vmem:[#allocation2 + $0x348] sm:$0xff] %v1015_v25  ;;  %1272 = vst [vmem:[#allocation2 + $0x350] sm:$0xff] %v1016_v3  ;;  %v721_v16 = vmul.f32 %v6888_v37, %v456_v27  ;;  %v722_v17 = vmul.f32 %v6892_v39, %v456_v27  ;;  %v723_v18 = vmul.f32 %v6894_v40, %v456_v27  ;;  %v451_v25 = vpop.permute.xlu0 %450 }
 0x14c   : > { %1273 = vst [vmem:[#allocation2 + $0x358] sm:$0xff] %v1017_v4  ;;  %1274 = vst [vmem:[#allocation2 + $0x360] sm:$0xff] %v1018_v5  ;;  %v724_v19 = vmul.f32 %v6896_v41, %v456_v27  ;;  %v725_v20 = vmul.f32 %v6898_v42, %v456_v27  ;;  %v726_v21 = vmul.f32 %v6900_v43, %v456_v27 }
 0x14d   : > { %1275 = vst [vmem:[#allocation2 + $0x368] sm:$0xff] %v1019_v6  ;;  %1276 = vst [vmem:[#allocation2 + $0x370] sm:$0xff] %v1020_v7  ;;  %v727_v22 = vmul.f32 %v6902_v44, %v456_v27  ;;  %v728_v23 = vmul.f32 %v6904_v45, %v456_v27  ;;  %v729_v24 = vmul.f32 %v6906_v46, %v456_v27 }
 0x14e   : > { %1277 = vst [vmem:[#allocation2 + $0x378] sm:$0xff] %v1021_v8  ;;  %v1054_v26 = vadd.f32 %v6908_v48, %v714_v9  ;;  %v1055_v28 = vadd.f32 %v6910_v49, %v715_v10  ;;  %v1056_v29 = vadd.f32 %v6912_v50, %v716_v11  ;;  %v1057_v38 = vadd.f32 %v6914_v51, %v717_v12 }
 0x14f   : > { %v1058_v47 = vadd.f32 %v6916_v52, %v718_v13  ;;  %v1059_v0 = vadd.f32 %v6918_v53, %v719_v14  ;;  %v1060_v1 = vadd.f32 %v6920_v54, %v720_v15  ;;  %v1061_v2 = vadd.f32 %v6922_v55, %v721_v16 }
 0x150   : > { %v1062_v3 = vadd.f32 %v6924_v56, %v722_v17  ;;  %v1063_v27 = vadd.f32 %v6926_v57, %v723_v18  ;;  %v1064_v4 = vadd.f32 %v6928_v58, %v724_v19  ;;  %v1065_v5 = vadd.f32 %v6930_v59, %v725_v20  ;;  %1310 = vst [vmem:[#allocation2 + $0x480] sm:$0xff] %v1054_v26 }
 0x151   : > { %1311 = vst [vmem:[#allocation2 + $0x488] sm:$0xff] %v1055_v28  ;;  %1312 = vst [vmem:[#allocation2 + $0x490] sm:$0xff] %v1056_v29  ;;  %v1066_v6 = vadd.f32 %v6932_v60, %v726_v21  ;;  %v1067_v7 = vadd.f32 %v6934_v61, %v727_v22  ;;  %v1068_v8 = vadd.f32 %v6936_v62, %v728_v23 }
 0x152   : > { %1313 = vst [vmem:[#allocation2 + $0x498] sm:$0xff] %v1057_v38  ;;  %v1069_v9 = vadd.f32 %v6938_v63, %v729_v24  ;;  %1314 = vst [vmem:[#allocation2 + $0x4a0] sm:$0xff] %v1058_v47  ;;  %v698_v10 = vmul.f32 %v6874_v30, %v451_v25  ;;  %v699_v11 = vmul.f32 %v6876_v31, %v451_v25 }
 0x153   : > { %1315 = vst [vmem:[#allocation2 + $0x4a8] sm:$0xff] %v1059_v0  ;;  %1316 = vst [vmem:[#allocation2 + $0x4b0] sm:$0xff] %v1060_v1  ;;  %v700_v12 = vmul.f32 %v6878_v32, %v451_v25  ;;  %v701_v13 = vmul.f32 %v6880_v33, %v451_v25  ;;  %v702_v14 = vmul.f32 %v6882_v34, %v451_v25 }
 0x154   : > { %1317 = vst [vmem:[#allocation2 + $0x4b8] sm:$0xff] %v1061_v2  ;;  %1318 = vst [vmem:[#allocation2 + $0x4c0] sm:$0xff] %v1062_v3  ;;  %v703_v15 = vmul.f32 %v6884_v35, %v451_v25  ;;  %v704_v16 = vmul.f32 %v6886_v36, %v451_v25  ;;  %v705_v17 = vmul.f32 %v6888_v37, %v451_v25 }
 0x155   : > { %1319 = vst [vmem:[#allocation2 + $0x4c8] sm:$0xff] %v1063_v27  ;;  %1320 = vst [vmem:[#allocation2 + $0x4d0] sm:$0xff] %v1064_v4  ;;  %v706_v18 = vmul.f32 %v6892_v39, %v451_v25  ;;  %v707_v19 = vmul.f32 %v6894_v40, %v451_v25  ;;  %v708_v20 = vmul.f32 %v6896_v41, %v451_v25  ;;  %v466_v27 = vpop.permute.xlu1 %465 }
 0x156   : > { %1321 = vst [vmem:[#allocation2 + $0x4d8] sm:$0xff] %v1065_v5  ;;  %1322 = vst [vmem:[#allocation2 + $0x4e0] sm:$0xff] %v1066_v6  ;;  %v709_v21 = vmul.f32 %v6898_v42, %v451_v25  ;;  %v710_v22 = vmul.f32 %v6900_v43, %v451_v25  ;;  %v711_v23 = vmul.f32 %v6902_v44, %v451_v25 }
 0x157   : > { %1323 = vst [vmem:[#allocation2 + $0x4e8] sm:$0xff] %v1067_v7  ;;  %1324 = vst [vmem:[#allocation2 + $0x4f0] sm:$0xff] %v1068_v8  ;;  %v712_v24 = vmul.f32 %v6904_v45, %v451_v25  ;;  %v713_v26 = vmul.f32 %v6906_v46, %v451_v25  ;;  %v1038_v28 = vadd.f32 %v6908_v48, %v698_v10 }
 0x158   : > { %1325 = vst [vmem:[#allocation2 + $0x4f8] sm:$0xff] %v1069_v9  ;;  %v1039_v29 = vadd.f32 %v6910_v49, %v699_v11  ;;  %v1040_v38 = vadd.f32 %v6912_v50, %v700_v12  ;;  %v1041_v47 = vadd.f32 %v6914_v51, %v701_v13  ;;  %v1042_v0 = vadd.f32 %v6916_v52, %v702_v14 }
 0x159   : > { %v1043_v1 = vadd.f32 %v6918_v53, %v703_v15  ;;  %v1044_v2 = vadd.f32 %v6920_v54, %v704_v16  ;;  %v1045_v3 = vadd.f32 %v6922_v55, %v705_v17  ;;  %v1046_v4 = vadd.f32 %v6924_v56, %v706_v18  ;;  %1294 = vst [vmem:[#allocation2 + $0x400] sm:$0xff] %v1038_v28 }
 0x15a   : > { %v1047_v25 = vadd.f32 %v6926_v57, %v707_v19  ;;  %v1048_v5 = vadd.f32 %v6928_v58, %v708_v20  ;;  %v1049_v6 = vadd.f32 %v6930_v59, %v709_v21  ;;  %1295 = vst [vmem:[#allocation2 + $0x408] sm:$0xff] %v1039_v29  ;;  %1296 = vst [vmem:[#allocation2 + $0x410] sm:$0xff] %v1040_v38 }
 0x15b   : > { %1297 = vst [vmem:[#allocation2 + $0x418] sm:$0xff] %v1041_v47  ;;  %v1050_v7 = vadd.f32 %v6932_v60, %v710_v22  ;;  %v1051_v8 = vadd.f32 %v6934_v61, %v711_v23  ;;  %v1052_v9 = vadd.f32 %v6936_v62, %v712_v24  ;;  %v1053_v10 = vadd.f32 %v6938_v63, %v713_v26 }
 0x15c   : > { %1298 = vst [vmem:[#allocation2 + $0x420] sm:$0xff] %v1042_v0  ;;  %1299 = vst [vmem:[#allocation2 + $0x428] sm:$0xff] %v1043_v1  ;;  %v746_v11 = vmul.f32 %v6874_v30, %v466_v27  ;;  %v747_v12 = vmul.f32 %v6876_v31, %v466_v27  ;;  %v748_v13 = vmul.f32 %v6878_v32, %v466_v27 }
 0x15d   : > { %1300 = vst [vmem:[#allocation2 + $0x430] sm:$0xff] %v1044_v2  ;;  %1301 = vst [vmem:[#allocation2 + $0x438] sm:$0xff] %v1045_v3  ;;  %v749_v14 = vmul.f32 %v6880_v33, %v466_v27  ;;  %v750_v15 = vmul.f32 %v6882_v34, %v466_v27  ;;  %v751_v16 = vmul.f32 %v6884_v35, %v466_v27 }
 0x15e   : > { %1302 = vst [vmem:[#allocation2 + $0x440] sm:$0xff] %v1046_v4  ;;  %1303 = vst [vmem:[#allocation2 + $0x448] sm:$0xff] %v1047_v25  ;;  %v752_v17 = vmul.f32 %v6886_v36, %v466_v27  ;;  %v753_v18 = vmul.f32 %v6888_v37, %v466_v27  ;;  %v754_v19 = vmul.f32 %v6892_v39, %v466_v27  ;;  %v461_v25 = vpop.permute.xlu0 %460 }
 0x15f   : > { %1304 = vst [vmem:[#allocation2 + $0x450] sm:$0xff] %v1048_v5  ;;  %1305 = vst [vmem:[#allocation2 + $0x458] sm:$0xff] %v1049_v6  ;;  %v755_v20 = vmul.f32 %v6894_v40, %v466_v27  ;;  %v756_v21 = vmul.f32 %v6896_v41, %v466_v27  ;;  %v757_v22 = vmul.f32 %v6898_v42, %v466_v27 }
 0x160   : > { %1306 = vst [vmem:[#allocation2 + $0x460] sm:$0xff] %v1050_v7  ;;  %1307 = vst [vmem:[#allocation2 + $0x468] sm:$0xff] %v1051_v8  ;;  %v758_v23 = vmul.f32 %v6900_v43, %v466_v27  ;;  %v759_v24 = vmul.f32 %v6902_v44, %v466_v27  ;;  %v760_v26 = vmul.f32 %v6904_v45, %v466_v27 }
 0x161   : > { %1308 = vst [vmem:[#allocation2 + $0x470] sm:$0xff] %v1052_v9  ;;  %1309 = vst [vmem:[#allocation2 + $0x478] sm:$0xff] %v1053_v10  ;;  %v761_v28 = vmul.f32 %v6906_v46, %v466_v27  ;;  %v1086_v29 = vadd.f32 %v6908_v48, %v746_v11  ;;  %v1087_v38 = vadd.f32 %v6910_v49, %v747_v12 }
 0x162   : > { %v1088_v47 = vadd.f32 %v6912_v50, %v748_v13  ;;  %v1089_v0 = vadd.f32 %v6914_v51, %v749_v14  ;;  %v1090_v1 = vadd.f32 %v6916_v52, %v750_v15  ;;  %v1091_v2 = vadd.f32 %v6918_v53, %v751_v16 }
 0x163   : > { %v1092_v3 = vadd.f32 %v6920_v54, %v752_v17  ;;  %v1093_v4 = vadd.f32 %v6922_v55, %v753_v18  ;;  %v1094_v5 = vadd.f32 %v6924_v56, %v754_v19  ;;  %v1095_v27 = vadd.f32 %v6926_v57, %v755_v20  ;;  %1342 = vst [vmem:[#allocation2 + $0x580] sm:$0xff] %v1086_v29 }
 0x164   : > { %v1096_v6 = vadd.f32 %v6928_v58, %v756_v21  ;;  %v1097_v7 = vadd.f32 %v6930_v59, %v757_v22  ;;  %1343 = vst [vmem:[#allocation2 + $0x588] sm:$0xff] %v1087_v38  ;;  %1344 = vst [vmem:[#allocation2 + $0x590] sm:$0xff] %v1088_v47  ;;  %v1098_v8 = vadd.f32 %v6932_v60, %v758_v23 }
 0x165   : > { %1345 = vst [vmem:[#allocation2 + $0x598] sm:$0xff] %v1089_v0  ;;  %v1099_v9 = vadd.f32 %v6934_v61, %v759_v24  ;;  %v1100_v10 = vadd.f32 %v6936_v62, %v760_v26  ;;  %v1101_v11 = vadd.f32 %v6938_v63, %v761_v28  ;;  %1346 = vst [vmem:[#allocation2 + $0x5a0] sm:$0xff] %v1090_v1 }
 0x166   : > { %1347 = vst [vmem:[#allocation2 + $0x5a8] sm:$0xff] %v1091_v2  ;;  %1348 = vst [vmem:[#allocation2 + $0x5b0] sm:$0xff] %v1092_v3  ;;  %v730_v12 = vmul.f32 %v6874_v30, %v461_v25  ;;  %v731_v13 = vmul.f32 %v6876_v31, %v461_v25  ;;  %v732_v14 = vmul.f32 %v6878_v32, %v461_v25 }
 0x167   : > { %1349 = vst [vmem:[#allocation2 + $0x5b8] sm:$0xff] %v1093_v4  ;;  %1350 = vst [vmem:[#allocation2 + $0x5c0] sm:$0xff] %v1094_v5  ;;  %v733_v15 = vmul.f32 %v6880_v33, %v461_v25  ;;  %v734_v16 = vmul.f32 %v6882_v34, %v461_v25  ;;  %v735_v17 = vmul.f32 %v6884_v35, %v461_v25 }
 0x168   : > { %1351 = vst [vmem:[#allocation2 + $0x5c8] sm:$0xff] %v1095_v27  ;;  %1352 = vst [vmem:[#allocation2 + $0x5d0] sm:$0xff] %v1096_v6  ;;  %v736_v18 = vmul.f32 %v6886_v36, %v461_v25  ;;  %v737_v19 = vmul.f32 %v6888_v37, %v461_v25  ;;  %v738_v20 = vmul.f32 %v6892_v39, %v461_v25  ;;  %v476_v27 = vpop.permute.xlu1 %475 }
 0x169   : > { %1353 = vst [vmem:[#allocation2 + $0x5d8] sm:$0xff] %v1097_v7  ;;  %1354 = vst [vmem:[#allocation2 + $0x5e0] sm:$0xff] %v1098_v8  ;;  %v739_v21 = vmul.f32 %v6894_v40, %v461_v25  ;;  %v740_v22 = vmul.f32 %v6896_v41, %v461_v25  ;;  %v741_v23 = vmul.f32 %v6898_v42, %v461_v25 }
 0x16a   : > { %1355 = vst [vmem:[#allocation2 + $0x5e8] sm:$0xff] %v1099_v9  ;;  %1356 = vst [vmem:[#allocation2 + $0x5f0] sm:$0xff] %v1100_v10  ;;  %v742_v24 = vmul.f32 %v6900_v43, %v461_v25  ;;  %v743_v26 = vmul.f32 %v6902_v44, %v461_v25  ;;  %v744_v28 = vmul.f32 %v6904_v45, %v461_v25 }
 0x16b   : > { %1357 = vst [vmem:[#allocation2 + $0x5f8] sm:$0xff] %v1101_v11  ;;  %v745_v29 = vmul.f32 %v6906_v46, %v461_v25  ;;  %v1070_v38 = vadd.f32 %v6908_v48, %v730_v12  ;;  %v1071_v47 = vadd.f32 %v6910_v49, %v731_v13  ;;  %v1072_v0 = vadd.f32 %v6912_v50, %v732_v14 }
 0x16c   : > { %v1073_v1 = vadd.f32 %v6914_v51, %v733_v15  ;;  %v1074_v2 = vadd.f32 %v6916_v52, %v734_v16  ;;  %v1075_v3 = vadd.f32 %v6918_v53, %v735_v17  ;;  %v1076_v4 = vadd.f32 %v6920_v54, %v736_v18 }
 0x16d   : > { %v1077_v5 = vadd.f32 %v6922_v55, %v737_v19  ;;  %v1078_v6 = vadd.f32 %v6924_v56, %v738_v20  ;;  %v1079_v25 = vadd.f32 %v6926_v57, %v739_v21  ;;  %v1080_v7 = vadd.f32 %v6928_v58, %v740_v22  ;;  %1326 = vst [vmem:[#allocation2 + $0x500] sm:$0xff] %v1070_v38 }
 0x16e   : > { %v1081_v8 = vadd.f32 %v6930_v59, %v741_v23  ;;  %1327 = vst [vmem:[#allocation2 + $0x508] sm:$0xff] %v1071_v47  ;;  %1328 = vst [vmem:[#allocation2 + $0x510] sm:$0xff] %v1072_v0  ;;  %v1082_v9 = vadd.f32 %v6932_v60, %v742_v24  ;;  %v1083_v10 = vadd.f32 %v6934_v61, %v743_v26 }
 0x16f   : > { %1329 = vst [vmem:[#allocation2 + $0x518] sm:$0xff] %v1073_v1  ;;  %v1084_v11 = vadd.f32 %v6936_v62, %v744_v28  ;;  %v1085_v12 = vadd.f32 %v6938_v63, %v745_v29  ;;  %1330 = vst [vmem:[#allocation2 + $0x520] sm:$0xff] %v1074_v2  ;;  %v778_v13 = vmul.f32 %v6874_v30, %v476_v27 }
 0x170   : > { %1331 = vst [vmem:[#allocation2 + $0x528] sm:$0xff] %v1075_v3  ;;  %1332 = vst [vmem:[#allocation2 + $0x530] sm:$0xff] %v1076_v4  ;;  %v779_v14 = vmul.f32 %v6876_v31, %v476_v27  ;;  %v780_v15 = vmul.f32 %v6878_v32, %v476_v27  ;;  %v781_v16 = vmul.f32 %v6880_v33, %v476_v27 }
 0x171   : > { %1333 = vst [vmem:[#allocation2 + $0x538] sm:$0xff] %v1077_v5  ;;  %1334 = vst [vmem:[#allocation2 + $0x540] sm:$0xff] %v1078_v6  ;;  %v782_v17 = vmul.f32 %v6882_v34, %v476_v27  ;;  %v783_v18 = vmul.f32 %v6884_v35, %v476_v27  ;;  %v784_v19 = vmul.f32 %v6886_v36, %v476_v27 }
 0x172   : > { %1335 = vst [vmem:[#allocation2 + $0x548] sm:$0xff] %v1079_v25  ;;  %1336 = vst [vmem:[#allocation2 + $0x550] sm:$0xff] %v1080_v7  ;;  %v785_v20 = vmul.f32 %v6888_v37, %v476_v27  ;;  %v786_v21 = vmul.f32 %v6892_v39, %v476_v27  ;;  %v787_v22 = vmul.f32 %v6894_v40, %v476_v27  ;;  %v471_v25 = vpop.permute.xlu0 %470 }
 0x173   : > { %1337 = vst [vmem:[#allocation2 + $0x558] sm:$0xff] %v1081_v8  ;;  %1338 = vst [vmem:[#allocation2 + $0x560] sm:$0xff] %v1082_v9  ;;  %v788_v23 = vmul.f32 %v6896_v41, %v476_v27  ;;  %v789_v24 = vmul.f32 %v6898_v42, %v476_v27  ;;  %v790_v26 = vmul.f32 %v6900_v43, %v476_v27 }
 0x174   : > { %1339 = vst [vmem:[#allocation2 + $0x568] sm:$0xff] %v1083_v10  ;;  %1340 = vst [vmem:[#allocation2 + $0x570] sm:$0xff] %v1084_v11  ;;  %v791_v28 = vmul.f32 %v6902_v44, %v476_v27  ;;  %v792_v29 = vmul.f32 %v6904_v45, %v476_v27  ;;  %v793_v38 = vmul.f32 %v6906_v46, %v476_v27 }
 0x175   : > { %1341 = vst [vmem:[#allocation2 + $0x578] sm:$0xff] %v1085_v12  ;;  %v1118_v47 = vadd.f32 %v6908_v48, %v778_v13  ;;  %v1119_v0 = vadd.f32 %v6910_v49, %v779_v14  ;;  %v1120_v1 = vadd.f32 %v6912_v50, %v780_v15  ;;  %v1121_v2 = vadd.f32 %v6914_v51, %v781_v16 }
 0x176   : > { %v1122_v3 = vadd.f32 %v6916_v52, %v782_v17  ;;  %v1123_v4 = vadd.f32 %v6918_v53, %v783_v18  ;;  %v1124_v5 = vadd.f32 %v6920_v54, %v784_v19  ;;  %v1125_v6 = vadd.f32 %v6922_v55, %v785_v20 }
 0x177   : > { %v1126_v7 = vadd.f32 %v6924_v56, %v786_v21  ;;  %v1127_v27 = vadd.f32 %v6926_v57, %v787_v22  ;;  %v1128_v8 = vadd.f32 %v6928_v58, %v788_v23  ;;  %v1129_v9 = vadd.f32 %v6930_v59, %v789_v24  ;;  %1374 = vst [vmem:[#allocation2 + $0x680] sm:$0xff] %v1118_v47 }
 0x178   : > { %1375 = vst [vmem:[#allocation2 + $0x688] sm:$0xff] %v1119_v0  ;;  %1376 = vst [vmem:[#allocation2 + $0x690] sm:$0xff] %v1120_v1  ;;  %v1130_v10 = vadd.f32 %v6932_v60, %v790_v26  ;;  %v1131_v11 = vadd.f32 %v6934_v61, %v791_v28  ;;  %v1132_v12 = vadd.f32 %v6936_v62, %v792_v29 }
 0x179   : > { %1377 = vst [vmem:[#allocation2 + $0x698] sm:$0xff] %v1121_v2  ;;  %v1133_v13 = vadd.f32 %v6938_v63, %v793_v38  ;;  %1378 = vst [vmem:[#allocation2 + $0x6a0] sm:$0xff] %v1122_v3  ;;  %v762_v14 = vmul.f32 %v6874_v30, %v471_v25  ;;  %v763_v15 = vmul.f32 %v6876_v31, %v471_v25 }
 0x17a   : > { %1379 = vst [vmem:[#allocation2 + $0x6a8] sm:$0xff] %v1123_v4  ;;  %1380 = vst [vmem:[#allocation2 + $0x6b0] sm:$0xff] %v1124_v5  ;;  %v764_v16 = vmul.f32 %v6878_v32, %v471_v25  ;;  %v765_v17 = vmul.f32 %v6880_v33, %v471_v25  ;;  %v766_v18 = vmul.f32 %v6882_v34, %v471_v25 }
 0x17b   : > { %1381 = vst [vmem:[#allocation2 + $0x6b8] sm:$0xff] %v1125_v6  ;;  %1382 = vst [vmem:[#allocation2 + $0x6c0] sm:$0xff] %v1126_v7  ;;  %v767_v19 = vmul.f32 %v6884_v35, %v471_v25  ;;  %v768_v20 = vmul.f32 %v6886_v36, %v471_v25  ;;  %v769_v21 = vmul.f32 %v6888_v37, %v471_v25 }
 0x17c   : > { %1383 = vst [vmem:[#allocation2 + $0x6c8] sm:$0xff] %v1127_v27  ;;  %1384 = vst [vmem:[#allocation2 + $0x6d0] sm:$0xff] %v1128_v8  ;;  %v770_v22 = vmul.f32 %v6892_v39, %v471_v25  ;;  %v771_v23 = vmul.f32 %v6894_v40, %v471_v25  ;;  %v772_v24 = vmul.f32 %v6896_v41, %v471_v25  ;;  %v486_v27 = vpop.permute.xlu1 %485 }
 0x17d   : > { %1385 = vst [vmem:[#allocation2 + $0x6d8] sm:$0xff] %v1129_v9  ;;  %1386 = vst [vmem:[#allocation2 + $0x6e0] sm:$0xff] %v1130_v10  ;;  %v773_v26 = vmul.f32 %v6898_v42, %v471_v25  ;;  %v774_v28 = vmul.f32 %v6900_v43, %v471_v25  ;;  %v775_v29 = vmul.f32 %v6902_v44, %v471_v25 }
 0x17e   : > { %1387 = vst [vmem:[#allocation2 + $0x6e8] sm:$0xff] %v1131_v11  ;;  %1388 = vst [vmem:[#allocation2 + $0x6f0] sm:$0xff] %v1132_v12  ;;  %v776_v38 = vmul.f32 %v6904_v45, %v471_v25  ;;  %v777_v47 = vmul.f32 %v6906_v46, %v471_v25  ;;  %v1102_v0 = vadd.f32 %v6908_v48, %v762_v14 }
 0x17f   : > { %1389 = vst [vmem:[#allocation2 + $0x6f8] sm:$0xff] %v1133_v13  ;;  %v1103_v1 = vadd.f32 %v6910_v49, %v763_v15  ;;  %v1104_v2 = vadd.f32 %v6912_v50, %v764_v16  ;;  %v1105_v3 = vadd.f32 %v6914_v51, %v765_v17  ;;  %v1106_v4 = vadd.f32 %v6916_v52, %v766_v18 }
 0x180   : > { %v1107_v5 = vadd.f32 %v6918_v53, %v767_v19  ;;  %v1108_v6 = vadd.f32 %v6920_v54, %v768_v20  ;;  %v1109_v7 = vadd.f32 %v6922_v55, %v769_v21  ;;  %v1110_v8 = vadd.f32 %v6924_v56, %v770_v22  ;;  %1358 = vst [vmem:[#allocation2 + $0x600] sm:$0xff] %v1102_v0 }
 0x181   : > { %v1111_v25 = vadd.f32 %v6926_v57, %v771_v23  ;;  %v1112_v9 = vadd.f32 %v6928_v58, %v772_v24  ;;  %v1113_v10 = vadd.f32 %v6930_v59, %v773_v26  ;;  %1359 = vst [vmem:[#allocation2 + $0x608] sm:$0xff] %v1103_v1  ;;  %1360 = vst [vmem:[#allocation2 + $0x610] sm:$0xff] %v1104_v2 }
 0x182   : > { %1361 = vst [vmem:[#allocation2 + $0x618] sm:$0xff] %v1105_v3  ;;  %v1114_v11 = vadd.f32 %v6932_v60, %v774_v28  ;;  %v1115_v12 = vadd.f32 %v6934_v61, %v775_v29  ;;  %v1116_v13 = vadd.f32 %v6936_v62, %v776_v38  ;;  %v1117_v14 = vadd.f32 %v6938_v63, %v777_v47 }
 0x183   : > { %1362 = vst [vmem:[#allocation2 + $0x620] sm:$0xff] %v1106_v4  ;;  %1363 = vst [vmem:[#allocation2 + $0x628] sm:$0xff] %v1107_v5  ;;  %v810_v15 = vmul.f32 %v6874_v30, %v486_v27  ;;  %v811_v16 = vmul.f32 %v6876_v31, %v486_v27  ;;  %v812_v17 = vmul.f32 %v6878_v32, %v486_v27 }
 0x184   : > { %1364 = vst [vmem:[#allocation2 + $0x630] sm:$0xff] %v1108_v6  ;;  %1365 = vst [vmem:[#allocation2 + $0x638] sm:$0xff] %v1109_v7  ;;  %v813_v18 = vmul.f32 %v6880_v33, %v486_v27  ;;  %v814_v19 = vmul.f32 %v6882_v34, %v486_v27  ;;  %v815_v20 = vmul.f32 %v6884_v35, %v486_v27 }
 0x185   : > { %1366 = vst [vmem:[#allocation2 + $0x640] sm:$0xff] %v1110_v8  ;;  %1367 = vst [vmem:[#allocation2 + $0x648] sm:$0xff] %v1111_v25  ;;  %v816_v21 = vmul.f32 %v6886_v36, %v486_v27  ;;  %v817_v22 = vmul.f32 %v6888_v37, %v486_v27  ;;  %v818_v23 = vmul.f32 %v6892_v39, %v486_v27  ;;  %v481_v25 = vpop.permute.xlu0 %480 }
 0x186   : > { %1368 = vst [vmem:[#allocation2 + $0x650] sm:$0xff] %v1112_v9  ;;  %1369 = vst [vmem:[#allocation2 + $0x658] sm:$0xff] %v1113_v10  ;;  %v819_v24 = vmul.f32 %v6894_v40, %v486_v27  ;;  %v820_v26 = vmul.f32 %v6896_v41, %v486_v27  ;;  %v821_v28 = vmul.f32 %v6898_v42, %v486_v27 }
 0x187   : > { %1370 = vst [vmem:[#allocation2 + $0x660] sm:$0xff] %v1114_v11  ;;  %1371 = vst [vmem:[#allocation2 + $0x668] sm:$0xff] %v1115_v12  ;;  %v822_v29 = vmul.f32 %v6900_v43, %v486_v27  ;;  %v823_v38 = vmul.f32 %v6902_v44, %v486_v27  ;;  %v824_v47 = vmul.f32 %v6904_v45, %v486_v27 }
 0x188   : > { %1372 = vst [vmem:[#allocation2 + $0x670] sm:$0xff] %v1116_v13  ;;  %1373 = vst [vmem:[#allocation2 + $0x678] sm:$0xff] %v1117_v14  ;;  %v825_v0 = vmul.f32 %v6906_v46, %v486_v27  ;;  %v1150_v1 = vadd.f32 %v6908_v48, %v810_v15  ;;  %v1151_v2 = vadd.f32 %v6910_v49, %v811_v16 }
 0x189   : > { %v1152_v3 = vadd.f32 %v6912_v50, %v812_v17  ;;  %v1153_v4 = vadd.f32 %v6914_v51, %v813_v18  ;;  %v1154_v5 = vadd.f32 %v6916_v52, %v814_v19  ;;  %v1155_v6 = vadd.f32 %v6918_v53, %v815_v20 }
 0x18a   : > { %v1156_v7 = vadd.f32 %v6920_v54, %v816_v21  ;;  %v1157_v8 = vadd.f32 %v6922_v55, %v817_v22  ;;  %v1158_v9 = vadd.f32 %v6924_v56, %v818_v23  ;;  %v1159_v27 = vadd.f32 %v6926_v57, %v819_v24  ;;  %1406 = vst [vmem:[#allocation2 + $0x780] sm:$0xff] %v1150_v1 }
 0x18b   : > { %v1160_v10 = vadd.f32 %v6928_v58, %v820_v26  ;;  %v1161_v11 = vadd.f32 %v6930_v59, %v821_v28  ;;  %1407 = vst [vmem:[#allocation2 + $0x788] sm:$0xff] %v1151_v2  ;;  %1408 = vst [vmem:[#allocation2 + $0x790] sm:$0xff] %v1152_v3  ;;  %v1162_v12 = vadd.f32 %v6932_v60, %v822_v29 }
 0x18c   : > { %1409 = vst [vmem:[#allocation2 + $0x798] sm:$0xff] %v1153_v4  ;;  %v1163_v13 = vadd.f32 %v6934_v61, %v823_v38  ;;  %v1164_v14 = vadd.f32 %v6936_v62, %v824_v47  ;;  %v1165_v15 = vadd.f32 %v6938_v63, %v825_v0  ;;  %1410 = vst [vmem:[#allocation2 + $0x7a0] sm:$0xff] %v1154_v5 }
 0x18d   : > { %1411 = vst [vmem:[#allocation2 + $0x7a8] sm:$0xff] %v1155_v6  ;;  %1412 = vst [vmem:[#allocation2 + $0x7b0] sm:$0xff] %v1156_v7  ;;  %v794_v16 = vmul.f32 %v6874_v30, %v481_v25  ;;  %v795_v17 = vmul.f32 %v6876_v31, %v481_v25  ;;  %v796_v18 = vmul.f32 %v6878_v32, %v481_v25 }
 0x18e   : > { %1413 = vst [vmem:[#allocation2 + $0x7b8] sm:$0xff] %v1157_v8  ;;  %1414 = vst [vmem:[#allocation2 + $0x7c0] sm:$0xff] %v1158_v9  ;;  %v797_v19 = vmul.f32 %v6880_v33, %v481_v25  ;;  %v798_v20 = vmul.f32 %v6882_v34, %v481_v25  ;;  %v799_v21 = vmul.f32 %v6884_v35, %v481_v25 }
 0x18f   : > { %1415 = vst [vmem:[#allocation2 + $0x7c8] sm:$0xff] %v1159_v27  ;;  %1416 = vst [vmem:[#allocation2 + $0x7d0] sm:$0xff] %v1160_v10  ;;  %v800_v22 = vmul.f32 %v6886_v36, %v481_v25  ;;  %v801_v23 = vmul.f32 %v6888_v37, %v481_v25  ;;  %v802_v30 = vmul.f32 %v6892_v39, %v481_v25 }
 0x190   : > { %1417 = vst [vmem:[#allocation2 + $0x7d8] sm:$0xff] %v1161_v11  ;;  %1418 = vst [vmem:[#allocation2 + $0x7e0] sm:$0xff] %v1162_v12  ;;  %v803_v31 = vmul.f32 %v6894_v40, %v481_v25  ;;  %v804_v32 = vmul.f32 %v6896_v41, %v481_v25  ;;  %v805_v33 = vmul.f32 %v6898_v42, %v481_v25 }
 0x191   : > { %1419 = vst [vmem:[#allocation2 + $0x7e8] sm:$0xff] %v1163_v13  ;;  %1420 = vst [vmem:[#allocation2 + $0x7f0] sm:$0xff] %v1164_v14  ;;  %v806_v24 = vmul.f32 %v6900_v43, %v481_v25  ;;  %v807_v26 = vmul.f32 %v6902_v44, %v481_v25  ;;  %v808_v34 = vmul.f32 %v6904_v45, %v481_v25 }
 0x192   : > { %1421 = vst [vmem:[#allocation2 + $0x7f8] sm:$0xff] %v1165_v15  ;;  %v809_v35 = vmul.f32 %v6906_v46, %v481_v25  ;;  %v1134_v36 = vadd.f32 %v6908_v48, %v794_v16  ;;  %v1135_v37 = vadd.f32 %v6910_v49, %v795_v17  ;;  %v1136_v39 = vadd.f32 %v6912_v50, %v796_v18 }
 0x193   : > { %v1137_v40 = vadd.f32 %v6914_v51, %v797_v19  ;;  %v1138_v41 = vadd.f32 %v6916_v52, %v798_v20  ;;  %v1139_v42 = vadd.f32 %v6918_v53, %v799_v21  ;;  %v1140_v43 = vadd.f32 %v6920_v54, %v800_v22 }
 0x194   : > { %v1141_v44 = vadd.f32 %v6922_v55, %v801_v23  ;;  %v1142_v45 = vadd.f32 %v6924_v56, %v802_v30  ;;  %v1143_v46 = vadd.f32 %v6926_v57, %v803_v31  ;;  %v1144_v48 = vadd.f32 %v6928_v58, %v804_v32  ;;  %1390 = vst [vmem:[#allocation2 + $0x700] sm:$0xff] %v1134_v36 }
 0x195   : > { %v1145_v49 = vadd.f32 %v6930_v59, %v805_v33  ;;  %1391 = vst [vmem:[#allocation2 + $0x708] sm:$0xff] %v1135_v37  ;;  %1392 = vst [vmem:[#allocation2 + $0x710] sm:$0xff] %v1136_v39  ;;  %v1146_v50 = vadd.f32 %v6932_v60, %v806_v24  ;;  %v1147_v51 = vadd.f32 %v6934_v61, %v807_v26 }
 0x196   : > { %1393 = vst [vmem:[#allocation2 + $0x718] sm:$0xff] %v1137_v40  ;;  %v1148_v52 = vadd.f32 %v6936_v62, %v808_v34  ;;  %v1149_v53 = vadd.f32 %v6938_v63, %v809_v35  ;;  %1394 = vst [vmem:[#allocation2 + $0x720] sm:$0xff] %v1138_v41 }
 0x197   : > { %1395 = vst [vmem:[#allocation2 + $0x728] sm:$0xff] %v1139_v42  ;;  %1396 = vst [vmem:[#allocation2 + $0x730] sm:$0xff] %v1140_v43 }
 0x198   : > { %1397 = vst [vmem:[#allocation2 + $0x738] sm:$0xff] %v1141_v44  ;;  %1398 = vst [vmem:[#allocation2 + $0x740] sm:$0xff] %v1142_v45 }
 0x199   : > { %1399 = vst [vmem:[#allocation2 + $0x748] sm:$0xff] %v1143_v46  ;;  %1400 = vst [vmem:[#allocation2 + $0x750] sm:$0xff] %v1144_v48 }
 0x19a   : > { %1401 = vst [vmem:[#allocation2 + $0x758] sm:$0xff] %v1145_v49  ;;  %1402 = vst [vmem:[#allocation2 + $0x760] sm:$0xff] %v1146_v50 }
 0x19b   : > { %1403 = vst [vmem:[#allocation2 + $0x768] sm:$0xff] %v1147_v51  ;;  %1404 = vst [vmem:[#allocation2 + $0x770] sm:$0xff] %v1148_v52 }
 0x19c   : > { %1405 = vst [vmem:[#allocation2 + $0x778] sm:$0xff] %v1149_v53 }
 0x19d LB: >> { %v1479_v54 = vld [vmem:[%s6818_s7] sm:$0xff]  ;;  %v1480_v56 = vld [vmem:[%s6818_s7 + $0x8] sm:$0xff]  ;;  %s5661_s21 = sshll.u32 %s6582_s10, 1  ;;  %s6582_s10 = sphi %s7457_s10, %s1427_s10  }
 0x19e   : >> { %v1487_v55 = vld [vmem:[%s6818_s7 + $0x40] sm:$0xff]  ;;  %v1488_v58 = vld [vmem:[%s6818_s7 + $0x48] sm:$0xff]  ;;  %s1429_s27 = ssub.s32 7, %s5661_s21 }
 0x19f   : >> { %v5665_v57 = vcombine.high %v1479_v54, %v1487_v55  ;;  %v5664_v59 = vcombine.low %v1479_v54, %v1487_v55  ;;  %v1495_v60 = vld [vmem:[%s6818_s7 + $0x80] sm:$0xff]  ;;  %v5667_v62 = vcombine.high %v1480_v56, %v1488_v58  ;;  %v5666_v63 = vcombine.low %v1480_v56, %v1488_v58  ;;  %v1496_v29 = vld [vmem:[%s6818_s7 + $0x88] sm:$0xff]  ;;  %s1430_s11 = smul.u32 %s6570_s18, %s1429_s27 }
 0x1a0   : >> { %v1503_v61 = vld [vmem:[%s6818_s7 + $0xc0] sm:$0xff]  ;;  %v1504_v38 = vld [vmem:[%s6818_s7 + $0xc8] sm:$0xff] }
 0x1a1   : >> { %v5681_v28 = vcombine.high %v1495_v60, %v1503_v61  ;;  %v1511_v47 = vld [vmem:[%s6818_s7 + $0x100] sm:$0xff]  ;;  %4551 = vmatprep.subr.bf16.mxu0 %v5665_v57  ;;  %v5683_v0 = vcombine.high %v1496_v29, %v1504_v38  ;;  %v1512_v2 = vld [vmem:[%s6818_s7 + $0x108] sm:$0xff]  ;;  %4637 = vmatprep.subr.bf16.mxu1 %v5667_v62  ;;  %v5680_v4 = vcombine.low %v1495_v60, %v1503_v61  ;;  %s8049_s24 = sadd.s32 %s6582_s10, %s1430_s11  ;;  %s1427_s10 = sadd.s32 1, %s6582_s10  }
 0x1a2   : >> { %v1519_v1 = vld [vmem:[%s6818_s7 + $0x140] sm:$0xff]  ;;  %v1520_v3 = vld [vmem:[%s6818_s7 + $0x148] sm:$0xff]  ;;  %4552 = vmatpush1.bf16.msra.mxu0 %v5664_v59  ;;  %4638 = vmatpush1.bf16.msra.mxu1 %v5666_v63  ;;  %v5682_v5 = vcombine.low %v1496_v29, %v1504_v38  ;;  %s6190_s13 = sshll.u32 %s8049_s24, 8  ;;  %s6195_s2 = sshll.u32 %s8049_s24, 5 }
 0x1a3   : >> { %4553 = vmatprep.subr.bf16.mxu0 %v5681_v28  ;;  %v5697_v6 = vcombine.high %v1511_v47, %v1519_v1  ;;  %4639 = vmatprep.subr.bf16.mxu1 %v5683_v0  ;;  %v5699_v7 = vcombine.high %v1512_v2, %v1520_v3  ;;  %v1527_v8 = vld [vmem:[%s6818_s7 + $0x180] sm:$0xff]  ;;  %v1528_v9 = vld [vmem:[%s6818_s7 + $0x188] sm:$0xff]  ;;  %v5696_v10 = vcombine.low %v1511_v47, %v1519_v1  ;;  %s8052_s26 = scalar_lea.vmem [#allocation2], %s6190_s13  ;;  %s5465_s6 = scalar_lea.vmem %s7455_s29, %s6195_s2 [#allocation11] }
 0x1a4   : >> { %v1535_v25 = vld [vmem:[%s6818_s7 + $0x1c0] sm:$0xff]  ;;  %v1536_v27 = vld [vmem:[%s6818_s7 + $0x1c8] sm:$0xff]  ;;  %v5698_v11 = vcombine.low %v1512_v2, %v1520_v3  ;;  %p1424_p2 = scmp.ge.s32.totalorder %s1427_s10, 8  }
 0x1a5   : >> { %v5713_v12 = vcombine.high %v1527_v8, %v1535_v25  ;;  %v5715_v13 = vcombine.high %v1528_v9, %v1536_v27  ;;  %v1543_v14 = vld [vmem:[%s6818_s7 + $0x200] sm:$0xff]  ;;  %v1544_v16 = vld [vmem:[%s6818_s7 + $0x208] sm:$0xff]  ;;  %v5712_v18 = vcombine.low %v1527_v8, %v1535_v25  ;;  %v5714_v19 = vcombine.low %v1528_v9, %v1536_v27  ;;  %s6196_s14 = sshll.u32 (%p1424_p2), %s6570_s18, 8  ;;  %s5491_s12 = sshll.u32 (%p1424_p2), %s7455_s29, 4  ;;  %s8114_s12 = int_to_ptr.vmem [resolvable:$true] %s5491_s12 }
 0x1a6   : >> { %4554 = vmatpush1.bf16.msra.mxu0 %v5680_v4  ;;  %4640 = vmatpush1.bf16.msra.mxu1 %v5682_v5  ;;  %v1551_v15 = vld [vmem:[%s6818_s7 + $0x240] sm:$0xff]  ;;  %v1552_v17 = vld [vmem:[%s6818_s7 + $0x248] sm:$0xff]  ;;  %s8111_s9 = scalar_lea.hbm (%p1424_p2), %s8167_s4, %s6196_s14  ;;  %s5471_s19 = scalar_lea.sflag (%p1424_p2), [#allocation7], %s6804_s25 }
 0x1a7   : >> { %4555 = vmatprep.subr.bf16.mxu0 %v5697_v6  ;;  %4641 = vmatprep.subr.bf16.mxu1 %v5699_v7  ;;  %v5729_v20 = vcombine.high %v1543_v14, %v1551_v15  ;;  %v5731_v21 = vcombine.high %v1544_v16, %v1552_v17  ;;  %v1559_v22 = vld [vmem:[%s6818_s7 + $0x280] sm:$0xff]  ;;  %v1560_v30 = vld [vmem:[%s6818_s7 + $0x288] sm:$0xff]  ;;  %v5728_v32 = vcombine.low %v1543_v14, %v1551_v15  ;;  %s6488_s8 = scalar_lea.vmem (%p1424_p2), %s8114_s12, 4096  ;;  %p8192_p12 = scmp.ne.s32.totalorder (%p1424_p2), %s8181_s28, 0 }
 0x1a8   : >> { %v1567_v23 = vld [vmem:[%s6818_s7 + $0x2c0] sm:$0xff]  ;;  %v1568_v31 = vld [vmem:[%s6818_s7 + $0x2c8] sm:$0xff]  ;;  %v5730_v33 = vcombine.low %v1544_v16, %v1552_v17  ;;  %p6489_p6 = scmp.ne.s32.totalorder (%p1424_p2), %s8114_s12, %s6488_s8 }
 0x1a9   : >> { %v5745_v24 = vcombine.high %v1559_v22, %v1567_v23  ;;  %v5747_v26 = vcombine.high %v1560_v30, %v1568_v31  ;;  %v1575_v34 = vld [vmem:[%s6818_s7 + $0x300] sm:$0xff]  ;;  %v1576_v36 = vld [vmem:[%s6818_s7 + $0x308] sm:$0xff]  ;;  %v5744_v39 = vcombine.low %v1559_v22, %v1567_v23  ;;  %v5746_v40 = vcombine.low %v1560_v30, %v1568_v31 }
 0x1aa   : >> { %4556 = vmatpush1.bf16.msra.mxu0 %v5696_v10  ;;  %4642 = vmatpush1.bf16.msra.mxu1 %v5698_v11  ;;  %v1583_v35 = vld [vmem:[%s6818_s7 + $0x340] sm:$0xff]  ;;  %v1584_v37 = vld [vmem:[%s6818_s7 + $0x348] sm:$0xff]  ;;  %p6490_p4 = pnand (%p1424_p2), %p6489_p6, %p8192_p12 }
 0x1ab   : >> { %4557 = vmatprep.subr.bf16.mxu0 %v5713_v12  ;;  %4643 = vmatprep.subr.bf16.mxu1 %v5715_v13  ;;  %v5761_v41 = vcombine.high %v1575_v34, %v1583_v35  ;;  %v1468_v42 = vld [vmem:[#allocation3 + $0x8] sm:$0xff]  ;;  %v5763_v44 = vcombine.high %v1576_v36, %v1584_v37  ;;  %v1591_v45 = vld [vmem:[%s6818_s7 + $0x380] sm:$0xff]  ;;  %v5760_v51 = vcombine.low %v1575_v34, %v1583_v35 }
 0x1ac   : >> { %v1472_v43 = vld [vmem:[#allocation3 + $0x28] sm:$0xff]  ;;  %v1599_v46 = vld [vmem:[%s6818_s7 + $0x3c0] sm:$0xff]  ;;  %v5762_v52 = vcombine.low %v1576_v36, %v1584_v37  ;;  %p6491_p9 = pneg (%p1424_p2), %p6490_p4 }
 0x1ad   : >> { %v7492_v48 = vpack.c.bf16 %v1472_v43, %v1468_v42  ;;  %v1592_v49 = vld [vmem:[%s6818_s7 + $0x388] sm:$0xff]  ;;  %v5777_v53 = vcombine.high %v1591_v45, %v1599_v46  ;;  %v1607_v55 = vld [vmem:[%s6818_s7 + $0x400] sm:$0xff]  ;;  %v5776_v59 = vcombine.low %v1591_v45, %v1599_v46 }
 0x1ae   : >> { %4558 = vmatpush1.bf16.msra.mxu0 %v5712_v18  ;;  %4644 = vmatpush1.bf16.msra.mxu1 %v5714_v19  ;;  %v1600_v50 = vld [vmem:[%s6818_s7 + $0x3c8] sm:$0xff]  ;;  %v1615_v56 = vld [vmem:[%s6818_s7 + $0x440] sm:$0xff] }
 0x1af   : >> { %4559 = vmatprep.subr.bf16.mxu0 %v5729_v20  ;;  %4645 = vmatprep.subr.bf16.mxu1 %v5731_v21  ;;  %v5779_v54 = vcombine.high %v1592_v49, %v1600_v50  ;;  %v1608_v57 = vld [vmem:[%s6818_s7 + $0x408] sm:$0xff]  ;;  %v5778_v60 = vcombine.low %v1592_v49, %v1600_v50  ;;  %v5793_v61 = vcombine.high %v1607_v55, %v1615_v56  ;;  %v1623_v63 = vld [vmem:[%s6818_s7 + $0x480] sm:$0xff] }
 0x1b0   : >> { %4583 = vmatprep.mubr.bf16.mxu0 %v7492_v48  ;;  %4669 = vmatprep.mubr.bf16.mxu1 %v7492_v48  ;;  %v1616_v58 = vld [vmem:[%s6818_s7 + $0x448] sm:$0xff]  ;;  %v1631_v28 = vld [vmem:[%s6818_s7 + $0x4c0] sm:$0xff]  ;;  %v5792_v47 = vcombine.low %v1607_v55, %v1615_v56 }
 0x1b1   : >> { %v5795_v62 = vcombine.high %v1608_v57, %v1616_v58  ;;  %v1624_v29 = vld [vmem:[%s6818_s7 + $0x488] sm:$0xff]  ;;  %v5794_v0 = vcombine.low %v1608_v57, %v1616_v58  ;;  %v5809_v1 = vcombine.high %v1623_v63, %v1631_v28  ;;  %v1639_v3 = vld [vmem:[%s6818_s7 + $0x500] sm:$0xff]  ;;  %v5808_v7 = vcombine.low %v1623_v63, %v1631_v28 }
 0x1b2   : >> { %4560 = vmatpush1.bf16.msra.mxu0 %v5728_v32  ;;  %4646 = vmatpush1.bf16.msra.mxu1 %v5730_v33  ;;  %v1632_v38 = vld [vmem:[%s6818_s7 + $0x4c8] sm:$0xff]  ;;  %v1647_v4 = vld [vmem:[%s6818_s7 + $0x540] sm:$0xff] }
 0x1b3   : >> { %4561 = vmatprep.subr.bf16.mxu0 %v5745_v24  ;;  %4647 = vmatprep.subr.bf16.mxu1 %v5747_v26  ;;  %v5811_v2 = vcombine.high %v1624_v29, %v1632_v38  ;;  %v1640_v5 = vld [vmem:[%s6818_s7 + $0x508] sm:$0xff]  ;;  %v5810_v8 = vcombine.low %v1624_v29, %v1632_v38  ;;  %v5825_v25 = vcombine.high %v1639_v3, %v1647_v4  ;;  %v1655_v27 = vld [vmem:[%s6818_s7 + $0x580] sm:$0xff] }
 0x1b4   : >> { %v1648_v6 = vld [vmem:[%s6818_s7 + $0x548] sm:$0xff]  ;;  %v1663_v10 = vld [vmem:[%s6818_s7 + $0x5c0] sm:$0xff]  ;;  %v5824_v13 = vcombine.low %v1639_v3, %v1647_v4  ;;  %v1470_v3 = vld [vmem:[#allocation3 + $0x18] sm:$0xff] }
 0x1b5   : >> { %v5827_v9 = vcombine.high %v1640_v5, %v1648_v6  ;;  %v1656_v11 = vld [vmem:[%s6818_s7 + $0x588] sm:$0xff]  ;;  %v5826_v14 = vcombine.low %v1640_v5, %v1648_v6  ;;  %v5841_v15 = vcombine.high %v1655_v27, %v1663_v10  ;;  %v1671_v17 = vld [vmem:[%s6818_s7 + $0x600] sm:$0xff]  ;;  %v5840_v21 = vcombine.low %v1655_v27, %v1663_v10  ;;  %v1474_v4 = vld [vmem:[#allocation3 + $0x38] sm:$0xff] }
 0x1b6   : >> { %4562 = vmatpush1.bf16.msra.mxu0 %v5744_v39  ;;  %4648 = vmatpush1.bf16.msra.mxu1 %v5746_v40  ;;  %v1664_v12 = vld [vmem:[%s6818_s7 + $0x5c8] sm:$0xff]  ;;  %v1679_v18 = vld [vmem:[%s6818_s7 + $0x640] sm:$0xff]  ;;  %v7542_v27 = vpack.c.bf16 %v1474_v4, %v1470_v3 }
 0x1b7   : >> { %4563 = vmatprep.subr.bf16.mxu0 %v5761_v41  ;;  %4649 = vmatprep.subr.bf16.mxu1 %v5763_v44  ;;  %v5843_v16 = vcombine.high %v1656_v11, %v1664_v12  ;;  %v1672_v19 = vld [vmem:[%s6818_s7 + $0x608] sm:$0xff]  ;;  %v5842_v22 = vcombine.low %v1656_v11, %v1664_v12  ;;  %v5857_v23 = vcombine.high %v1671_v17, %v1679_v18  ;;  %v1687_v31 = vld [vmem:[%s6818_s7 + $0x680] sm:$0xff] }
 0x1b8   : >> { %v1680_v20 = vld [vmem:[%s6818_s7 + $0x648] sm:$0xff]  ;;  %v1695_v32 = vld [vmem:[%s6818_s7 + $0x6c0] sm:$0xff]  ;;  %v5856_v26 = vcombine.low %v1671_v17, %v1679_v18 }
 0x1b9   : >> { %v5859_v30 = vcombine.high %v1672_v19, %v1680_v20  ;;  %v1688_v33 = vld [vmem:[%s6818_s7 + $0x688] sm:$0xff]  ;;  %v5858_v34 = vcombine.low %v1672_v19, %v1680_v20  ;;  %v5873_v35 = vcombine.high %v1687_v31, %v1695_v32  ;;  %v1703_v37 = vld [vmem:[%s6818_s7 + $0x700] sm:$0xff]  ;;  %v5872_v42 = vcombine.low %v1687_v31, %v1695_v32 }
 0x1ba   : >> { %4564 = vmatpush1.bf16.msra.mxu0 %v5760_v51  ;;  %4650 = vmatpush1.bf16.msra.mxu1 %v5762_v52  ;;  %v1696_v24 = vld [vmem:[%s6818_s7 + $0x6c8] sm:$0xff]  ;;  %v1711_v39 = vld [vmem:[%s6818_s7 + $0x740] sm:$0xff] }
 0x1bb   : >> { %4565 = vmatprep.subr.bf16.mxu0 %v5777_v53  ;;  %4651 = vmatprep.subr.bf16.mxu1 %v5779_v54  ;;  %v5875_v36 = vcombine.high %v1688_v33, %v1696_v24  ;;  %v1704_v40 = vld [vmem:[%s6818_s7 + $0x708] sm:$0xff]  ;;  %v5874_v43 = vcombine.low %v1688_v33, %v1696_v24  ;;  %v5889_v44 = vcombine.high %v1703_v37, %v1711_v39  ;;  %v1719_v46 = vld [vmem:[%s6818_s7 + $0x780] sm:$0xff] }
 0x1bc   : >> { %v1712_v41 = vld [vmem:[%s6818_s7 + $0x748] sm:$0xff]  ;;  %v1727_v49 = vld [vmem:[%s6818_s7 + $0x7c0] sm:$0xff]  ;;  %v5888_v52 = vcombine.low %v1703_v37, %v1711_v39 }
 0x1bd   : >> { %v5891_v45 = vcombine.high %v1704_v40, %v1712_v41  ;;  %v1720_v50 = vld [vmem:[%s6818_s7 + $0x788] sm:$0xff]  ;;  %v5890_v53 = vcombine.low %v1704_v40, %v1712_v41  ;;  %v5905_v54 = vcombine.high %v1719_v46, %v1727_v49  ;;  %v1735_v56 = vld [vmem:[%s6818_s7 + $0x800] sm:$0xff] }
 0x1be   : >> { %4566 = vmatpush1.bf16.msra.mxu0 %v5776_v59  ;;  %4652 = vmatpush1.bf16.msra.mxu1 %v5778_v60  ;;  %v1728_v51 = vld [vmem:[%s6818_s7 + $0x7c8] sm:$0xff]  ;;  %v1743_v57 = vld [vmem:[%s6818_s7 + $0x840] sm:$0xff]  ;;  %v5904_v60 = vcombine.low %v1719_v46, %v1727_v49 }
 0x1bf   : >> { %4567 = vmatprep.subr.bf16.mxu0 %v5793_v61  ;;  %4653 = vmatprep.subr.bf16.mxu1 %v5795_v62  ;;  %v5907_v55 = vcombine.high %v1720_v50, %v1728_v51  ;;  %v1736_v58 = vld [vmem:[%s6818_s7 + $0x808] sm:$0xff]  ;;  %v1467_v61 = vld [vmem:[#allocation3] sm:$0xff]  ;;  %v5906_v63 = vcombine.low %v1720_v50, %v1728_v51  ;;  %v5921_v28 = vcombine.high %v1735_v56, %v1743_v57 }
 0x1c0   : >> { %v1744_v59 = vld [vmem:[%s6818_s7 + $0x848] sm:$0xff]  ;;  %v1471_v62 = vld [vmem:[#allocation3 + $0x20] sm:$0xff]  ;;  %v5920_v5 = vcombine.low %v1735_v56, %v1743_v57 }
 0x1c1   : >> { %v5923_v29 = vcombine.high %v1736_v58, %v1744_v59  ;;  %v1751_v38 = vld [vmem:[%s6818_s7 + $0x880] sm:$0xff]  ;;  %v5922_v6 = vcombine.low %v1736_v58, %v1744_v59  ;;  %v1768_v10 = vld [vmem:[%s6818_s7 + $0x908] sm:$0xff] }
 0x1c2   : >> { %4568 = vmatpush1.bf16.msra.mxu0 %v5792_v47  ;;  %4654 = vmatpush1.bf16.msra.mxu1 %v5794_v0  ;;  %v1759_v47 = vld [vmem:[%s6818_s7 + $0x8c0] sm:$0xff]  ;;  %v1752_v0 = vld [vmem:[%s6818_s7 + $0x888] sm:$0xff] }
 0x1c3   : >> { %4569 = vmatprep.subr.bf16.mxu0 %v5809_v1  ;;  %4655 = vmatprep.subr.bf16.mxu1 %v5811_v2  ;;  %v7537_v1 = vpack.c.bf16 %v1471_v62, %v1467_v61  ;;  %v1760_v2 = vld [vmem:[%s6818_s7 + $0x8c8] sm:$0xff]  ;;  %v5936_v12 = vcombine.low %v1751_v38, %v1759_v47  ;;  %v1791_v17 = vld [vmem:[%s6818_s7 + $0x9c0] sm:$0xff] }
 0x1c4   : >> { %v1776_v11 = vld [vmem:[%s6818_s7 + $0x948] sm:$0xff]  ;;  %v1807_v31 = vld [vmem:[%s6818_s7 + $0xa40] sm:$0xff] }
 0x1c5   : >> { %v1784_v18 = vld [vmem:[%s6818_s7 + $0x988] sm:$0xff]  ;;  %v1823_v37 = vld [vmem:[%s6818_s7 + $0xac0] sm:$0xff] }
 0x1c6   : >> { %4570 = vmatpush1.bf16.msra.mxu0 %v5808_v7  ;;  %4656 = vmatpush1.bf16.msra.mxu1 %v5810_v8  ;;  %v5937_v7 = vcombine.high %v1751_v38, %v1759_v47  ;;  %v5939_v8 = vcombine.high %v1752_v0, %v1760_v2  ;;  %v1792_v19 = vld [vmem:[%s6818_s7 + $0x9c8] sm:$0xff]  ;;  %v1839_v46 = vld [vmem:[%s6818_s7 + $0xb40] sm:$0xff] }
 0x1c7   : >> { %4571 = vmatprep.subr.bf16.mxu0 %v5825_v25  ;;  %4657 = vmatprep.subr.bf16.mxu1 %v5827_v9  ;;  %v1767_v25 = vld [vmem:[%s6818_s7 + $0x900] sm:$0xff]  ;;  %v1800_v32 = vld [vmem:[%s6818_s7 + $0xa08] sm:$0xff] }
 0x1c8   : >> { %v1775_v9 = vld [vmem:[%s6818_s7 + $0x940] sm:$0xff]  ;;  %v1808_v33 = vld [vmem:[%s6818_s7 + $0xa48] sm:$0xff] }
 0x1c9   : >> { %v5952_v20 = vcombine.low %v1767_v25, %v1775_v9  ;;  %v1816_v39 = vld [vmem:[%s6818_s7 + $0xa88] sm:$0xff]  ;;  %v1855_v56 = vld [vmem:[%s6818_s7 + $0xbc0] sm:$0xff] }
 0x1ca   : >> { %4572 = vmatpush1.bf16.msra.mxu0 %v5824_v13  ;;  %4658 = vmatpush1.bf16.msra.mxu1 %v5826_v14  ;;  %v5938_v13 = vcombine.low %v1752_v0, %v1760_v2  ;;  %v5953_v14 = vcombine.high %v1767_v25, %v1775_v9  ;;  %v1824_v40 = vld [vmem:[%s6818_s7 + $0xac8] sm:$0xff]  ;;  %v1879_v4 = vld [vmem:[%s6818_s7 + $0xc80] sm:$0xff] }
 0x1cb   : >> { %4573 = vmatprep.subr.bf16.mxu0 %v5841_v15  ;;  %4659 = vmatprep.subr.bf16.mxu1 %v5843_v16  ;;  %v5955_v15 = vcombine.high %v1768_v10, %v1776_v11  ;;  %v1783_v16 = vld [vmem:[%s6818_s7 + $0x980] sm:$0xff]  ;;  %v1832_v49 = vld [vmem:[%s6818_s7 + $0xb08] sm:$0xff] }
 0x1cc   : >> { %v5968_v24 = vcombine.low %v1783_v16, %v1791_v17  ;;  %v1840_v50 = vld [vmem:[%s6818_s7 + $0xb48] sm:$0xff] }
 0x1cd   : >> { %v1848_v57 = vld [vmem:[%s6818_s7 + $0xb88] sm:$0xff] }
 0x1ce   : >> { %4574 = vmatpush1.bf16.msra.mxu0 %v5840_v21  ;;  %4660 = vmatpush1.bf16.msra.mxu1 %v5842_v22  ;;  %v5954_v21 = vcombine.low %v1768_v10, %v1776_v11  ;;  %v5969_v22 = vcombine.high %v1783_v16, %v1791_v17  ;;  %v1856_v58 = vld [vmem:[%s6818_s7 + $0xbc8] sm:$0xff]  ;;  %v1895_v11 = vld [vmem:[%s6818_s7 + $0xd00] sm:$0xff] }
 0x1cf   : >> { %4575 = vmatprep.subr.bf16.mxu0 %v5857_v23  ;;  %4661 = vmatprep.subr.bf16.mxu1 %v5859_v30  ;;  %v5971_v23 = vcombine.high %v1784_v18, %v1792_v19  ;;  %v1799_v30 = vld [vmem:[%s6818_s7 + $0xa00] sm:$0xff]  ;;  %v6035_v62 = vcombine.high %v1848_v57, %v1856_v58  ;;  %v1872_v38 = vld [vmem:[%s6818_s7 + $0xc48] sm:$0xff]  ;;  %v6034_v0 = vcombine.low %v1848_v57, %v1856_v58 }
 0x1d0   : >> { %v5984_v41 = vcombine.low %v1799_v30, %v1807_v31  ;;  %v1975_v58 = vld [vmem:[%s6818_s7 + $0xf80] sm:$0xff] }
 0x1d2   : >> { %4576 = vmatpush1.bf16.msra.mxu0 %v5856_v26  ;;  %4662 = vmatpush1.bf16.msra.mxu1 %v5858_v34  ;;  %v5970_v26 = vcombine.low %v1784_v18, %v1792_v19  ;;  %v5985_v34 = vcombine.high %v1799_v30, %v1807_v31  ;;  %v1911_v19 = vld [vmem:[%s6818_s7 + $0xd80] sm:$0xff] }
 0x1d3   : >> { %4577 = vmatprep.subr.bf16.mxu0 %v5873_v35  ;;  %4663 = vmatprep.subr.bf16.mxu1 %v5875_v36  ;;  %v5987_v35 = vcombine.high %v1800_v32, %v1808_v33  ;;  %v1815_v36 = vld [vmem:[%s6818_s7 + $0xa80] sm:$0xff] }
 0x1d4   : >> { %v6000_v51 = vcombine.low %v1815_v36, %v1823_v37 }
 0x1d6   : >> { %4578 = vmatpush1.bf16.msra.mxu0 %v5872_v42  ;;  %4664 = vmatpush1.bf16.msra.mxu1 %v5874_v43  ;;  %v5986_v42 = vcombine.low %v1800_v32, %v1808_v33  ;;  %v6001_v43 = vcombine.high %v1815_v36, %v1823_v37  ;;  %v1927_v33 = vld [vmem:[%s6818_s7 + $0xe00] sm:$0xff] }
 0x1d7   : >> { %4579 = vmatprep.subr.bf16.mxu0 %v5889_v44  ;;  %4665 = vmatprep.subr.bf16.mxu1 %v5891_v45  ;;  %v6003_v44 = vcombine.high %v1816_v39, %v1824_v40  ;;  %v1831_v45 = vld [vmem:[%s6818_s7 + $0xb00] sm:$0xff] }
 0x1d8   : >> { %v6016_v59 = vcombine.low %v1831_v45, %v1839_v46 }
 0x1da   : >> { %4580 = vmatpush1.bf16.msra.mxu0 %v5888_v52  ;;  %4666 = vmatpush1.bf16.msra.mxu1 %v5890_v53  ;;  %v6002_v52 = vcombine.low %v1816_v39, %v1824_v40  ;;  %v6017_v53 = vcombine.high %v1831_v45, %v1839_v46  ;;  %v1943_v40 = vld [vmem:[%s6818_s7 + $0xe80] sm:$0xff] }
 0x1db   : >> { %4581 = vmatprep.subr.bf16.mxu0 %v5905_v54  ;;  %4667 = vmatprep.subr.bf16.mxu1 %v5907_v55  ;;  %v6019_v54 = vcombine.high %v1832_v49, %v1840_v50  ;;  %v1847_v55 = vld [vmem:[%s6818_s7 + $0xb80] sm:$0xff] }
 0x1dc   : >> { %v6033_v61 = vcombine.high %v1847_v55, %v1855_v56  ;;  %v6032_v47 = vcombine.low %v1847_v55, %v1855_v56 }
 0x1de   : >> { %4582 = vmatpush1.bf16.msra.mxu0 %v5904_v60  ;;  %4668 = vmatpush1.bf16.msra.mxu1 %v5906_v63  ;;  %v6018_v60 = vcombine.low %v1832_v49, %v1840_v50  ;;  %v1863_v63 = vld [vmem:[%s6818_s7 + $0xc00] sm:$0xff] }
 0x1df   : >> { %4594 = vmatprep.subr.bf16.mxu0 %v5921_v28  ;;  %4680 = vmatprep.subr.bf16.mxu1 %v5923_v29  ;;  %v1871_v28 = vld [vmem:[%s6818_s7 + $0xc40] sm:$0xff]  ;;  %v1864_v29 = vld [vmem:[%s6818_s7 + $0xc08] sm:$0xff] }
 0x1e0   : >> { %v6049_v2 = vcombine.high %v1863_v63, %v1871_v28  ;;  %v6051_v3 = vcombine.high %v1864_v29, %v1872_v38  ;;  %v6050_v25 = vcombine.low %v1864_v29, %v1872_v38  ;;  %v1959_v50 = vld [vmem:[%s6818_s7 + $0xf00] sm:$0xff]  ;;  %v1481_v38 = vld [vmem:[%s6818_s7 + $0x10] sm:$0xff] }
 0x1e1   : >> { %4584 = vmatmul.mubr.bf16.vlgmr.msra.gmra.mrb[0].mxu0 %v7537_v1  ;;  %4670 = vmatmul.mubr.bf16.vlgmr.msra.gmra.mrb[0].mxu1 %v7537_v1 }
 0x1e2   : >> { %4595 = vmatpush1.bf16.msra.mxu0 %v5920_v5  ;;  %4681 = vmatpush1.bf16.msra.mxu1 %v5922_v6  ;;  %v1887_v5 = vld [vmem:[%s6818_s7 + $0xcc0] sm:$0xff]  ;;  %v1880_v6 = vld [vmem:[%s6818_s7 + $0xc88] sm:$0xff] }
 0x1e3   : >> { %4596 = vmatprep.subr.bf16.mxu0 %v5937_v7  ;;  %4682 = vmatprep.subr.bf16.mxu1 %v5939_v8  ;;  %v1888_v7 = vld [vmem:[%s6818_s7 + $0xcc8] sm:$0xff]  ;;  %v6048_v8 = vcombine.low %v1863_v63, %v1871_v28  ;;  %v6065_v9 = vcombine.high %v1879_v4, %v1887_v5 }
 0x1e4   : >> { %4626 = vmatprep.mubr.bf16.mxu0 %v7542_v27  ;;  %4712 = vmatprep.mubr.bf16.mxu1 %v7542_v27  ;;  %v6067_v10 = vcombine.high %v1880_v6, %v1888_v7  ;;  %v6066_v16 = vcombine.low %v1880_v6, %v1888_v7 }
 0x1e6   : >> { %4597 = vmatpush1.bf16.msra.mxu0 %v5936_v12  ;;  %4683 = vmatpush1.bf16.msra.mxu1 %v5938_v13  ;;  %v1903_v12 = vld [vmem:[%s6818_s7 + $0xd40] sm:$0xff]  ;;  %v1896_v13 = vld [vmem:[%s6818_s7 + $0xd08] sm:$0xff] }
 0x1e7   : >> { %4598 = vmatprep.subr.bf16.mxu0 %v5953_v14  ;;  %4684 = vmatprep.subr.bf16.mxu1 %v5955_v15  ;;  %v1904_v14 = vld [vmem:[%s6818_s7 + $0xd48] sm:$0xff]  ;;  %v6064_v15 = vcombine.low %v1879_v4, %v1887_v5  ;;  %v6081_v17 = vcombine.high %v1895_v11, %v1903_v12  ;;  %v1469_v4 = vld [vmem:[#allocation3 + $0x10] sm:$0xff] }
 0x1e8   : >> { %v6083_v18 = vcombine.high %v1896_v13, %v1904_v14  ;;  %v6082_v30 = vcombine.low %v1896_v13, %v1904_v14  ;;  %v1473_v5 = vld [vmem:[#allocation3 + $0x30] sm:$0xff] }
 0x1ea   : >> { %4599 = vmatpush1.bf16.msra.mxu0 %v5952_v20  ;;  %4685 = vmatpush1.bf16.msra.mxu1 %v5954_v21  ;;  %v1919_v20 = vld [vmem:[%s6818_s7 + $0xdc0] sm:$0xff]  ;;  %v1912_v21 = vld [vmem:[%s6818_s7 + $0xd88] sm:$0xff] }
 0x1eb   : >> { %4600 = vmatprep.subr.bf16.mxu0 %v5969_v22  ;;  %4686 = vmatprep.subr.bf16.mxu1 %v5971_v23  ;;  %v1920_v22 = vld [vmem:[%s6818_s7 + $0xdc8] sm:$0xff]  ;;  %v6080_v23 = vcombine.low %v1895_v11, %v1903_v12  ;;  %v6097_v31 = vcombine.high %v1911_v19, %v1919_v20  ;;  %v1498_v11 = vld [vmem:[%s6818_s7 + $0x98] sm:$0xff] }
 0x1ec   : >> { %v6099_v32 = vcombine.high %v1912_v21, %v1920_v22  ;;  %v6098_v36 = vcombine.low %v1912_v21, %v1920_v22  ;;  %v1506_v12 = vld [vmem:[%s6818_s7 + $0xd8] sm:$0xff] }
 0x1ed   : >> { %v5686_v22 = vcombine.low %v1498_v11, %v1506_v12 }
 0x1ee   : >> { %4601 = vmatpush1.bf16.msra.mxu0 %v5968_v24  ;;  %4687 = vmatpush1.bf16.msra.mxu1 %v5970_v26  ;;  %v1935_v24 = vld [vmem:[%s6818_s7 + $0xe40] sm:$0xff]  ;;  %v1928_v26 = vld [vmem:[%s6818_s7 + $0xe08] sm:$0xff] }
 0x1ef   : >> { %4602 = vmatprep.subr.bf16.mxu0 %v5985_v34  ;;  %4688 = vmatprep.subr.bf16.mxu1 %v5987_v35  ;;  %v1936_v34 = vld [vmem:[%s6818_s7 + $0xe48] sm:$0xff]  ;;  %v6096_v35 = vcombine.low %v1911_v19, %v1919_v20  ;;  %v6113_v37 = vcombine.high %v1927_v33, %v1935_v24  ;;  %v1514_v19 = vld [vmem:[%s6818_s7 + $0x118] sm:$0xff] }
 0x1f0   : >> { %v6115_v39 = vcombine.high %v1928_v26, %v1936_v34  ;;  %v6114_v45 = vcombine.low %v1928_v26, %v1936_v34  ;;  %v1522_v20 = vld [vmem:[%s6818_s7 + $0x158] sm:$0xff] }
 0x1f1   : >> { %v5702_v34 = vcombine.low %v1514_v19, %v1522_v20 }
 0x1f2   : >> { %4603 = vmatpush1.bf16.msra.mxu0 %v5984_v41  ;;  %4689 = vmatpush1.bf16.msra.mxu1 %v5986_v42  ;;  %v1951_v41 = vld [vmem:[%s6818_s7 + $0xec0] sm:$0xff]  ;;  %v1944_v42 = vld [vmem:[%s6818_s7 + $0xe88] sm:$0xff] }
 0x1f3   : >> { %4604 = vmatprep.subr.bf16.mxu0 %v6001_v43  ;;  %4690 = vmatprep.subr.bf16.mxu1 %v6003_v44  ;;  %v1952_v43 = vld [vmem:[%s6818_s7 + $0xec8] sm:$0xff]  ;;  %v6112_v44 = vcombine.low %v1927_v33, %v1935_v24  ;;  %v6129_v46 = vcombine.high %v1943_v40, %v1951_v41  ;;  %v1530_v33 = vld [vmem:[%s6818_s7 + $0x198] sm:$0xff] }
 0x1f4   : >> { %v6131_v49 = vcombine.high %v1944_v42, %v1952_v43  ;;  %v6130_v55 = vcombine.low %v1944_v42, %v1952_v43  ;;  %v1538_v24 = vld [vmem:[%s6818_s7 + $0x1d8] sm:$0xff] }
 0x1f5   : >> { %v5718_v43 = vcombine.low %v1530_v33, %v1538_v24 }
 0x1f6   : >> { %4605 = vmatpush1.bf16.msra.mxu0 %v6000_v51  ;;  %4691 = vmatpush1.bf16.msra.mxu1 %v6002_v52  ;;  %v1967_v51 = vld [vmem:[%s6818_s7 + $0xf40] sm:$0xff]  ;;  %v1960_v52 = vld [vmem:[%s6818_s7 + $0xf08] sm:$0xff] }
 0x1f7   : >> { %4606 = vmatprep.subr.bf16.mxu0 %v6017_v53  ;;  %4692 = vmatprep.subr.bf16.mxu1 %v6019_v54  ;;  %v1968_v53 = vld [vmem:[%s6818_s7 + $0xf48] sm:$0xff]  ;;  %v6128_v54 = vcombine.low %v1943_v40, %v1951_v41  ;;  %v6145_v56 = vcombine.high %v1959_v50, %v1967_v51  ;;  %v1546_v40 = vld [vmem:[%s6818_s7 + $0x218] sm:$0xff] }
 0x1f8   : >> { %v6147_v57 = vcombine.high %v1960_v52, %v1968_v53  ;;  %v6146_v63 = vcombine.low %v1960_v52, %v1968_v53  ;;  %v1554_v41 = vld [vmem:[%s6818_s7 + $0x258] sm:$0xff] }
 0x1f9   : >> { %v5734_v53 = vcombine.low %v1546_v40, %v1554_v41 }
 0x1fa   : >> { %4607 = vmatpush1.bf16.msra.mxu0 %v6016_v59  ;;  %4693 = vmatpush1.bf16.msra.mxu1 %v6018_v60  ;;  %v1983_v59 = vld [vmem:[%s6818_s7 + $0xfc0] sm:$0xff]  ;;  %v1976_v60 = vld [vmem:[%s6818_s7 + $0xf88] sm:$0xff] }
 0x1fb   : >> { %4608 = vmatprep.subr.bf16.mxu0 %v6033_v61  ;;  %4694 = vmatprep.subr.bf16.mxu1 %v6035_v62  ;;  %v1984_v61 = vld [vmem:[%s6818_s7 + $0xfc8] sm:$0xff]  ;;  %v6144_v62 = vcombine.low %v1959_v50, %v1967_v51  ;;  %v6161_v28 = vcombine.high %v1975_v58, %v1983_v59  ;;  %v1562_v50 = vld [vmem:[%s6818_s7 + $0x298] sm:$0xff] }
 0x1fc   : >> { %v6163_v29 = vcombine.high %v1976_v60, %v1984_v61  ;;  %v6162_v6 = vcombine.low %v1976_v60, %v1984_v61  ;;  %v1570_v51 = vld [vmem:[%s6818_s7 + $0x2d8] sm:$0xff] }
 0x1fd   : >> { %v5750_v61 = vcombine.low %v1562_v50, %v1570_v51 }
 0x1fe   : >> { %4609 = vmatpush1.bf16.msra.mxu0 %v6032_v47  ;;  %4695 = vmatpush1.bf16.msra.mxu1 %v6034_v0  ;;  %v1489_v47 = vld [vmem:[%s6818_s7 + $0x50] sm:$0xff]  ;;  %v1482_v0 = vld [vmem:[%s6818_s7 + $0x18] sm:$0xff] }
 0x1ff   : >> { %4610 = vmatprep.subr.bf16.mxu0 %v6049_v2  ;;  %4696 = vmatprep.subr.bf16.mxu1 %v6051_v3  ;;  %v1490_v2 = vld [vmem:[%s6818_s7 + $0x58] sm:$0xff]  ;;  %v6160_v3 = vcombine.low %v1975_v58, %v1983_v59  ;;  %v5669_v7 = vcombine.high %v1481_v38, %v1489_v47  ;;  %v5668_v13 = vcombine.low %v1481_v38, %v1489_v47 }
 0x200   : >> { %v5670_v14 = vcombine.low %v1482_v0, %v1490_v2  ;;  %v1578_v58 = vld [vmem:[%s6818_s7 + $0x318] sm:$0xff] }
 0x201   : >> { %v1586_v59 = vld [vmem:[%s6818_s7 + $0x358] sm:$0xff] }
 0x202   : >> { %4611 = vmatpush1.bf16.msra.mxu0 %v6048_v8  ;;  %4697 = vmatpush1.bf16.msra.mxu1 %v6050_v25  ;;  %v5671_v8 = vcombine.high %v1482_v0, %v1490_v2  ;;  %v1497_v25 = vld [vmem:[%s6818_s7 + $0x90] sm:$0xff]  ;;  %v1594_v38 = vld [vmem:[%s6818_s7 + $0x398] sm:$0xff]  ;;  %v5766_v2 = vcombine.low %v1578_v58, %v1586_v59 }
 0x203   : >> { %4612 = vmatprep.subr.bf16.mxu0 %v6065_v9  ;;  %4698 = vmatprep.subr.bf16.mxu1 %v6067_v10  ;;  %v1505_v9 = vld [vmem:[%s6818_s7 + $0xd0] sm:$0xff]  ;;  %v7608_v10 = vpack.c.bf16 %v1473_v5, %v1469_v4  ;;  %v1602_v47 = vld [vmem:[%s6818_s7 + $0x3d8] sm:$0xff] }
 0x204   : >> { %v5684_v21 = vcombine.low %v1497_v25, %v1505_v9  ;;  %v5783_v4 = vcombine.high %v1594_v38, %v1602_v47  ;;  %v1609_v5 = vld [vmem:[%s6818_s7 + $0x410] sm:$0xff] }
 0x206   : >> { %4613 = vmatpush1.bf16.msra.mxu0 %v6064_v15  ;;  %4699 = vmatpush1.bf16.msra.mxu1 %v6066_v16  ;;  %v5685_v15 = vcombine.high %v1497_v25, %v1505_v9  ;;  %v5687_v16 = vcombine.high %v1498_v11, %v1506_v12  ;;  %v5782_v9 = vcombine.low %v1594_v38, %v1602_v47 }
 0x207   : >> { %4614 = vmatprep.subr.bf16.mxu0 %v6081_v17  ;;  %4700 = vmatprep.subr.bf16.mxu1 %v6083_v18  ;;  %v1513_v17 = vld [vmem:[%s6818_s7 + $0x110] sm:$0xff] }
 0x208   : >> { %v1521_v18 = vld [vmem:[%s6818_s7 + $0x150] sm:$0xff] }
 0x209   : >> { %v5700_v26 = vcombine.low %v1513_v17, %v1521_v18 }
 0x20a   : >> { %4615 = vmatpush1.bf16.msra.mxu0 %v6080_v23  ;;  %4701 = vmatpush1.bf16.msra.mxu1 %v6082_v30  ;;  %v5701_v23 = vcombine.high %v1513_v17, %v1521_v18  ;;  %v5703_v30 = vcombine.high %v1514_v19, %v1522_v20 }
 0x20b   : >> { %4616 = vmatprep.subr.bf16.mxu0 %v6097_v31  ;;  %4702 = vmatprep.subr.bf16.mxu1 %v6099_v32  ;;  %v1529_v31 = vld [vmem:[%s6818_s7 + $0x190] sm:$0xff] }
 0x20c   : >> { %v1537_v32 = vld [vmem:[%s6818_s7 + $0x1d0] sm:$0xff] }
 0x20d   : >> { %v5716_v42 = vcombine.low %v1529_v31, %v1537_v32 }
 0x20e   : >> { %4617 = vmatpush1.bf16.msra.mxu0 %v6096_v35  ;;  %4703 = vmatpush1.bf16.msra.mxu1 %v6098_v36  ;;  %v5717_v35 = vcombine.high %v1529_v31, %v1537_v32  ;;  %v5719_v36 = vcombine.high %v1530_v33, %v1538_v24 }
 0x20f   : >> { %4618 = vmatprep.subr.bf16.mxu0 %v6113_v37  ;;  %4704 = vmatprep.subr.bf16.mxu1 %v6115_v39  ;;  %v1545_v37 = vld [vmem:[%s6818_s7 + $0x210] sm:$0xff] }
 0x210   : >> { %v1553_v39 = vld [vmem:[%s6818_s7 + $0x250] sm:$0xff] }
 0x211   : >> { %v5732_v52 = vcombine.low %v1545_v37, %v1553_v39 }
 0x212   : >> { %4619 = vmatpush1.bf16.msra.mxu0 %v6112_v44  ;;  %4705 = vmatpush1.bf16.msra.mxu1 %v6114_v45  ;;  %v5733_v44 = vcombine.high %v1545_v37, %v1553_v39  ;;  %v5735_v45 = vcombine.high %v1546_v40, %v1554_v41 }
 0x213   : >> { %4620 = vmatprep.subr.bf16.mxu0 %v6129_v46  ;;  %4706 = vmatprep.subr.bf16.mxu1 %v6131_v49  ;;  %v1561_v46 = vld [vmem:[%s6818_s7 + $0x290] sm:$0xff] }
 0x214   : >> { %v1569_v49 = vld [vmem:[%s6818_s7 + $0x2d0] sm:$0xff] }
 0x215   : >> { %v5748_v60 = vcombine.low %v1561_v46, %v1569_v49 }
 0x216   : >> { %4621 = vmatpush1.bf16.msra.mxu0 %v6128_v54  ;;  %4707 = vmatpush1.bf16.msra.mxu1 %v6130_v55  ;;  %v5749_v54 = vcombine.high %v1561_v46, %v1569_v49  ;;  %v5751_v55 = vcombine.high %v1562_v50, %v1570_v51 }
 0x217   : >> { %4622 = vmatprep.subr.bf16.mxu0 %v6145_v56  ;;  %4708 = vmatprep.subr.bf16.mxu1 %v6147_v57  ;;  %v1577_v56 = vld [vmem:[%s6818_s7 + $0x310] sm:$0xff] }
 0x218   : >> { %v1585_v57 = vld [vmem:[%s6818_s7 + $0x350] sm:$0xff] }
 0x219   : >> { %v5764_v0 = vcombine.low %v1577_v56, %v1585_v57 }
 0x21a   : >> { %4623 = vmatpush1.bf16.msra.mxu0 %v6144_v62  ;;  %4709 = vmatpush1.bf16.msra.mxu1 %v6146_v63  ;;  %v5765_v62 = vcombine.high %v1577_v56, %v1585_v57  ;;  %v5767_v63 = vcombine.high %v1578_v58, %v1586_v59 }
 0x21b   : >> { %4624 = vmatprep.subr.bf16.mxu0 %v6161_v28  ;;  %4710 = vmatprep.subr.bf16.mxu1 %v6163_v29  ;;  %v1593_v28 = vld [vmem:[%s6818_s7 + $0x390] sm:$0xff] }
 0x21c   : >> { %v1601_v29 = vld [vmem:[%s6818_s7 + $0x3d0] sm:$0xff] }
 0x21d   : >> { %v5780_v25 = vcombine.low %v1593_v28, %v1601_v29 }
 0x21e   : >> { %4625 = vmatpush1.bf16.msra.mxu0 %v6160_v3  ;;  %4711 = vmatpush1.bf16.msra.mxu1 %v6162_v6  ;;  %v5781_v3 = vcombine.high %v1593_v28, %v1601_v29  ;;  %v1617_v6 = vld [vmem:[%s6818_s7 + $0x450] sm:$0xff] }
 0x21f   : >> { %4723 = vmatprep.subr.bf16.mxu0 %v5669_v7  ;;  %4809 = vmatprep.subr.bf16.mxu1 %v5671_v8  ;;  %v1610_v7 = vld [vmem:[%s6818_s7 + $0x418] sm:$0xff]  ;;  %v5797_v11 = vcombine.high %v1609_v5, %v1617_v6  ;;  %v5796_v17 = vcombine.low %v1609_v5, %v1617_v6 }
 0x220   : >> { %v1618_v8 = vld [vmem:[%s6818_s7 + $0x458] sm:$0xff] }
 0x221   : >> { %4627 = vmatmul.mubr.bf16.vlgmr.msra.gmra.mrb[0].mxu0 %v7608_v10  ;;  %4713 = vmatmul.mubr.bf16.vlgmr.msra.gmra.mrb[0].mxu1 %v7608_v10  ;;  %v5799_v12 = vcombine.high %v1610_v7, %v1618_v8  ;;  %v5798_v18 = vcombine.low %v1610_v7, %v1618_v8 }
 0x222   : >> { %4724 = vmatpush1.bf16.msra.mxu0 %v5668_v13  ;;  %4810 = vmatpush1.bf16.msra.mxu1 %v5670_v14  ;;  %v1625_v13 = vld [vmem:[%s6818_s7 + $0x490] sm:$0xff] }
 0x223   : >> { %4725 = vmatprep.subr.bf16.mxu0 %v5685_v15  ;;  %4811 = vmatprep.subr.bf16.mxu1 %v5687_v16  ;;  %v1633_v14 = vld [vmem:[%s6818_s7 + $0x4d0] sm:$0xff]  ;;  %v1626_v15 = vld [vmem:[%s6818_s7 + $0x498] sm:$0xff] }
 0x224   : >> { %4755 = vmatprep.mubr.bf16.mxu0 %v7492_v48  ;;  %4841 = vmatprep.mubr.bf16.mxu1 %v7492_v48  ;;  %v1634_v16 = vld [vmem:[%s6818_s7 + $0x4d8] sm:$0xff]  ;;  %v5813_v19 = vcombine.high %v1625_v13, %v1633_v14  ;;  %v5812_v31 = vcombine.low %v1625_v13, %v1633_v14 }
 0x225   : >> { %v5815_v20 = vcombine.high %v1626_v15, %v1634_v16  ;;  %v5814_v32 = vcombine.low %v1626_v15, %v1634_v16 }
 0x226   : >> { %4726 = vmatpush1.bf16.msra.mxu0 %v5684_v21  ;;  %4812 = vmatpush1.bf16.msra.mxu1 %v5686_v22  ;;  %v1641_v21 = vld [vmem:[%s6818_s7 + $0x510] sm:$0xff] }
 0x227   : >> { %4727 = vmatprep.subr.bf16.mxu0 %v5701_v23  ;;  %4813 = vmatprep.subr.bf16.mxu1 %v5703_v30  ;;  %v1649_v22 = vld [vmem:[%s6818_s7 + $0x550] sm:$0xff]  ;;  %v1642_v23 = vld [vmem:[%s6818_s7 + $0x518] sm:$0xff] }
 0x228   : >> { %v1650_v30 = vld [vmem:[%s6818_s7 + $0x558] sm:$0xff]  ;;  %v5829_v33 = vcombine.high %v1641_v21, %v1649_v22  ;;  %v5828_v37 = vcombine.low %v1641_v21, %v1649_v22 }
 0x229   : >> { %v5831_v24 = vcombine.high %v1642_v23, %v1650_v30  ;;  %v5830_v39 = vcombine.low %v1642_v23, %v1650_v30 }
 0x22a   : >> { %4728 = vmatpush1.bf16.msra.mxu0 %v5700_v26  ;;  %4814 = vmatpush1.bf16.msra.mxu1 %v5702_v34  ;;  %v1657_v26 = vld [vmem:[%s6818_s7 + $0x590] sm:$0xff] }
 0x22b   : >> { %4729 = vmatprep.subr.bf16.mxu0 %v5717_v35  ;;  %4815 = vmatprep.subr.bf16.mxu1 %v5719_v36  ;;  %v1665_v34 = vld [vmem:[%s6818_s7 + $0x5d0] sm:$0xff]  ;;  %v1658_v35 = vld [vmem:[%s6818_s7 + $0x598] sm:$0xff] }
 0x22c   : >> { %v1666_v36 = vld [vmem:[%s6818_s7 + $0x5d8] sm:$0xff]  ;;  %v5845_v40 = vcombine.high %v1657_v26, %v1665_v34  ;;  %v5844_v46 = vcombine.low %v1657_v26, %v1665_v34 }
 0x22d   : >> { %v5847_v41 = vcombine.high %v1658_v35, %v1666_v36  ;;  %v5846_v49 = vcombine.low %v1658_v35, %v1666_v36 }
 0x22e   : >> { %4730 = vmatpush1.bf16.msra.mxu0 %v5716_v42  ;;  %4816 = vmatpush1.bf16.msra.mxu1 %v5718_v43  ;;  %v1673_v42 = vld [vmem:[%s6818_s7 + $0x610] sm:$0xff] }
 0x22f   : >> { %4731 = vmatprep.subr.bf16.mxu0 %v5733_v44  ;;  %4817 = vmatprep.subr.bf16.mxu1 %v5735_v45  ;;  %v1681_v43 = vld [vmem:[%s6818_s7 + $0x650] sm:$0xff]  ;;  %v1674_v44 = vld [vmem:[%s6818_s7 + $0x618] sm:$0xff] }
 0x230   : >> { %v1682_v45 = vld [vmem:[%s6818_s7 + $0x658] sm:$0xff]  ;;  %v5861_v50 = vcombine.high %v1673_v42, %v1681_v43  ;;  %v5860_v56 = vcombine.low %v1673_v42, %v1681_v43 }
 0x231   : >> { %v5863_v51 = vcombine.high %v1674_v44, %v1682_v45  ;;  %v5862_v57 = vcombine.low %v1674_v44, %v1682_v45 }
 0x232   : >> { %4732 = vmatpush1.bf16.msra.mxu0 %v5732_v52  ;;  %4818 = vmatpush1.bf16.msra.mxu1 %v5734_v53  ;;  %v1689_v52 = vld [vmem:[%s6818_s7 + $0x690] sm:$0xff] }
 0x233   : >> { %4733 = vmatprep.subr.bf16.mxu0 %v5749_v54  ;;  %4819 = vmatprep.subr.bf16.mxu1 %v5751_v55  ;;  %v1697_v53 = vld [vmem:[%s6818_s7 + $0x6d0] sm:$0xff]  ;;  %v1690_v54 = vld [vmem:[%s6818_s7 + $0x698] sm:$0xff] }
 0x234   : >> { %v1698_v55 = vld [vmem:[%s6818_s7 + $0x6d8] sm:$0xff]  ;;  %v5877_v58 = vcombine.high %v1689_v52, %v1697_v53  ;;  %v5876_v28 = vcombine.low %v1689_v52, %v1697_v53 }
 0x235   : >> { %v5879_v59 = vcombine.high %v1690_v54, %v1698_v55  ;;  %v5878_v29 = vcombine.low %v1690_v54, %v1698_v55 }
 0x236   : >> { %4734 = vmatpush1.bf16.msra.mxu0 %v5748_v60  ;;  %4820 = vmatpush1.bf16.msra.mxu1 %v5750_v61  ;;  %v1705_v60 = vld [vmem:[%s6818_s7 + $0x710] sm:$0xff] }
 0x237   : >> { %4735 = vmatprep.subr.bf16.mxu0 %v5765_v62  ;;  %4821 = vmatprep.subr.bf16.mxu1 %v5767_v63  ;;  %v1713_v61 = vld [vmem:[%s6818_s7 + $0x750] sm:$0xff]  ;;  %v1706_v62 = vld [vmem:[%s6818_s7 + $0x718] sm:$0xff] }
 0x238   : >> { %v1714_v63 = vld [vmem:[%s6818_s7 + $0x758] sm:$0xff]  ;;  %v5893_v38 = vcombine.high %v1705_v60, %v1713_v61  ;;  %v5892_v5 = vcombine.low %v1705_v60, %v1713_v61 }
 0x239   : >> { %v5895_v47 = vcombine.high %v1706_v62, %v1714_v63  ;;  %v5894_v6 = vcombine.low %v1706_v62, %v1714_v63 }
 0x23a   : >> { %4736 = vmatpush1.bf16.msra.mxu0 %v5764_v0  ;;  %4822 = vmatpush1.bf16.msra.mxu1 %v5766_v2  ;;  %v1721_v0 = vld [vmem:[%s6818_s7 + $0x790] sm:$0xff] }
 0x23b   : >> { %4737 = vmatprep.subr.bf16.mxu0 %v5781_v3  ;;  %4823 = vmatprep.subr.bf16.mxu1 %v5783_v4  ;;  %v1729_v2 = vld [vmem:[%s6818_s7 + $0x7d0] sm:$0xff]  ;;  %v1722_v3 = vld [vmem:[%s6818_s7 + $0x798] sm:$0xff] }
 0x23c   : >> { %v1730_v4 = vld [vmem:[%s6818_s7 + $0x7d8] sm:$0xff]  ;;  %v5909_v7 = vcombine.high %v1721_v0, %v1729_v2  ;;  %v5908_v13 = vcombine.low %v1721_v0, %v1729_v2 }
 0x23d   : >> { %v5911_v8 = vcombine.high %v1722_v3, %v1730_v4  ;;  %v5910_v14 = vcombine.low %v1722_v3, %v1730_v4 }
 0x23e   : >> { %4738 = vmatpush1.bf16.msra.mxu0 %v5780_v25  ;;  %4824 = vmatpush1.bf16.msra.mxu1 %v5782_v9  ;;  %v1737_v25 = vld [vmem:[%s6818_s7 + $0x810] sm:$0xff] }
 0x23f   : >> { %4739 = vmatprep.subr.bf16.mxu0 %v5797_v11  ;;  %4825 = vmatprep.subr.bf16.mxu1 %v5799_v12  ;;  %v1745_v9 = vld [vmem:[%s6818_s7 + $0x850] sm:$0xff]  ;;  %v1738_v11 = vld [vmem:[%s6818_s7 + $0x818] sm:$0xff] }
 0x240   : >> { %v1746_v12 = vld [vmem:[%s6818_s7 + $0x858] sm:$0xff]  ;;  %v5925_v15 = vcombine.high %v1737_v25, %v1745_v9  ;;  %v5924_v21 = vcombine.low %v1737_v25, %v1745_v9 }
 0x241   : >> { %v5927_v16 = vcombine.high %v1738_v11, %v1746_v12  ;;  %v5926_v22 = vcombine.low %v1738_v11, %v1746_v12 }
 0x242   : >> { %4740 = vmatpush1.bf16.msra.mxu0 %v5796_v17  ;;  %4826 = vmatpush1.bf16.msra.mxu1 %v5798_v18  ;;  %v1753_v17 = vld [vmem:[%s6818_s7 + $0x890] sm:$0xff] }
 0x243   : >> { %4741 = vmatprep.subr.bf16.mxu0 %v5813_v19  ;;  %4827 = vmatprep.subr.bf16.mxu1 %v5815_v20  ;;  %v1761_v18 = vld [vmem:[%s6818_s7 + $0x8d0] sm:$0xff]  ;;  %v1754_v19 = vld [vmem:[%s6818_s7 + $0x898] sm:$0xff] }
 0x244   : >> { %v1762_v20 = vld [vmem:[%s6818_s7 + $0x8d8] sm:$0xff]  ;;  %v5941_v23 = vcombine.high %v1753_v17, %v1761_v18  ;;  %v5940_v26 = vcombine.low %v1753_v17, %v1761_v18 }
 0x245   : >> { %v5943_v30 = vcombine.high %v1754_v19, %v1762_v20  ;;  %v5942_v34 = vcombine.low %v1754_v19, %v1762_v20 }
 0x246   : >> { %4742 = vmatpush1.bf16.msra.mxu0 %v5812_v31  ;;  %4828 = vmatpush1.bf16.msra.mxu1 %v5814_v32  ;;  %v1769_v31 = vld [vmem:[%s6818_s7 + $0x910] sm:$0xff] }
 0x247   : >> { %4743 = vmatprep.subr.bf16.mxu0 %v5829_v33  ;;  %4829 = vmatprep.subr.bf16.mxu1 %v5831_v24  ;;  %v1777_v32 = vld [vmem:[%s6818_s7 + $0x950] sm:$0xff]  ;;  %v1770_v33 = vld [vmem:[%s6818_s7 + $0x918] sm:$0xff] }
 0x248   : >> { %v1778_v24 = vld [vmem:[%s6818_s7 + $0x958] sm:$0xff]  ;;  %v5957_v35 = vcombine.high %v1769_v31, %v1777_v32  ;;  %v5956_v42 = vcombine.low %v1769_v31, %v1777_v32 }
 0x249   : >> { %v5959_v36 = vcombine.high %v1770_v33, %v1778_v24  ;;  %v5958_v43 = vcombine.low %v1770_v33, %v1778_v24 }
 0x24a   : >> { %4744 = vmatpush1.bf16.msra.mxu0 %v5828_v37  ;;  %4830 = vmatpush1.bf16.msra.mxu1 %v5830_v39  ;;  %v1785_v37 = vld [vmem:[%s6818_s7 + $0x990] sm:$0xff] }
 0x24b   : >> { %4745 = vmatprep.subr.bf16.mxu0 %v5845_v40  ;;  %4831 = vmatprep.subr.bf16.mxu1 %v5847_v41  ;;  %v1793_v39 = vld [vmem:[%s6818_s7 + $0x9d0] sm:$0xff]  ;;  %v1786_v40 = vld [vmem:[%s6818_s7 + $0x998] sm:$0xff] }
 0x24c   : >> { %v1794_v41 = vld [vmem:[%s6818_s7 + $0x9d8] sm:$0xff]  ;;  %v5973_v44 = vcombine.high %v1785_v37, %v1793_v39  ;;  %v5972_v52 = vcombine.low %v1785_v37, %v1793_v39 }
 0x24d   : >> { %v5975_v45 = vcombine.high %v1786_v40, %v1794_v41  ;;  %v5974_v53 = vcombine.low %v1786_v40, %v1794_v41 }
 0x24e   : >> { %4746 = vmatpush1.bf16.msra.mxu0 %v5844_v46  ;;  %4832 = vmatpush1.bf16.msra.mxu1 %v5846_v49  ;;  %v1801_v46 = vld [vmem:[%s6818_s7 + $0xa10] sm:$0xff] }
 0x24f   : >> { %4747 = vmatprep.subr.bf16.mxu0 %v5861_v50  ;;  %4833 = vmatprep.subr.bf16.mxu1 %v5863_v51  ;;  %v1809_v49 = vld [vmem:[%s6818_s7 + $0xa50] sm:$0xff]  ;;  %v1802_v50 = vld [vmem:[%s6818_s7 + $0xa18] sm:$0xff] }
 0x250   : >> { %v1810_v51 = vld [vmem:[%s6818_s7 + $0xa58] sm:$0xff]  ;;  %v5989_v54 = vcombine.high %v1801_v46, %v1809_v49  ;;  %v5988_v60 = vcombine.low %v1801_v46, %v1809_v49 }
 0x251   : >> { %v5991_v55 = vcombine.high %v1802_v50, %v1810_v51  ;;  %v5990_v61 = vcombine.low %v1802_v50, %v1810_v51 }
 0x252   : >> { %4748 = vmatpush1.bf16.msra.mxu0 %v5860_v56  ;;  %4834 = vmatpush1.bf16.msra.mxu1 %v5862_v57  ;;  %v1817_v56 = vld [vmem:[%s6818_s7 + $0xa90] sm:$0xff] }
 0x253   : >> { %4749 = vmatprep.subr.bf16.mxu0 %v5877_v58  ;;  %4835 = vmatprep.subr.bf16.mxu1 %v5879_v59  ;;  %v1825_v57 = vld [vmem:[%s6818_s7 + $0xad0] sm:$0xff]  ;;  %v1818_v58 = vld [vmem:[%s6818_s7 + $0xa98] sm:$0xff] }
 0x254   : >> { %v1826_v59 = vld [vmem:[%s6818_s7 + $0xad8] sm:$0xff]  ;;  %v6005_v62 = vcombine.high %v1817_v56, %v1825_v57  ;;  %v6004_v0 = vcombine.low %v1817_v56, %v1825_v57 }
 0x255   : >> { %v6007_v63 = vcombine.high %v1818_v58, %v1826_v59  ;;  %v6006_v2 = vcombine.low %v1818_v58, %v1826_v59 }
 0x256   : >> { %4750 = vmatpush1.bf16.msra.mxu0 %v5876_v28  ;;  %4836 = vmatpush1.bf16.msra.mxu1 %v5878_v29  ;;  %v1833_v28 = vld [vmem:[%s6818_s7 + $0xb10] sm:$0xff] }
 0x257   : >> { %4751 = vmatprep.subr.bf16.mxu0 %v5893_v38  ;;  %4837 = vmatprep.subr.bf16.mxu1 %v5895_v47  ;;  %v1841_v29 = vld [vmem:[%s6818_s7 + $0xb50] sm:$0xff]  ;;  %v1834_v38 = vld [vmem:[%s6818_s7 + $0xb18] sm:$0xff] }
 0x258   : >> { %v1842_v47 = vld [vmem:[%s6818_s7 + $0xb58] sm:$0xff]  ;;  %v6021_v3 = vcombine.high %v1833_v28, %v1841_v29  ;;  %v6020_v25 = vcombine.low %v1833_v28, %v1841_v29 }
 0x259   : >> { %v6023_v4 = vcombine.high %v1834_v38, %v1842_v47  ;;  %v6022_v9 = vcombine.low %v1834_v38, %v1842_v47 }
 0x25a   : >> { %4752 = vmatpush1.bf16.msra.mxu0 %v5892_v5  ;;  %4838 = vmatpush1.bf16.msra.mxu1 %v5894_v6  ;;  %v1849_v5 = vld [vmem:[%s6818_s7 + $0xb90] sm:$0xff] }
 0x25b   : >> { %4753 = vmatprep.subr.bf16.mxu0 %v5909_v7  ;;  %4839 = vmatprep.subr.bf16.mxu1 %v5911_v8  ;;  %v1857_v6 = vld [vmem:[%s6818_s7 + $0xbd0] sm:$0xff]  ;;  %v1850_v7 = vld [vmem:[%s6818_s7 + $0xb98] sm:$0xff] }
 0x25c   : >> { %v1858_v8 = vld [vmem:[%s6818_s7 + $0xbd8] sm:$0xff]  ;;  %v6037_v11 = vcombine.high %v1849_v5, %v1857_v6  ;;  %v6036_v17 = vcombine.low %v1849_v5, %v1857_v6 }
 0x25d   : >> { %v6039_v12 = vcombine.high %v1850_v7, %v1858_v8  ;;  %v6038_v18 = vcombine.low %v1850_v7, %v1858_v8 }
 0x25e   : >> { %4754 = vmatpush1.bf16.msra.mxu0 %v5908_v13  ;;  %4840 = vmatpush1.bf16.msra.mxu1 %v5910_v14  ;;  %v1865_v13 = vld [vmem:[%s6818_s7 + $0xc10] sm:$0xff] }
 0x25f   : >> { %4766 = vmatprep.subr.bf16.mxu0 %v5925_v15  ;;  %4852 = vmatprep.subr.bf16.mxu1 %v5927_v16  ;;  %v1873_v14 = vld [vmem:[%s6818_s7 + $0xc50] sm:$0xff]  ;;  %v1866_v15 = vld [vmem:[%s6818_s7 + $0xc18] sm:$0xff] }
 0x260   : >> { %v1874_v16 = vld [vmem:[%s6818_s7 + $0xc58] sm:$0xff]  ;;  %v6053_v19 = vcombine.high %v1865_v13, %v1873_v14  ;;  %v6052_v31 = vcombine.low %v1865_v13, %v1873_v14 }
 0x261   : >> { %4756 = vmatmul.mubr.bf16.vlgmr.msra.gmra.mrb[4].mxu0 %v7537_v1  ;;  %4842 = vmatmul.mubr.bf16.vlgmr.msra.gmra.mrb[4].mxu1 %v7537_v1  ;;  %v6055_v20 = vcombine.high %v1866_v15, %v1874_v16  ;;  %v6054_v32 = vcombine.low %v1866_v15, %v1874_v16 }
 0x262   : >> { %4767 = vmatpush1.bf16.msra.mxu0 %v5924_v21  ;;  %4853 = vmatpush1.bf16.msra.mxu1 %v5926_v22  ;;  %v1881_v21 = vld [vmem:[%s6818_s7 + $0xc90] sm:$0xff] }
 0x263   : >> { %4768 = vmatprep.subr.bf16.mxu0 %v5941_v23  ;;  %4854 = vmatprep.subr.bf16.mxu1 %v5943_v30  ;;  %v1889_v22 = vld [vmem:[%s6818_s7 + $0xcd0] sm:$0xff]  ;;  %v1882_v23 = vld [vmem:[%s6818_s7 + $0xc98] sm:$0xff] }
 0x264   : >> { %4798 = vmatprep.mubr.bf16.mxu0 %v7542_v27  ;;  %4884 = vmatprep.mubr.bf16.mxu1 %v7542_v27  ;;  %v1890_v30 = vld [vmem:[%s6818_s7 + $0xcd8] sm:$0xff]  ;;  %v6069_v33 = vcombine.high %v1881_v21, %v1889_v22  ;;  %v6068_v37 = vcombine.low %v1881_v21, %v1889_v22 }
 0x265   : >> { %v6071_v24 = vcombine.high %v1882_v23, %v1890_v30  ;;  %v6070_v39 = vcombine.low %v1882_v23, %v1890_v30 }
 0x266   : >> { %4769 = vmatpush1.bf16.msra.mxu0 %v5940_v26  ;;  %4855 = vmatpush1.bf16.msra.mxu1 %v5942_v34  ;;  %v1897_v26 = vld [vmem:[%s6818_s7 + $0xd10] sm:$0xff] }
 0x267   : >> { %4770 = vmatprep.subr.bf16.mxu0 %v5957_v35  ;;  %4856 = vmatprep.subr.bf16.mxu1 %v5959_v36  ;;  %v1905_v34 = vld [vmem:[%s6818_s7 + $0xd50] sm:$0xff]  ;;  %v1898_v35 = vld [vmem:[%s6818_s7 + $0xd18] sm:$0xff] }
 0x268   : >> { %v1906_v36 = vld [vmem:[%s6818_s7 + $0xd58] sm:$0xff]  ;;  %v6085_v40 = vcombine.high %v1897_v26, %v1905_v34  ;;  %v6084_v46 = vcombine.low %v1897_v26, %v1905_v34 }
 0x269   : >> { %v6087_v41 = vcombine.high %v1898_v35, %v1906_v36  ;;  %v6086_v49 = vcombine.low %v1898_v35, %v1906_v36 }
 0x26a   : >> { %4771 = vmatpush1.bf16.msra.mxu0 %v5956_v42  ;;  %4857 = vmatpush1.bf16.msra.mxu1 %v5958_v43  ;;  %v1913_v42 = vld [vmem:[%s6818_s7 + $0xd90] sm:$0xff] }
 0x26b   : >> { %4772 = vmatprep.subr.bf16.mxu0 %v5973_v44  ;;  %4858 = vmatprep.subr.bf16.mxu1 %v5975_v45  ;;  %v1921_v43 = vld [vmem:[%s6818_s7 + $0xdd0] sm:$0xff]  ;;  %v1914_v44 = vld [vmem:[%s6818_s7 + $0xd98] sm:$0xff] }
 0x26c   : >> { %v1922_v45 = vld [vmem:[%s6818_s7 + $0xdd8] sm:$0xff]  ;;  %v6101_v50 = vcombine.high %v1913_v42, %v1921_v43  ;;  %v6100_v56 = vcombine.low %v1913_v42, %v1921_v43 }
 0x26d   : >> { %v6103_v51 = vcombine.high %v1914_v44, %v1922_v45  ;;  %v6102_v57 = vcombine.low %v1914_v44, %v1922_v45 }
 0x26e   : >> { %4773 = vmatpush1.bf16.msra.mxu0 %v5972_v52  ;;  %4859 = vmatpush1.bf16.msra.mxu1 %v5974_v53  ;;  %v1929_v52 = vld [vmem:[%s6818_s7 + $0xe10] sm:$0xff] }
 0x26f   : >> { %4774 = vmatprep.subr.bf16.mxu0 %v5989_v54  ;;  %4860 = vmatprep.subr.bf16.mxu1 %v5991_v55  ;;  %v1937_v53 = vld [vmem:[%s6818_s7 + $0xe50] sm:$0xff]  ;;  %v1930_v54 = vld [vmem:[%s6818_s7 + $0xe18] sm:$0xff] }
 0x270   : >> { %v1938_v55 = vld [vmem:[%s6818_s7 + $0xe58] sm:$0xff]  ;;  %v6117_v58 = vcombine.high %v1929_v52, %v1937_v53  ;;  %v6116_v28 = vcombine.low %v1929_v52, %v1937_v53 }
 0x271   : >> { %v6119_v59 = vcombine.high %v1930_v54, %v1938_v55  ;;  %v6118_v29 = vcombine.low %v1930_v54, %v1938_v55 }
 0x272   : >> { %4775 = vmatpush1.bf16.msra.mxu0 %v5988_v60  ;;  %4861 = vmatpush1.bf16.msra.mxu1 %v5990_v61  ;;  %v1945_v60 = vld [vmem:[%s6818_s7 + $0xe90] sm:$0xff] }
 0x273   : >> { %4776 = vmatprep.subr.bf16.mxu0 %v6005_v62  ;;  %4862 = vmatprep.subr.bf16.mxu1 %v6007_v63  ;;  %v1953_v61 = vld [vmem:[%s6818_s7 + $0xed0] sm:$0xff]  ;;  %v1946_v62 = vld [vmem:[%s6818_s7 + $0xe98] sm:$0xff] }
 0x274   : >> { %v1954_v63 = vld [vmem:[%s6818_s7 + $0xed8] sm:$0xff]  ;;  %v6133_v38 = vcombine.high %v1945_v60, %v1953_v61  ;;  %v6132_v5 = vcombine.low %v1945_v60, %v1953_v61 }
 0x275   : >> { %v6135_v47 = vcombine.high %v1946_v62, %v1954_v63  ;;  %v6134_v6 = vcombine.low %v1946_v62, %v1954_v63 }
 0x276   : >> { %4777 = vmatpush1.bf16.msra.mxu0 %v6004_v0  ;;  %4863 = vmatpush1.bf16.msra.mxu1 %v6006_v2  ;;  %v1961_v0 = vld [vmem:[%s6818_s7 + $0xf10] sm:$0xff] }
 0x277   : >> { %4778 = vmatprep.subr.bf16.mxu0 %v6021_v3  ;;  %4864 = vmatprep.subr.bf16.mxu1 %v6023_v4  ;;  %v1969_v2 = vld [vmem:[%s6818_s7 + $0xf50] sm:$0xff]  ;;  %v1962_v3 = vld [vmem:[%s6818_s7 + $0xf18] sm:$0xff] }
 0x278   : >> { %v1970_v4 = vld [vmem:[%s6818_s7 + $0xf58] sm:$0xff]  ;;  %v6149_v7 = vcombine.high %v1961_v0, %v1969_v2  ;;  %v6148_v13 = vcombine.low %v1961_v0, %v1969_v2 }
 0x279   : >> { %v6151_v8 = vcombine.high %v1962_v3, %v1970_v4  ;;  %v6150_v14 = vcombine.low %v1962_v3, %v1970_v4 }
 0x27a   : >> { %4779 = vmatpush1.bf16.msra.mxu0 %v6020_v25  ;;  %4865 = vmatpush1.bf16.msra.mxu1 %v6022_v9  ;;  %v1977_v25 = vld [vmem:[%s6818_s7 + $0xf90] sm:$0xff] }
 0x27b   : >> { %4780 = vmatprep.subr.bf16.mxu0 %v6037_v11  ;;  %4866 = vmatprep.subr.bf16.mxu1 %v6039_v12  ;;  %v1985_v9 = vld [vmem:[%s6818_s7 + $0xfd0] sm:$0xff]  ;;  %v1978_v11 = vld [vmem:[%s6818_s7 + $0xf98] sm:$0xff] }
 0x27c   : >> { %v1986_v12 = vld [vmem:[%s6818_s7 + $0xfd8] sm:$0xff]  ;;  %v6165_v15 = vcombine.high %v1977_v25, %v1985_v9  ;;  %v6164_v21 = vcombine.low %v1977_v25, %v1985_v9 }
 0x27d   : >> { %v6167_v16 = vcombine.high %v1978_v11, %v1986_v12  ;;  %v6166_v22 = vcombine.low %v1978_v11, %v1986_v12 }
 0x27e   : >> { %4781 = vmatpush1.bf16.msra.mxu0 %v6036_v17  ;;  %4867 = vmatpush1.bf16.msra.mxu1 %v6038_v18  ;;  %v1483_v17 = vld [vmem:[%s6818_s7 + $0x20] sm:$0xff] }
 0x27f   : >> { %4782 = vmatprep.subr.bf16.mxu0 %v6053_v19  ;;  %4868 = vmatprep.subr.bf16.mxu1 %v6055_v20  ;;  %v1491_v18 = vld [vmem:[%s6818_s7 + $0x60] sm:$0xff]  ;;  %v1484_v19 = vld [vmem:[%s6818_s7 + $0x28] sm:$0xff] }
 0x280   : >> { %v1492_v20 = vld [vmem:[%s6818_s7 + $0x68] sm:$0xff]  ;;  %v5673_v23 = vcombine.high %v1483_v17, %v1491_v18  ;;  %v5672_v26 = vcombine.low %v1483_v17, %v1491_v18 }
 0x281   : >> { %v5675_v30 = vcombine.high %v1484_v19, %v1492_v20  ;;  %v5674_v34 = vcombine.low %v1484_v19, %v1492_v20 }
 0x282   : >> { %4783 = vmatpush1.bf16.msra.mxu0 %v6052_v31  ;;  %4869 = vmatpush1.bf16.msra.mxu1 %v6054_v32  ;;  %v1499_v31 = vld [vmem:[%s6818_s7 + $0xa0] sm:$0xff] }
 0x283   : >> { %4784 = vmatprep.subr.bf16.mxu0 %v6069_v33  ;;  %4870 = vmatprep.subr.bf16.mxu1 %v6071_v24  ;;  %v1507_v32 = vld [vmem:[%s6818_s7 + $0xe0] sm:$0xff]  ;;  %v1500_v33 = vld [vmem:[%s6818_s7 + $0xa8] sm:$0xff] }
 0x284   : >> { %v1508_v24 = vld [vmem:[%s6818_s7 + $0xe8] sm:$0xff]  ;;  %v5689_v35 = vcombine.high %v1499_v31, %v1507_v32  ;;  %v5688_v42 = vcombine.low %v1499_v31, %v1507_v32 }
 0x285   : >> { %v5691_v36 = vcombine.high %v1500_v33, %v1508_v24  ;;  %v5690_v43 = vcombine.low %v1500_v33, %v1508_v24 }
 0x286   : >> { %4785 = vmatpush1.bf16.msra.mxu0 %v6068_v37  ;;  %4871 = vmatpush1.bf16.msra.mxu1 %v6070_v39  ;;  %v1515_v37 = vld [vmem:[%s6818_s7 + $0x120] sm:$0xff] }
 0x287   : >> { %4786 = vmatprep.subr.bf16.mxu0 %v6085_v40  ;;  %4872 = vmatprep.subr.bf16.mxu1 %v6087_v41  ;;  %v1523_v39 = vld [vmem:[%s6818_s7 + $0x160] sm:$0xff]  ;;  %v1516_v40 = vld [vmem:[%s6818_s7 + $0x128] sm:$0xff] }
 0x288   : >> { %v1524_v41 = vld [vmem:[%s6818_s7 + $0x168] sm:$0xff]  ;;  %v5705_v44 = vcombine.high %v1515_v37, %v1523_v39  ;;  %v5704_v52 = vcombine.low %v1515_v37, %v1523_v39 }
 0x289   : >> { %v5707_v45 = vcombine.high %v1516_v40, %v1524_v41  ;;  %v5706_v53 = vcombine.low %v1516_v40, %v1524_v41 }
 0x28a   : >> { %4787 = vmatpush1.bf16.msra.mxu0 %v6084_v46  ;;  %4873 = vmatpush1.bf16.msra.mxu1 %v6086_v49  ;;  %v1531_v46 = vld [vmem:[%s6818_s7 + $0x1a0] sm:$0xff] }
 0x28b   : >> { %4788 = vmatprep.subr.bf16.mxu0 %v6101_v50  ;;  %4874 = vmatprep.subr.bf16.mxu1 %v6103_v51  ;;  %v1539_v49 = vld [vmem:[%s6818_s7 + $0x1e0] sm:$0xff]  ;;  %v1532_v50 = vld [vmem:[%s6818_s7 + $0x1a8] sm:$0xff] }
 0x28c   : >> { %v1540_v51 = vld [vmem:[%s6818_s7 + $0x1e8] sm:$0xff]  ;;  %v5721_v54 = vcombine.high %v1531_v46, %v1539_v49  ;;  %v5720_v60 = vcombine.low %v1531_v46, %v1539_v49 }
 0x28d   : >> { %v5723_v55 = vcombine.high %v1532_v50, %v1540_v51  ;;  %v5722_v61 = vcombine.low %v1532_v50, %v1540_v51 }
 0x28e   : >> { %4789 = vmatpush1.bf16.msra.mxu0 %v6100_v56  ;;  %4875 = vmatpush1.bf16.msra.mxu1 %v6102_v57  ;;  %v1547_v56 = vld [vmem:[%s6818_s7 + $0x220] sm:$0xff] }
 0x28f   : >> { %4790 = vmatprep.subr.bf16.mxu0 %v6117_v58  ;;  %4876 = vmatprep.subr.bf16.mxu1 %v6119_v59  ;;  %v1555_v57 = vld [vmem:[%s6818_s7 + $0x260] sm:$0xff]  ;;  %v1548_v58 = vld [vmem:[%s6818_s7 + $0x228] sm:$0xff] }
 0x290   : >> { %v1556_v59 = vld [vmem:[%s6818_s7 + $0x268] sm:$0xff]  ;;  %v5737_v62 = vcombine.high %v1547_v56, %v1555_v57  ;;  %v5736_v0 = vcombine.low %v1547_v56, %v1555_v57 }
 0x291   : >> { %v5739_v63 = vcombine.high %v1548_v58, %v1556_v59  ;;  %v5738_v2 = vcombine.low %v1548_v58, %v1556_v59 }
 0x292   : >> { %4791 = vmatpush1.bf16.msra.mxu0 %v6116_v28  ;;  %4877 = vmatpush1.bf16.msra.mxu1 %v6118_v29  ;;  %v1563_v28 = vld [vmem:[%s6818_s7 + $0x2a0] sm:$0xff] }
 0x293   : >> { %4792 = vmatprep.subr.bf16.mxu0 %v6133_v38  ;;  %4878 = vmatprep.subr.bf16.mxu1 %v6135_v47  ;;  %v1571_v29 = vld [vmem:[%s6818_s7 + $0x2e0] sm:$0xff]  ;;  %v1564_v38 = vld [vmem:[%s6818_s7 + $0x2a8] sm:$0xff] }
 0x294   : >> { %v1572_v47 = vld [vmem:[%s6818_s7 + $0x2e8] sm:$0xff]  ;;  %v5753_v3 = vcombine.high %v1563_v28, %v1571_v29  ;;  %v5752_v25 = vcombine.low %v1563_v28, %v1571_v29 }
 0x295   : >> { %v5755_v4 = vcombine.high %v1564_v38, %v1572_v47  ;;  %v5754_v9 = vcombine.low %v1564_v38, %v1572_v47 }
 0x296   : >> { %4793 = vmatpush1.bf16.msra.mxu0 %v6132_v5  ;;  %4879 = vmatpush1.bf16.msra.mxu1 %v6134_v6  ;;  %v1579_v5 = vld [vmem:[%s6818_s7 + $0x320] sm:$0xff] }
 0x297   : >> { %4794 = vmatprep.subr.bf16.mxu0 %v6149_v7  ;;  %4880 = vmatprep.subr.bf16.mxu1 %v6151_v8  ;;  %v1587_v6 = vld [vmem:[%s6818_s7 + $0x360] sm:$0xff]  ;;  %v1580_v7 = vld [vmem:[%s6818_s7 + $0x328] sm:$0xff] }
 0x298   : >> { %v1588_v8 = vld [vmem:[%s6818_s7 + $0x368] sm:$0xff]  ;;  %v5769_v11 = vcombine.high %v1579_v5, %v1587_v6  ;;  %v5768_v17 = vcombine.low %v1579_v5, %v1587_v6 }
 0x299   : >> { %v5771_v12 = vcombine.high %v1580_v7, %v1588_v8  ;;  %v5770_v18 = vcombine.low %v1580_v7, %v1588_v8 }
 0x29a   : >> { %4795 = vmatpush1.bf16.msra.mxu0 %v6148_v13  ;;  %4881 = vmatpush1.bf16.msra.mxu1 %v6150_v14  ;;  %v1595_v13 = vld [vmem:[%s6818_s7 + $0x3a0] sm:$0xff] }
 0x29b   : >> { %4796 = vmatprep.subr.bf16.mxu0 %v6165_v15  ;;  %4882 = vmatprep.subr.bf16.mxu1 %v6167_v16  ;;  %v1603_v14 = vld [vmem:[%s6818_s7 + $0x3e0] sm:$0xff]  ;;  %v1596_v15 = vld [vmem:[%s6818_s7 + $0x3a8] sm:$0xff] }
 0x29c   : >> { %v1604_v16 = vld [vmem:[%s6818_s7 + $0x3e8] sm:$0xff]  ;;  %v5785_v19 = vcombine.high %v1595_v13, %v1603_v14  ;;  %v5784_v31 = vcombine.low %v1595_v13, %v1603_v14 }
 0x29d   : >> { %v5787_v20 = vcombine.high %v1596_v15, %v1604_v16  ;;  %v5786_v32 = vcombine.low %v1596_v15, %v1604_v16 }
 0x29e   : >> { %4797 = vmatpush1.bf16.msra.mxu0 %v6164_v21  ;;  %4883 = vmatpush1.bf16.msra.mxu1 %v6166_v22  ;;  %v1611_v21 = vld [vmem:[%s6818_s7 + $0x420] sm:$0xff] }
 0x29f   : >> { %4895 = vmatprep.subr.bf16.mxu0 %v5673_v23  ;;  %4981 = vmatprep.subr.bf16.mxu1 %v5675_v30  ;;  %v1619_v22 = vld [vmem:[%s6818_s7 + $0x460] sm:$0xff]  ;;  %v1612_v23 = vld [vmem:[%s6818_s7 + $0x428] sm:$0xff] }
 0x2a0   : >> { %v1620_v30 = vld [vmem:[%s6818_s7 + $0x468] sm:$0xff]  ;;  %v5801_v33 = vcombine.high %v1611_v21, %v1619_v22  ;;  %v5800_v37 = vcombine.low %v1611_v21, %v1619_v22 }
 0x2a1   : >> { %4799 = vmatmul.mubr.bf16.vlgmr.msra.gmra.mrb[4].mxu0 %v7608_v10  ;;  %4885 = vmatmul.mubr.bf16.vlgmr.msra.gmra.mrb[4].mxu1 %v7608_v10  ;;  %v5803_v24 = vcombine.high %v1612_v23, %v1620_v30  ;;  %v5802_v39 = vcombine.low %v1612_v23, %v1620_v30 }
 0x2a2   : >> { %4896 = vmatpush1.bf16.msra.mxu0 %v5672_v26  ;;  %4982 = vmatpush1.bf16.msra.mxu1 %v5674_v34  ;;  %v1627_v26 = vld [vmem:[%s6818_s7 + $0x4a0] sm:$0xff] }
 0x2a3   : >> { %4897 = vmatprep.subr.bf16.mxu0 %v5689_v35  ;;  %4983 = vmatprep.subr.bf16.mxu1 %v5691_v36  ;;  %v1635_v34 = vld [vmem:[%s6818_s7 + $0x4e0] sm:$0xff]  ;;  %v1628_v35 = vld [vmem:[%s6818_s7 + $0x4a8] sm:$0xff] }
 0x2a4   : >> { %4927 = vmatprep.mubr.bf16.mxu0 %v7492_v48  ;;  %5013 = vmatprep.mubr.bf16.mxu1 %v7492_v48  ;;  %v1636_v36 = vld [vmem:[%s6818_s7 + $0x4e8] sm:$0xff]  ;;  %v5817_v40 = vcombine.high %v1627_v26, %v1635_v34  ;;  %v5816_v46 = vcombine.low %v1627_v26, %v1635_v34 }
 0x2a5   : >> { %v5819_v41 = vcombine.high %v1628_v35, %v1636_v36  ;;  %v5818_v49 = vcombine.low %v1628_v35, %v1636_v36 }
 0x2a6   : >> { %4898 = vmatpush1.bf16.msra.mxu0 %v5688_v42  ;;  %4984 = vmatpush1.bf16.msra.mxu1 %v5690_v43  ;;  %v1643_v42 = vld [vmem:[%s6818_s7 + $0x520] sm:$0xff] }
 0x2a7   : >> { %4899 = vmatprep.subr.bf16.mxu0 %v5705_v44  ;;  %4985 = vmatprep.subr.bf16.mxu1 %v5707_v45  ;;  %v1651_v43 = vld [vmem:[%s6818_s7 + $0x560] sm:$0xff]  ;;  %v1644_v44 = vld [vmem:[%s6818_s7 + $0x528] sm:$0xff] }
 0x2a8   : >> { %v1652_v45 = vld [vmem:[%s6818_s7 + $0x568] sm:$0xff]  ;;  %v5833_v50 = vcombine.high %v1643_v42, %v1651_v43  ;;  %v5832_v56 = vcombine.low %v1643_v42, %v1651_v43 }
 0x2a9   : >> { %v5835_v51 = vcombine.high %v1644_v44, %v1652_v45  ;;  %v5834_v57 = vcombine.low %v1644_v44, %v1652_v45 }
 0x2aa   : >> { %4900 = vmatpush1.bf16.msra.mxu0 %v5704_v52  ;;  %4986 = vmatpush1.bf16.msra.mxu1 %v5706_v53  ;;  %v1659_v52 = vld [vmem:[%s6818_s7 + $0x5a0] sm:$0xff] }
 0x2ab   : >> { %4901 = vmatprep.subr.bf16.mxu0 %v5721_v54  ;;  %4987 = vmatprep.subr.bf16.mxu1 %v5723_v55  ;;  %v1667_v53 = vld [vmem:[%s6818_s7 + $0x5e0] sm:$0xff]  ;;  %v1660_v54 = vld [vmem:[%s6818_s7 + $0x5a8] sm:$0xff] }
 0x2ac   : >> { %v1668_v55 = vld [vmem:[%s6818_s7 + $0x5e8] sm:$0xff]  ;;  %v5849_v58 = vcombine.high %v1659_v52, %v1667_v53  ;;  %v5848_v28 = vcombine.low %v1659_v52, %v1667_v53 }
 0x2ad   : >> { %v5851_v59 = vcombine.high %v1660_v54, %v1668_v55  ;;  %v5850_v29 = vcombine.low %v1660_v54, %v1668_v55 }
 0x2ae   : >> { %4902 = vmatpush1.bf16.msra.mxu0 %v5720_v60  ;;  %4988 = vmatpush1.bf16.msra.mxu1 %v5722_v61  ;;  %v1675_v60 = vld [vmem:[%s6818_s7 + $0x620] sm:$0xff] }
 0x2af   : >> { %4903 = vmatprep.subr.bf16.mxu0 %v5737_v62  ;;  %4989 = vmatprep.subr.bf16.mxu1 %v5739_v63  ;;  %v1683_v61 = vld [vmem:[%s6818_s7 + $0x660] sm:$0xff]  ;;  %v1676_v62 = vld [vmem:[%s6818_s7 + $0x628] sm:$0xff] }
 0x2b0   : >> { %v1684_v63 = vld [vmem:[%s6818_s7 + $0x668] sm:$0xff]  ;;  %v5865_v38 = vcombine.high %v1675_v60, %v1683_v61  ;;  %v5864_v5 = vcombine.low %v1675_v60, %v1683_v61 }
 0x2b1   : >> { %v5867_v47 = vcombine.high %v1676_v62, %v1684_v63  ;;  %v5866_v6 = vcombine.low %v1676_v62, %v1684_v63 }
 0x2b2   : >> { %4904 = vmatpush1.bf16.msra.mxu0 %v5736_v0  ;;  %4990 = vmatpush1.bf16.msra.mxu1 %v5738_v2  ;;  %v1691_v0 = vld [vmem:[%s6818_s7 + $0x6a0] sm:$0xff] }
 0x2b3   : >> { %4905 = vmatprep.subr.bf16.mxu0 %v5753_v3  ;;  %4991 = vmatprep.subr.bf16.mxu1 %v5755_v4  ;;  %v1699_v2 = vld [vmem:[%s6818_s7 + $0x6e0] sm:$0xff]  ;;  %v1692_v3 = vld [vmem:[%s6818_s7 + $0x6a8] sm:$0xff] }
 0x2b4   : >> { %v1700_v4 = vld [vmem:[%s6818_s7 + $0x6e8] sm:$0xff]  ;;  %v5881_v7 = vcombine.high %v1691_v0, %v1699_v2  ;;  %v5880_v13 = vcombine.low %v1691_v0, %v1699_v2 }
 0x2b5   : >> { %v5883_v8 = vcombine.high %v1692_v3, %v1700_v4  ;;  %v5882_v14 = vcombine.low %v1692_v3, %v1700_v4 }
 0x2b6   : >> { %4906 = vmatpush1.bf16.msra.mxu0 %v5752_v25  ;;  %4992 = vmatpush1.bf16.msra.mxu1 %v5754_v9  ;;  %v1707_v25 = vld [vmem:[%s6818_s7 + $0x720] sm:$0xff] }
 0x2b7   : >> { %4907 = vmatprep.subr.bf16.mxu0 %v5769_v11  ;;  %4993 = vmatprep.subr.bf16.mxu1 %v5771_v12  ;;  %v1715_v9 = vld [vmem:[%s6818_s7 + $0x760] sm:$0xff]  ;;  %v1708_v11 = vld [vmem:[%s6818_s7 + $0x728] sm:$0xff] }
 0x2b8   : >> { %v1716_v12 = vld [vmem:[%s6818_s7 + $0x768] sm:$0xff]  ;;  %v5897_v15 = vcombine.high %v1707_v25, %v1715_v9  ;;  %v5896_v21 = vcombine.low %v1707_v25, %v1715_v9 }
 0x2b9   : >> { %v5899_v16 = vcombine.high %v1708_v11, %v1716_v12  ;;  %v5898_v22 = vcombine.low %v1708_v11, %v1716_v12 }
 0x2ba   : >> { %4908 = vmatpush1.bf16.msra.mxu0 %v5768_v17  ;;  %4994 = vmatpush1.bf16.msra.mxu1 %v5770_v18  ;;  %v1723_v17 = vld [vmem:[%s6818_s7 + $0x7a0] sm:$0xff] }
 0x2bb   : >> { %4909 = vmatprep.subr.bf16.mxu0 %v5785_v19  ;;  %4995 = vmatprep.subr.bf16.mxu1 %v5787_v20  ;;  %v1731_v18 = vld [vmem:[%s6818_s7 + $0x7e0] sm:$0xff]  ;;  %v1724_v19 = vld [vmem:[%s6818_s7 + $0x7a8] sm:$0xff] }
 0x2bc   : >> { %v1732_v20 = vld [vmem:[%s6818_s7 + $0x7e8] sm:$0xff]  ;;  %v5913_v23 = vcombine.high %v1723_v17, %v1731_v18  ;;  %v5912_v26 = vcombine.low %v1723_v17, %v1731_v18 }
 0x2bd   : >> { %v5915_v30 = vcombine.high %v1724_v19, %v1732_v20  ;;  %v5914_v34 = vcombine.low %v1724_v19, %v1732_v20 }
 0x2be   : >> { %4910 = vmatpush1.bf16.msra.mxu0 %v5784_v31  ;;  %4996 = vmatpush1.bf16.msra.mxu1 %v5786_v32  ;;  %v1739_v31 = vld [vmem:[%s6818_s7 + $0x820] sm:$0xff] }
 0x2bf   : >> { %4911 = vmatprep.subr.bf16.mxu0 %v5801_v33  ;;  %4997 = vmatprep.subr.bf16.mxu1 %v5803_v24  ;;  %v1747_v32 = vld [vmem:[%s6818_s7 + $0x860] sm:$0xff]  ;;  %v1740_v33 = vld [vmem:[%s6818_s7 + $0x828] sm:$0xff] }
 0x2c0   : >> { %v1748_v24 = vld [vmem:[%s6818_s7 + $0x868] sm:$0xff]  ;;  %v5929_v35 = vcombine.high %v1739_v31, %v1747_v32  ;;  %v5928_v42 = vcombine.low %v1739_v31, %v1747_v32 }
 0x2c1   : >> { %v5931_v36 = vcombine.high %v1740_v33, %v1748_v24  ;;  %v5930_v43 = vcombine.low %v1740_v33, %v1748_v24  ;;  %v1852_v32 = vld [vmem:[%s6818_s7 + $0xba8] sm:$0xff] }
 0x2c2   : >> { %4912 = vmatpush1.bf16.msra.mxu0 %v5800_v37  ;;  %4998 = vmatpush1.bf16.msra.mxu1 %v5802_v39  ;;  %v1755_v37 = vld [vmem:[%s6818_s7 + $0x8a0] sm:$0xff]  ;;  %v1860_v33 = vld [vmem:[%s6818_s7 + $0xbe8] sm:$0xff] }
 0x2c3   : >> { %4913 = vmatprep.subr.bf16.mxu0 %v5817_v40  ;;  %4999 = vmatprep.subr.bf16.mxu1 %v5819_v41  ;;  %v1763_v39 = vld [vmem:[%s6818_s7 + $0x8e0] sm:$0xff]  ;;  %v1756_v40 = vld [vmem:[%s6818_s7 + $0x8a8] sm:$0xff] }
 0x2c4   : >> { %v1764_v41 = vld [vmem:[%s6818_s7 + $0x8e8] sm:$0xff]  ;;  %v5945_v44 = vcombine.high %v1755_v37, %v1763_v39  ;;  %v5944_v52 = vcombine.low %v1755_v37, %v1763_v39 }
 0x2c5   : >> { %v5947_v45 = vcombine.high %v1756_v40, %v1764_v41  ;;  %v5946_v53 = vcombine.low %v1756_v40, %v1764_v41  ;;  %v6043_v41 = vcombine.high %v1852_v32, %v1860_v33 }
 0x2c6   : >> { %4914 = vmatpush1.bf16.msra.mxu0 %v5816_v46  ;;  %5000 = vmatpush1.bf16.msra.mxu1 %v5818_v49  ;;  %v1771_v46 = vld [vmem:[%s6818_s7 + $0x920] sm:$0xff] }
 0x2c7   : >> { %4915 = vmatprep.subr.bf16.mxu0 %v5833_v50  ;;  %5001 = vmatprep.subr.bf16.mxu1 %v5835_v51  ;;  %v1779_v49 = vld [vmem:[%s6818_s7 + $0x960] sm:$0xff]  ;;  %v1772_v50 = vld [vmem:[%s6818_s7 + $0x928] sm:$0xff] }
 0x2c8   : >> { %v1780_v51 = vld [vmem:[%s6818_s7 + $0x968] sm:$0xff]  ;;  %v5961_v54 = vcombine.high %v1771_v46, %v1779_v49  ;;  %v5960_v60 = vcombine.low %v1771_v46, %v1779_v49  ;;  %v6042_v49 = vcombine.low %v1852_v32, %v1860_v33 }
 0x2c9   : >> { %v5963_v55 = vcombine.high %v1772_v50, %v1780_v51  ;;  %v5962_v61 = vcombine.low %v1772_v50, %v1780_v51 }
 0x2ca   : >> { %4916 = vmatpush1.bf16.msra.mxu0 %v5832_v56  ;;  %5002 = vmatpush1.bf16.msra.mxu1 %v5834_v57  ;;  %v1787_v56 = vld [vmem:[%s6818_s7 + $0x9a0] sm:$0xff] }
 0x2cb   : >> { %4917 = vmatprep.subr.bf16.mxu0 %v5849_v58  ;;  %5003 = vmatprep.subr.bf16.mxu1 %v5851_v59  ;;  %v1795_v57 = vld [vmem:[%s6818_s7 + $0x9e0] sm:$0xff]  ;;  %v1788_v58 = vld [vmem:[%s6818_s7 + $0x9a8] sm:$0xff] }
 0x2cc   : >> { %v1796_v59 = vld [vmem:[%s6818_s7 + $0x9e8] sm:$0xff]  ;;  %v5977_v62 = vcombine.high %v1787_v56, %v1795_v57  ;;  %v5976_v0 = vcombine.low %v1787_v56, %v1795_v57 }
 0x2cd   : >> { %v5979_v63 = vcombine.high %v1788_v58, %v1796_v59  ;;  %v5978_v2 = vcombine.low %v1788_v58, %v1796_v59 }
 0x2ce   : >> { %4918 = vmatpush1.bf16.msra.mxu0 %v5848_v28  ;;  %5004 = vmatpush1.bf16.msra.mxu1 %v5850_v29  ;;  %v1803_v28 = vld [vmem:[%s6818_s7 + $0xa20] sm:$0xff] }
 0x2cf   : >> { %4919 = vmatprep.subr.bf16.mxu0 %v5865_v38  ;;  %5005 = vmatprep.subr.bf16.mxu1 %v5867_v47  ;;  %v1811_v29 = vld [vmem:[%s6818_s7 + $0xa60] sm:$0xff]  ;;  %v1804_v38 = vld [vmem:[%s6818_s7 + $0xa28] sm:$0xff] }
 0x2d0   : >> { %v1812_v47 = vld [vmem:[%s6818_s7 + $0xa68] sm:$0xff]  ;;  %v5993_v3 = vcombine.high %v1803_v28, %v1811_v29  ;;  %v5992_v25 = vcombine.low %v1803_v28, %v1811_v29 }
 0x2d1   : >> { %v5995_v4 = vcombine.high %v1804_v38, %v1812_v47  ;;  %v5994_v9 = vcombine.low %v1804_v38, %v1812_v47 }
 0x2d2   : >> { %4920 = vmatpush1.bf16.msra.mxu0 %v5864_v5  ;;  %5006 = vmatpush1.bf16.msra.mxu1 %v5866_v6  ;;  %v1819_v5 = vld [vmem:[%s6818_s7 + $0xaa0] sm:$0xff] }
 0x2d3   : >> { %4921 = vmatprep.subr.bf16.mxu0 %v5881_v7  ;;  %5007 = vmatprep.subr.bf16.mxu1 %v5883_v8  ;;  %v1827_v6 = vld [vmem:[%s6818_s7 + $0xae0] sm:$0xff]  ;;  %v1820_v7 = vld [vmem:[%s6818_s7 + $0xaa8] sm:$0xff] }
 0x2d4   : >> { %v1828_v8 = vld [vmem:[%s6818_s7 + $0xae8] sm:$0xff]  ;;  %v6009_v11 = vcombine.high %v1819_v5, %v1827_v6  ;;  %v6008_v17 = vcombine.low %v1819_v5, %v1827_v6 }
 0x2d5   : >> { %v6011_v12 = vcombine.high %v1820_v7, %v1828_v8  ;;  %v6010_v18 = vcombine.low %v1820_v7, %v1828_v8 }
 0x2d6   : >> { %4922 = vmatpush1.bf16.msra.mxu0 %v5880_v13  ;;  %5008 = vmatpush1.bf16.msra.mxu1 %v5882_v14  ;;  %v1835_v13 = vld [vmem:[%s6818_s7 + $0xb20] sm:$0xff] }
 0x2d7   : >> { %4923 = vmatprep.subr.bf16.mxu0 %v5897_v15  ;;  %5009 = vmatprep.subr.bf16.mxu1 %v5899_v16  ;;  %v1843_v14 = vld [vmem:[%s6818_s7 + $0xb60] sm:$0xff]  ;;  %v1836_v15 = vld [vmem:[%s6818_s7 + $0xb28] sm:$0xff] }
 0x2d8   : >> { %v1844_v16 = vld [vmem:[%s6818_s7 + $0xb68] sm:$0xff]  ;;  %v6025_v19 = vcombine.high %v1835_v13, %v1843_v14 }
 0x2d9   : >> { %v6026_v37 = vcombine.low %v1836_v15, %v1844_v16 }
 0x2da   : >> { %4924 = vmatpush1.bf16.msra.mxu0 %v5896_v21  ;;  %5010 = vmatpush1.bf16.msra.mxu1 %v5898_v22  ;;  %v6027_v21 = vcombine.high %v1836_v15, %v1844_v16  ;;  %v1851_v22 = vld [vmem:[%s6818_s7 + $0xba0] sm:$0xff] }
 0x2db   : >> { %4925 = vmatprep.subr.bf16.mxu0 %v5913_v23  ;;  %5011 = vmatprep.subr.bf16.mxu1 %v5915_v30  ;;  %v1859_v23 = vld [vmem:[%s6818_s7 + $0xbe0] sm:$0xff] }
 0x2dc   : >> { %v6041_v39 = vcombine.high %v1851_v22, %v1859_v23  ;;  %v6040_v46 = vcombine.low %v1851_v22, %v1859_v23 }
 0x2de   : >> { %4926 = vmatpush1.bf16.msra.mxu0 %v5912_v26  ;;  %5012 = vmatpush1.bf16.msra.mxu1 %v5914_v34  ;;  %v6024_v34 = vcombine.low %v1835_v13, %v1843_v14 }
 0x2df   : >> { %4938 = vmatprep.subr.bf16.mxu0 %v5929_v35  ;;  %5024 = vmatprep.subr.bf16.mxu1 %v5931_v36 }
 0x2e1   : >> { %4928 = vmatmul.mubr.bf16.vlgmr.msra.gmra.mrb[8].mxu0 %v7537_v1  ;;  %5014 = vmatmul.mubr.bf16.vlgmr.msra.gmra.mrb[8].mxu1 %v7537_v1 }
 0x2e2   : >> { %4939 = vmatpush1.bf16.msra.mxu0 %v5928_v42  ;;  %5025 = vmatpush1.bf16.msra.mxu1 %v5930_v43  ;;  %v1867_v42 = vld [vmem:[%s6818_s7 + $0xc20] sm:$0xff] }
 0x2e3   : >> { %4940 = vmatprep.subr.bf16.mxu0 %v5945_v44  ;;  %5026 = vmatprep.subr.bf16.mxu1 %v5947_v45  ;;  %v1875_v43 = vld [vmem:[%s6818_s7 + $0xc60] sm:$0xff]  ;;  %v1868_v44 = vld [vmem:[%s6818_s7 + $0xc28] sm:$0xff] }
 0x2e4   : >> { %4970 = vmatprep.mubr.bf16.mxu0 %v7542_v27  ;;  %5056 = vmatprep.mubr.bf16.mxu1 %v7542_v27  ;;  %v1876_v45 = vld [vmem:[%s6818_s7 + $0xc68] sm:$0xff]  ;;  %v6057_v50 = vcombine.high %v1867_v42, %v1875_v43  ;;  %v6056_v56 = vcombine.low %v1867_v42, %v1875_v43 }
 0x2e5   : >> { %v6059_v51 = vcombine.high %v1868_v44, %v1876_v45  ;;  %v6058_v57 = vcombine.low %v1868_v44, %v1876_v45 }
 0x2e6   : >> { %4941 = vmatpush1.bf16.msra.mxu0 %v5944_v52  ;;  %5027 = vmatpush1.bf16.msra.mxu1 %v5946_v53  ;;  %v1883_v52 = vld [vmem:[%s6818_s7 + $0xca0] sm:$0xff] }
 0x2e7   : >> { %4942 = vmatprep.subr.bf16.mxu0 %v5961_v54  ;;  %5028 = vmatprep.subr.bf16.mxu1 %v5963_v55  ;;  %v1891_v53 = vld [vmem:[%s6818_s7 + $0xce0] sm:$0xff]  ;;  %v1884_v54 = vld [vmem:[%s6818_s7 + $0xca8] sm:$0xff] }
 0x2e8   : >> { %v1892_v55 = vld [vmem:[%s6818_s7 + $0xce8] sm:$0xff]  ;;  %v6073_v58 = vcombine.high %v1883_v52, %v1891_v53  ;;  %v6072_v28 = vcombine.low %v1883_v52, %v1891_v53 }
 0x2e9   : >> { %v6075_v59 = vcombine.high %v1884_v54, %v1892_v55  ;;  %v6074_v29 = vcombine.low %v1884_v54, %v1892_v55 }
 0x2ea   : >> { %4943 = vmatpush1.bf16.msra.mxu0 %v5960_v60  ;;  %5029 = vmatpush1.bf16.msra.mxu1 %v5962_v61  ;;  %v1899_v60 = vld [vmem:[%s6818_s7 + $0xd20] sm:$0xff] }
 0x2eb   : >> { %4944 = vmatprep.subr.bf16.mxu0 %v5977_v62  ;;  %5030 = vmatprep.subr.bf16.mxu1 %v5979_v63  ;;  %v1907_v61 = vld [vmem:[%s6818_s7 + $0xd60] sm:$0xff]  ;;  %v1900_v62 = vld [vmem:[%s6818_s7 + $0xd28] sm:$0xff] }
 0x2ec   : >> { %v1908_v63 = vld [vmem:[%s6818_s7 + $0xd68] sm:$0xff]  ;;  %v6089_v38 = vcombine.high %v1899_v60, %v1907_v61  ;;  %v6088_v5 = vcombine.low %v1899_v60, %v1907_v61 }
 0x2ed   : >> { %v6091_v47 = vcombine.high %v1900_v62, %v1908_v63  ;;  %v6090_v6 = vcombine.low %v1900_v62, %v1908_v63 }
 0x2ee   : >> { %4945 = vmatpush1.bf16.msra.mxu0 %v5976_v0  ;;  %5031 = vmatpush1.bf16.msra.mxu1 %v5978_v2  ;;  %v1915_v0 = vld [vmem:[%s6818_s7 + $0xda0] sm:$0xff] }
 0x2ef   : >> { %4946 = vmatprep.subr.bf16.mxu0 %v5993_v3  ;;  %5032 = vmatprep.subr.bf16.mxu1 %v5995_v4  ;;  %v1923_v2 = vld [vmem:[%s6818_s7 + $0xde0] sm:$0xff]  ;;  %v1916_v3 = vld [vmem:[%s6818_s7 + $0xda8] sm:$0xff] }
 0x2f0   : >> { %v1924_v4 = vld [vmem:[%s6818_s7 + $0xde8] sm:$0xff]  ;;  %v6105_v7 = vcombine.high %v1915_v0, %v1923_v2  ;;  %v6104_v13 = vcombine.low %v1915_v0, %v1923_v2 }
 0x2f1   : >> { %v6107_v8 = vcombine.high %v1916_v3, %v1924_v4  ;;  %v6106_v14 = vcombine.low %v1916_v3, %v1924_v4 }
 0x2f2   : >> { %4947 = vmatpush1.bf16.msra.mxu0 %v5992_v25  ;;  %5033 = vmatpush1.bf16.msra.mxu1 %v5994_v9  ;;  %v1931_v25 = vld [vmem:[%s6818_s7 + $0xe20] sm:$0xff] }
 0x2f3   : >> { %4948 = vmatprep.subr.bf16.mxu0 %v6009_v11  ;;  %5034 = vmatprep.subr.bf16.mxu1 %v6011_v12  ;;  %v1939_v9 = vld [vmem:[%s6818_s7 + $0xe60] sm:$0xff]  ;;  %v1932_v11 = vld [vmem:[%s6818_s7 + $0xe28] sm:$0xff] }
 0x2f4   : >> { %v7840_v20 = vpop.f32.mrb[0].mxu0  ;;  %v7844_v30 = vpop.f32.mrb[0].mxu1  ;;  %v1940_v12 = vld [vmem:[%s6818_s7 + $0xe68] sm:$0xff]  ;;  %v6121_v15 = vcombine.high %v1931_v25, %v1939_v9  ;;  %v6120_v22 = vcombine.low %v1931_v25, %v1939_v9 }
 0x2f5   : >> { %v7846_v31 = vpop.f32.mrb[1].mxu0  ;;  %v7850_v24 = vpop.f32.mrb[1].mxu1  ;;  %v6123_v16 = vcombine.high %v1932_v11, %v1940_v12  ;;  %v6122_v23 = vcombine.low %v1932_v11, %v1940_v12 }
 0x2f6   : >> { %v7852_v26 = vpop.f32.mrb[2].mxu0  ;;  %4949 = vmatpush1.bf16.msra.mxu0 %v6008_v17  ;;  %v7854_v35 = vpop.f32.mrb[2].mxu1  ;;  %5035 = vmatpush1.bf16.msra.mxu1 %v6010_v18  ;;  %v1947_v17 = vld [vmem:[%s6818_s7 + $0xea0] sm:$0xff] }
 0x2f7   : >> { %v7856_v36 = vpop.f32.mrb[3].mxu0  ;;  %4950 = vmatprep.subr.bf16.mxu0 %v6025_v19  ;;  %v7858_v40 = vpop.f32.mrb[3].mxu1  ;;  %5036 = vmatprep.subr.bf16.mxu1 %v6027_v21  ;;  %v1955_v18 = vld [vmem:[%s6818_s7 + $0xee0] sm:$0xff]  ;;  %v1948_v19 = vld [vmem:[%s6818_s7 + $0xea8] sm:$0xff] }
 0x2f8   : >> { %v1956_v21 = vld [vmem:[%s6818_s7 + $0xee8] sm:$0xff]  ;;  %v6137_v32 = vcombine.high %v1947_v17, %v1955_v18  ;;  %v6136_v42 = vcombine.low %v1947_v17, %v1955_v18 }
 0x2f9   : >> { %v6139_v33 = vcombine.high %v1948_v19, %v1956_v21  ;;  %v6138_v43 = vcombine.low %v1948_v19, %v1956_v21 }
 0x2fa   : >> { %4951 = vmatpush1.bf16.msra.mxu0 %v6024_v34  ;;  %5037 = vmatpush1.bf16.msra.mxu1 %v6026_v37  ;;  %v1963_v34 = vld [vmem:[%s6818_s7 + $0xf20] sm:$0xff] }
 0x2fb   : >> { %4952 = vmatprep.subr.bf16.mxu0 %v6041_v39  ;;  %5038 = vmatprep.subr.bf16.mxu1 %v6043_v41  ;;  %v1971_v37 = vld [vmem:[%s6818_s7 + $0xf60] sm:$0xff]  ;;  %v1964_v39 = vld [vmem:[%s6818_s7 + $0xf28] sm:$0xff] }
 0x2fc   : >> { %v1972_v41 = vld [vmem:[%s6818_s7 + $0xf68] sm:$0xff]  ;;  %v6153_v44 = vcombine.high %v1963_v34, %v1971_v37  ;;  %v6152_v52 = vcombine.low %v1963_v34, %v1971_v37 }
 0x2fd   : >> { %v6155_v45 = vcombine.high %v1964_v39, %v1972_v41  ;;  %v6154_v53 = vcombine.low %v1964_v39, %v1972_v41  ;;  %v1565_v41 = vld [vmem:[%s6818_s7 + $0x2b0] sm:$0xff] }
 0x2fe   : >> { %4953 = vmatpush1.bf16.msra.mxu0 %v6040_v46  ;;  %5039 = vmatpush1.bf16.msra.mxu1 %v6042_v49  ;;  %v1979_v46 = vld [vmem:[%s6818_s7 + $0xfa0] sm:$0xff] }
 0x2ff   : >> { %4954 = vmatprep.subr.bf16.mxu0 %v6057_v50  ;;  %5040 = vmatprep.subr.bf16.mxu1 %v6059_v51  ;;  %v1987_v49 = vld [vmem:[%s6818_s7 + $0xfe0] sm:$0xff]  ;;  %v1980_v50 = vld [vmem:[%s6818_s7 + $0xfa8] sm:$0xff] }
 0x300   : >> { %v1988_v51 = vld [vmem:[%s6818_s7 + $0xfe8] sm:$0xff]  ;;  %v6169_v54 = vcombine.high %v1979_v46, %v1987_v49  ;;  %v6168_v60 = vcombine.low %v1979_v46, %v1987_v49 }
 0x301   : >> { %v6171_v55 = vcombine.high %v1980_v50, %v1988_v51  ;;  %v6170_v61 = vcombine.low %v1980_v50, %v1988_v51  ;;  %v1581_v51 = vld [vmem:[%s6818_s7 + $0x330] sm:$0xff] }
 0x302   : >> { %4955 = vmatpush1.bf16.msra.mxu0 %v6056_v56  ;;  %5041 = vmatpush1.bf16.msra.mxu1 %v6058_v57  ;;  %v1485_v56 = vld [vmem:[%s6818_s7 + $0x30] sm:$0xff] }
 0x303   : >> { %4956 = vmatprep.subr.bf16.mxu0 %v6073_v58  ;;  %5042 = vmatprep.subr.bf16.mxu1 %v6075_v59  ;;  %v1493_v57 = vld [vmem:[%s6818_s7 + $0x70] sm:$0xff]  ;;  %v1486_v58 = vld [vmem:[%s6818_s7 + $0x38] sm:$0xff] }
 0x304   : >> { %v1494_v59 = vld [vmem:[%s6818_s7 + $0x78] sm:$0xff]  ;;  %v5677_v62 = vcombine.high %v1485_v56, %v1493_v57  ;;  %v5676_v0 = vcombine.low %v1485_v56, %v1493_v57 }
 0x305   : >> { %v5679_v63 = vcombine.high %v1486_v58, %v1494_v59  ;;  %v5678_v2 = vcombine.low %v1486_v58, %v1494_v59  ;;  %v1597_v59 = vld [vmem:[%s6818_s7 + $0x3b0] sm:$0xff] }
 0x306   : >> { %4957 = vmatpush1.bf16.msra.mxu0 %v6072_v28  ;;  %5043 = vmatpush1.bf16.msra.mxu1 %v6074_v29  ;;  %v1501_v28 = vld [vmem:[%s6818_s7 + $0xb0] sm:$0xff] }
 0x307   : >> { %4958 = vmatprep.subr.bf16.mxu0 %v6089_v38  ;;  %5044 = vmatprep.subr.bf16.mxu1 %v6091_v47  ;;  %v1509_v29 = vld [vmem:[%s6818_s7 + $0xf0] sm:$0xff]  ;;  %v1502_v38 = vld [vmem:[%s6818_s7 + $0xb8] sm:$0xff] }
 0x308   : >> { %v1510_v47 = vld [vmem:[%s6818_s7 + $0xf8] sm:$0xff]  ;;  %v5693_v3 = vcombine.high %v1501_v28, %v1509_v29  ;;  %v5692_v25 = vcombine.low %v1501_v28, %v1509_v29 }
 0x309   : >> { %v5695_v4 = vcombine.high %v1502_v38, %v1510_v47  ;;  %v5694_v9 = vcombine.low %v1502_v38, %v1510_v47  ;;  %v1613_v47 = vld [vmem:[%s6818_s7 + $0x430] sm:$0xff] }
 0x30a   : >> { %4959 = vmatpush1.bf16.msra.mxu0 %v6088_v5  ;;  %5045 = vmatpush1.bf16.msra.mxu1 %v6090_v6  ;;  %v1517_v5 = vld [vmem:[%s6818_s7 + $0x130] sm:$0xff] }
 0x30b   : >> { %4960 = vmatprep.subr.bf16.mxu0 %v6105_v7  ;;  %5046 = vmatprep.subr.bf16.mxu1 %v6107_v8  ;;  %v1525_v6 = vld [vmem:[%s6818_s7 + $0x170] sm:$0xff]  ;;  %v1518_v7 = vld [vmem:[%s6818_s7 + $0x138] sm:$0xff] }
 0x30c   : >> { %v1526_v8 = vld [vmem:[%s6818_s7 + $0x178] sm:$0xff]  ;;  %v5709_v11 = vcombine.high %v1517_v5, %v1525_v6  ;;  %v5708_v17 = vcombine.low %v1517_v5, %v1525_v6 }
 0x30d   : >> { %v5711_v12 = vcombine.high %v1518_v7, %v1526_v8  ;;  %v5710_v18 = vcombine.low %v1518_v7, %v1526_v8  ;;  %v1629_v8 = vld [vmem:[%s6818_s7 + $0x4b0] sm:$0xff] }
 0x30e   : >> { %4961 = vmatpush1.bf16.msra.mxu0 %v6104_v13  ;;  %5047 = vmatpush1.bf16.msra.mxu1 %v6106_v14  ;;  %v1533_v13 = vld [vmem:[%s6818_s7 + $0x1b0] sm:$0xff] }
 0x30f   : >> { %4962 = vmatprep.subr.bf16.mxu0 %v6121_v15  ;;  %5048 = vmatprep.subr.bf16.mxu1 %v6123_v16  ;;  %v1541_v14 = vld [vmem:[%s6818_s7 + $0x1f0] sm:$0xff]  ;;  %v1534_v15 = vld [vmem:[%s6818_s7 + $0x1b8] sm:$0xff] }
 0x310   : >> { %v1542_v16 = vld [vmem:[%s6818_s7 + $0x1f8] sm:$0xff]  ;;  %v5725_v19 = vcombine.high %v1533_v13, %v1541_v14  ;;  %v5724_v34 = vcombine.low %v1533_v13, %v1541_v14 }
 0x311   : >> { %v5727_v21 = vcombine.high %v1534_v15, %v1542_v16 }
 0x312   : >> { %4963 = vmatpush1.bf16.msra.mxu0 %v6120_v22  ;;  %5049 = vmatpush1.bf16.msra.mxu1 %v6122_v23  ;;  %v1549_v22 = vld [vmem:[%s6818_s7 + $0x230] sm:$0xff] }
 0x313   : >> { %4964 = vmatprep.subr.bf16.mxu0 %v6137_v32  ;;  %5050 = vmatprep.subr.bf16.mxu1 %v6139_v33  ;;  %v1557_v23 = vld [vmem:[%s6818_s7 + $0x270] sm:$0xff]  ;;  %v1550_v32 = vld [vmem:[%s6818_s7 + $0x238] sm:$0xff] }
 0x314   : >> { %v1558_v33 = vld [vmem:[%s6818_s7 + $0x278] sm:$0xff]  ;;  %v5741_v37 = vcombine.high %v1549_v22, %v1557_v23 }
 0x315   : >> { %v5743_v39 = vcombine.high %v1550_v32, %v1558_v33  ;;  %v5742_v46 = vcombine.low %v1550_v32, %v1558_v33  ;;  %v1661_v33 = vld [vmem:[%s6818_s7 + $0x5b0] sm:$0xff] }
 0x316   : >> { %4965 = vmatpush1.bf16.msra.mxu0 %v6136_v42  ;;  %5051 = vmatpush1.bf16.msra.mxu1 %v6138_v43  ;;  %v1573_v42 = vld [vmem:[%s6818_s7 + $0x2f0] sm:$0xff]  ;;  %v1566_v43 = vld [vmem:[%s6818_s7 + $0x2b8] sm:$0xff] }
 0x317   : >> { %4966 = vmatprep.subr.bf16.mxu0 %v6153_v44  ;;  %5052 = vmatprep.subr.bf16.mxu1 %v6155_v45  ;;  %v1574_v44 = vld [vmem:[%s6818_s7 + $0x2f8] sm:$0xff]  ;;  %v5740_v45 = vcombine.low %v1549_v22, %v1557_v23  ;;  %v5757_v49 = vcombine.high %v1565_v41, %v1573_v42 }
 0x318   : >> { %v5759_v50 = vcombine.high %v1566_v43, %v1574_v44  ;;  %v5758_v56 = vcombine.low %v1566_v43, %v1574_v44  ;;  %v1677_v44 = vld [vmem:[%s6818_s7 + $0x630] sm:$0xff] }
 0x31a   : >> { %4967 = vmatpush1.bf16.msra.mxu0 %v6152_v52  ;;  %5053 = vmatpush1.bf16.msra.mxu1 %v6154_v53  ;;  %v1589_v52 = vld [vmem:[%s6818_s7 + $0x370] sm:$0xff]  ;;  %v1582_v53 = vld [vmem:[%s6818_s7 + $0x338] sm:$0xff] }
 0x31b   : >> { %4968 = vmatprep.subr.bf16.mxu0 %v6169_v54  ;;  %5054 = vmatprep.subr.bf16.mxu1 %v6171_v55  ;;  %v1590_v54 = vld [vmem:[%s6818_s7 + $0x378] sm:$0xff]  ;;  %v5756_v55 = vcombine.low %v1565_v41, %v1573_v42  ;;  %v5773_v57 = vcombine.high %v1581_v51, %v1589_v52 }
 0x31c   : >> { %v5775_v58 = vcombine.high %v1582_v53, %v1590_v54  ;;  %v5774_v28 = vcombine.low %v1582_v53, %v1590_v54  ;;  %v1693_v54 = vld [vmem:[%s6818_s7 + $0x6b0] sm:$0xff] }
 0x31e   : >> { %4969 = vmatpush1.bf16.msra.mxu0 %v6168_v60  ;;  %5055 = vmatpush1.bf16.msra.mxu1 %v6170_v61  ;;  %v1605_v60 = vld [vmem:[%s6818_s7 + $0x3f0] sm:$0xff]  ;;  %v1598_v61 = vld [vmem:[%s6818_s7 + $0x3b8] sm:$0xff] }
 0x31f   : >> { %5067 = vmatprep.subr.bf16.mxu0 %v5677_v62  ;;  %5153 = vmatprep.subr.bf16.mxu1 %v5679_v63  ;;  %v1606_v62 = vld [vmem:[%s6818_s7 + $0x3f8] sm:$0xff]  ;;  %v5772_v63 = vcombine.low %v1581_v51, %v1589_v52  ;;  %v5789_v29 = vcombine.high %v1597_v59, %v1605_v60 }
 0x320   : >> { %v5791_v38 = vcombine.high %v1598_v61, %v1606_v62  ;;  %v5790_v5 = vcombine.low %v1598_v61, %v1606_v62  ;;  %v1709_v62 = vld [vmem:[%s6818_s7 + $0x730] sm:$0xff] }
 0x321   : >> { %4971 = vmatmul.mubr.bf16.vlgmr.msra.gmra.mrb[8].mxu0 %v7608_v10  ;;  %5057 = vmatmul.mubr.bf16.vlgmr.msra.gmra.mrb[8].mxu1 %v7608_v10 }
 0x322   : >> { %5068 = vmatpush1.bf16.msra.mxu0 %v5676_v0  ;;  %5154 = vmatpush1.bf16.msra.mxu1 %v5678_v2  ;;  %v1621_v0 = vld [vmem:[%s6818_s7 + $0x470] sm:$0xff]  ;;  %v1614_v2 = vld [vmem:[%s6818_s7 + $0x438] sm:$0xff] }
 0x323   : >> { %5069 = vmatprep.subr.bf16.mxu0 %v5693_v3  ;;  %5155 = vmatprep.subr.bf16.mxu1 %v5695_v4  ;;  %v1622_v3 = vld [vmem:[%s6818_s7 + $0x478] sm:$0xff]  ;;  %v5788_v4 = vcombine.low %v1597_v59, %v1605_v60  ;;  %v5805_v6 = vcombine.high %v1613_v47, %v1621_v0 }
 0x324   : >> { %5099 = vmatprep.mubr.bf16.mxu0 %v7492_v48  ;;  %5185 = vmatprep.mubr.bf16.mxu1 %v7492_v48  ;;  %v5726_v48 = vcombine.low %v1534_v15, %v1542_v16  ;;  %v5807_v7 = vcombine.high %v1614_v2, %v1622_v3  ;;  %v5806_v13 = vcombine.low %v1614_v2, %v1622_v3  ;;  %v1645_v16 = vld [vmem:[%s6818_s7 + $0x530] sm:$0xff] }
 0x325   : >> { %v1725_v3 = vld [vmem:[%s6818_s7 + $0x7b0] sm:$0xff] }
 0x326   : >> { %5070 = vmatpush1.bf16.msra.mxu0 %v5692_v25  ;;  %5156 = vmatpush1.bf16.msra.mxu1 %v5694_v9  ;;  %v1637_v25 = vld [vmem:[%s6818_s7 + $0x4f0] sm:$0xff]  ;;  %v1630_v9 = vld [vmem:[%s6818_s7 + $0x4b8] sm:$0xff] }
 0x327   : >> { %5071 = vmatprep.subr.bf16.mxu0 %v5709_v11  ;;  %5157 = vmatprep.subr.bf16.mxu1 %v5711_v12  ;;  %v1638_v11 = vld [vmem:[%s6818_s7 + $0x4f8] sm:$0xff]  ;;  %v5804_v12 = vcombine.low %v1613_v47, %v1621_v0  ;;  %v5821_v14 = vcombine.high %v1629_v8, %v1637_v25 }
 0x328   : >> { %v5823_v15 = vcombine.high %v1630_v9, %v1638_v11  ;;  %v5822_v22 = vcombine.low %v1630_v9, %v1638_v11  ;;  %v1741_v11 = vld [vmem:[%s6818_s7 + $0x830] sm:$0xff] }
 0x32a   : >> { %5072 = vmatpush1.bf16.msra.mxu0 %v5708_v17  ;;  %5158 = vmatpush1.bf16.msra.mxu1 %v5710_v18  ;;  %v1653_v17 = vld [vmem:[%s6818_s7 + $0x570] sm:$0xff]  ;;  %v1646_v18 = vld [vmem:[%s6818_s7 + $0x538] sm:$0xff] }
 0x32b   : >> { %5073 = vmatprep.subr.bf16.mxu0 %v5725_v19  ;;  %5159 = vmatprep.subr.bf16.mxu1 %v5727_v21  ;;  %v1654_v19 = vld [vmem:[%s6818_s7 + $0x578] sm:$0xff]  ;;  %v5820_v21 = vcombine.low %v1629_v8, %v1637_v25  ;;  %v5837_v23 = vcombine.high %v1645_v16, %v1653_v17 }
 0x32c   : >> { %v5839_v32 = vcombine.high %v1646_v18, %v1654_v19  ;;  %v5838_v41 = vcombine.low %v1646_v18, %v1654_v19  ;;  %v1757_v19 = vld [vmem:[%s6818_s7 + $0x8b0] sm:$0xff] }
 0x32e   : >> { %5074 = vmatpush1.bf16.msra.mxu0 %v5724_v34  ;;  %5160 = vmatpush1.bf16.msra.mxu1 %v5726_v48  ;;  %v1669_v34 = vld [vmem:[%s6818_s7 + $0x5f0] sm:$0xff]  ;;  %v1662_v48 = vld [vmem:[%s6818_s7 + $0x5b8] sm:$0xff] }
 0x32f   : >> { %5075 = vmatprep.subr.bf16.mxu0 %v5741_v37  ;;  %5161 = vmatprep.subr.bf16.mxu1 %v5743_v39  ;;  %v1670_v37 = vld [vmem:[%s6818_s7 + $0x5f8] sm:$0xff]  ;;  %v5836_v39 = vcombine.low %v1645_v16, %v1653_v17  ;;  %v5853_v42 = vcombine.high %v1661_v33, %v1669_v34 }
 0x330   : >> { %v5855_v43 = vcombine.high %v1662_v48, %v1670_v37  ;;  %v5854_v51 = vcombine.low %v1662_v48, %v1670_v37  ;;  %v1773_v37 = vld [vmem:[%s6818_s7 + $0x930] sm:$0xff] }
 0x332   : >> { %5076 = vmatpush1.bf16.msra.mxu0 %v5740_v45  ;;  %5162 = vmatpush1.bf16.msra.mxu1 %v5742_v46  ;;  %v1685_v45 = vld [vmem:[%s6818_s7 + $0x670] sm:$0xff]  ;;  %v1678_v46 = vld [vmem:[%s6818_s7 + $0x638] sm:$0xff] }
 0x333   : >> { %5077 = vmatprep.subr.bf16.mxu0 %v5757_v49  ;;  %5163 = vmatprep.subr.bf16.mxu1 %v5759_v50  ;;  %v1686_v49 = vld [vmem:[%s6818_s7 + $0x678] sm:$0xff]  ;;  %v5852_v50 = vcombine.low %v1661_v33, %v1669_v34  ;;  %v5869_v52 = vcombine.high %v1677_v44, %v1685_v45 }
 0x334   : >> { %v5871_v53 = vcombine.high %v1678_v46, %v1686_v49  ;;  %v5870_v59 = vcombine.low %v1678_v46, %v1686_v49  ;;  %v1789_v49 = vld [vmem:[%s6818_s7 + $0x9b0] sm:$0xff] }
 0x336   : >> { %5078 = vmatpush1.bf16.msra.mxu0 %v5756_v55  ;;  %5164 = vmatpush1.bf16.msra.mxu1 %v5758_v56  ;;  %v1701_v55 = vld [vmem:[%s6818_s7 + $0x6f0] sm:$0xff]  ;;  %v1694_v56 = vld [vmem:[%s6818_s7 + $0x6b8] sm:$0xff] }
 0x337   : >> { %5079 = vmatprep.subr.bf16.mxu0 %v5773_v57  ;;  %5165 = vmatprep.subr.bf16.mxu1 %v5775_v58  ;;  %v1702_v57 = vld [vmem:[%s6818_s7 + $0x6f8] sm:$0xff]  ;;  %v5868_v58 = vcombine.low %v1677_v44, %v1685_v45  ;;  %v5885_v60 = vcombine.high %v1693_v54, %v1701_v55 }
 0x338   : >> { %v5887_v61 = vcombine.high %v1694_v56, %v1702_v57  ;;  %v5886_v47 = vcombine.low %v1694_v56, %v1702_v57  ;;  %v1805_v56 = vld [vmem:[%s6818_s7 + $0xa30] sm:$0xff] }
 0x339   : >> { %v1813_v57 = vld [vmem:[%s6818_s7 + $0xa70] sm:$0xff] }
 0x33a   : >> { %5080 = vmatpush1.bf16.msra.mxu0 %v5772_v63  ;;  %5166 = vmatpush1.bf16.msra.mxu1 %v5774_v28  ;;  %v1717_v63 = vld [vmem:[%s6818_s7 + $0x770] sm:$0xff]  ;;  %v1710_v28 = vld [vmem:[%s6818_s7 + $0x738] sm:$0xff] }
 0x33b   : >> { %5081 = vmatprep.subr.bf16.mxu0 %v5789_v29  ;;  %5167 = vmatprep.subr.bf16.mxu1 %v5791_v38  ;;  %v1718_v29 = vld [vmem:[%s6818_s7 + $0x778] sm:$0xff]  ;;  %v5884_v38 = vcombine.low %v1693_v54, %v1701_v55  ;;  %v5901_v0 = vcombine.high %v1709_v62, %v1717_v63 }
 0x33c   : >> { %v5903_v2 = vcombine.high %v1710_v28, %v1718_v29  ;;  %v5902_v8 = vcombine.low %v1710_v28, %v1718_v29  ;;  %v1829_v28 = vld [vmem:[%s6818_s7 + $0xaf0] sm:$0xff]  ;;  %v1822_v29 = vld [vmem:[%s6818_s7 + $0xab8] sm:$0xff] }
 0x33e   : >> { %5082 = vmatpush1.bf16.msra.mxu0 %v5788_v4  ;;  %5168 = vmatpush1.bf16.msra.mxu1 %v5790_v5  ;;  %v1733_v4 = vld [vmem:[%s6818_s7 + $0x7f0] sm:$0xff]  ;;  %v1726_v5 = vld [vmem:[%s6818_s7 + $0x7b8] sm:$0xff] }
 0x33f   : >> { %5083 = vmatprep.subr.bf16.mxu0 %v5805_v6  ;;  %5169 = vmatprep.subr.bf16.mxu1 %v5807_v7  ;;  %v1734_v6 = vld [vmem:[%s6818_s7 + $0x7f8] sm:$0xff]  ;;  %v5900_v7 = vcombine.low %v1709_v62, %v1717_v63  ;;  %v5917_v25 = vcombine.high %v1725_v3, %v1733_v4  ;;  %v1821_v63 = vld [vmem:[%s6818_s7 + $0xab0] sm:$0xff] }
 0x340   : >> { %v5919_v9 = vcombine.high %v1726_v5, %v1734_v6  ;;  %v5918_v16 = vcombine.low %v1726_v5, %v1734_v6  ;;  %v1845_v5 = vld [vmem:[%s6818_s7 + $0xb70] sm:$0xff]  ;;  %v1838_v6 = vld [vmem:[%s6818_s7 + $0xb38] sm:$0xff] }
 0x342   : >> { %5084 = vmatpush1.bf16.msra.mxu0 %v5804_v12  ;;  %5170 = vmatpush1.bf16.msra.mxu1 %v5806_v13  ;;  %v1749_v12 = vld [vmem:[%s6818_s7 + $0x870] sm:$0xff]  ;;  %v1742_v13 = vld [vmem:[%s6818_s7 + $0x838] sm:$0xff] }
 0x343   : >> { %5085 = vmatprep.subr.bf16.mxu0 %v5821_v14  ;;  %5171 = vmatprep.subr.bf16.mxu1 %v5823_v15  ;;  %v1750_v14 = vld [vmem:[%s6818_s7 + $0x878] sm:$0xff]  ;;  %v5916_v15 = vcombine.low %v1725_v3, %v1733_v4  ;;  %v5933_v17 = vcombine.high %v1741_v11, %v1749_v12  ;;  %v1837_v4 = vld [vmem:[%s6818_s7 + $0xb30] sm:$0xff] }
 0x344   : >> { %v5935_v18 = vcombine.high %v1742_v13, %v1750_v14  ;;  %v5934_v33 = vcombine.low %v1742_v13, %v1750_v14  ;;  %v1853_v13 = vld [vmem:[%s6818_s7 + $0xbb0] sm:$0xff] }
 0x345   : >> { %v1861_v14 = vld [vmem:[%s6818_s7 + $0xbf0] sm:$0xff] }
 0x346   : >> { %5086 = vmatpush1.bf16.msra.mxu0 %v5820_v21  ;;  %5172 = vmatpush1.bf16.msra.mxu1 %v5822_v22  ;;  %v1765_v21 = vld [vmem:[%s6818_s7 + $0x8f0] sm:$0xff]  ;;  %v1758_v22 = vld [vmem:[%s6818_s7 + $0x8b8] sm:$0xff] }
 0x347   : >> { %5087 = vmatprep.subr.bf16.mxu0 %v5837_v23  ;;  %5173 = vmatprep.subr.bf16.mxu1 %v5839_v32  ;;  %v1766_v23 = vld [vmem:[%s6818_s7 + $0x8f8] sm:$0xff]  ;;  %v5932_v32 = vcombine.low %v1741_v11, %v1749_v12  ;;  %v5949_v34 = vcombine.high %v1757_v19, %v1765_v21 }
 0x348   : >> { %v5951_v48 = vcombine.high %v1758_v22, %v1766_v23  ;;  %v5950_v44 = vcombine.low %v1758_v22, %v1766_v23  ;;  %v6028_v22 = vcombine.low %v1837_v4, %v1845_v5 }
 0x34a   : >> { %5088 = vmatpush1.bf16.msra.mxu0 %v5836_v39  ;;  %5174 = vmatpush1.bf16.msra.mxu1 %v5838_v41  ;;  %v1781_v39 = vld [vmem:[%s6818_s7 + $0x970] sm:$0xff]  ;;  %v1774_v41 = vld [vmem:[%s6818_s7 + $0x938] sm:$0xff] }
 0x34b   : >> { %5089 = vmatprep.subr.bf16.mxu0 %v5853_v42  ;;  %5175 = vmatprep.subr.bf16.mxu1 %v5855_v43  ;;  %v1782_v42 = vld [vmem:[%s6818_s7 + $0x978] sm:$0xff]  ;;  %v5948_v43 = vcombine.low %v1757_v19, %v1765_v21  ;;  %v5965_v45 = vcombine.high %v1773_v37, %v1781_v39 }
 0x34c   : >> { %v5967_v46 = vcombine.high %v1774_v41, %v1782_v42 }
 0x34e   : >> { %5090 = vmatpush1.bf16.msra.mxu0 %v5852_v50  ;;  %5176 = vmatpush1.bf16.msra.mxu1 %v5854_v51  ;;  %v1797_v50 = vld [vmem:[%s6818_s7 + $0x9f0] sm:$0xff]  ;;  %v1790_v51 = vld [vmem:[%s6818_s7 + $0x9b8] sm:$0xff] }
 0x34f   : >> { %5091 = vmatprep.subr.bf16.mxu0 %v5869_v52  ;;  %5177 = vmatprep.subr.bf16.mxu1 %v5871_v53  ;;  %v1798_v52 = vld [vmem:[%s6818_s7 + $0x9f8] sm:$0xff]  ;;  %v5966_v53 = vcombine.low %v1774_v41, %v1782_v42  ;;  %v5981_v54 = vcombine.high %v1789_v49, %v1797_v50  ;;  %v1877_v41 = vld [vmem:[%s6818_s7 + $0xc70] sm:$0xff] }
 0x350   : >> { %v5983_v55 = vcombine.high %v1790_v51, %v1798_v52  ;;  %v1870_v42 = vld [vmem:[%s6818_s7 + $0xc38] sm:$0xff] }
 0x352   : >> { %5092 = vmatpush1.bf16.msra.mxu0 %v5868_v58  ;;  %5178 = vmatpush1.bf16.msra.mxu1 %v5870_v59  ;;  %v1806_v58 = vld [vmem:[%s6818_s7 + $0xa38] sm:$0xff] }
 0x353   : >> { %5093 = vmatprep.subr.bf16.mxu0 %v5885_v60  ;;  %5179 = vmatprep.subr.bf16.mxu1 %v5887_v61  ;;  %v1814_v59 = vld [vmem:[%s6818_s7 + $0xa78] sm:$0xff]  ;;  %v5980_v60 = vcombine.low %v1789_v49, %v1797_v50  ;;  %v5997_v61 = vcombine.high %v1805_v56, %v1813_v57  ;;  %v1885_v50 = vld [vmem:[%s6818_s7 + $0xcb0] sm:$0xff] }
 0x354   : >> { %v5999_v62 = vcombine.high %v1806_v58, %v1814_v59 }
 0x356   : >> { %5094 = vmatpush1.bf16.msra.mxu0 %v5884_v38  ;;  %5180 = vmatpush1.bf16.msra.mxu1 %v5886_v47  ;;  %v1830_v38 = vld [vmem:[%s6818_s7 + $0xaf8] sm:$0xff]  ;;  %v5996_v47 = vcombine.low %v1805_v56, %v1813_v57  ;;  %v1901_v57 = vld [vmem:[%s6818_s7 + $0xd30] sm:$0xff] }
 0x357   : >> { %5095 = vmatprep.subr.bf16.mxu0 %v5901_v0  ;;  %5181 = vmatprep.subr.bf16.mxu1 %v5903_v2  ;;  %v5998_v0 = vcombine.low %v1806_v58, %v1814_v59  ;;  %v6013_v2 = vcombine.high %v1821_v63, %v1829_v28  ;;  %v6015_v3 = vcombine.high %v1822_v29, %v1830_v38  ;;  %v1909_v58 = vld [vmem:[%s6818_s7 + $0xd70] sm:$0xff]  ;;  %v1902_v59 = vld [vmem:[%s6818_s7 + $0xd38] sm:$0xff] }
 0x35a   : >> { %5096 = vmatpush1.bf16.msra.mxu0 %v5900_v7  ;;  %5182 = vmatpush1.bf16.msra.mxu1 %v5902_v8  ;;  %v1846_v7 = vld [vmem:[%s6818_s7 + $0xb78] sm:$0xff]  ;;  %v6012_v8 = vcombine.low %v1821_v63, %v1829_v28  ;;  %v1917_v28 = vld [vmem:[%s6818_s7 + $0xdb0] sm:$0xff] }
 0x35b   : >> { %5097 = vmatprep.subr.bf16.mxu0 %v5917_v25  ;;  %5183 = vmatprep.subr.bf16.mxu1 %v5919_v9  ;;  %v6014_v25 = vcombine.low %v1822_v29, %v1830_v38  ;;  %v6029_v9 = vcombine.high %v1837_v4, %v1845_v5  ;;  %v6031_v12 = vcombine.high %v1838_v6, %v1846_v7  ;;  %v1925_v29 = vld [vmem:[%s6818_s7 + $0xdf0] sm:$0xff]  ;;  %v1918_v38 = vld [vmem:[%s6818_s7 + $0xdb8] sm:$0xff] }
 0x35c   : >> { %v1933_v5 = vld [vmem:[%s6818_s7 + $0xe30] sm:$0xff] }
 0x35e   : >> { %5098 = vmatpush1.bf16.msra.mxu0 %v5916_v15  ;;  %5184 = vmatpush1.bf16.msra.mxu1 %v5918_v16 }
 0x35f   : >> { %5110 = vmatprep.subr.bf16.mxu0 %v5933_v17  ;;  %5196 = vmatprep.subr.bf16.mxu1 %v5935_v18  ;;  %v1854_v17 = vld [vmem:[%s6818_s7 + $0xbb8] sm:$0xff] }
 0x360   : >> { %v1862_v18 = vld [vmem:[%s6818_s7 + $0xbf8] sm:$0xff] }
 0x361   : >> { %5100 = vmatmul.mubr.bf16.vlgmr.msra.gmra.mrb[12].mxu0 %v7537_v1  ;;  %5186 = vmatmul.mubr.bf16.vlgmr.msra.gmra.mrb[12].mxu1 %v7537_v1  ;;  %v5964_v1 = vcombine.low %v1773_v37, %v1781_v39  ;;  %v6047_v37 = vcombine.high %v1854_v17, %v1862_v18  ;;  %v1869_v39 = vld [vmem:[%s6818_s7 + $0xc30] sm:$0xff] }
 0x362   : >> { %5111 = vmatpush1.bf16.msra.mxu0 %v5932_v32  ;;  %5197 = vmatpush1.bf16.msra.mxu1 %v5934_v33  ;;  %v6030_v33 = vcombine.low %v1838_v6, %v1846_v7  ;;  %v1941_v6 = vld [vmem:[%s6818_s7 + $0xe70] sm:$0xff]  ;;  %v1934_v7 = vld [vmem:[%s6818_s7 + $0xe38] sm:$0xff] }
 0x363   : >> { %5112 = vmatprep.subr.bf16.mxu0 %v5949_v34  ;;  %5198 = vmatprep.subr.bf16.mxu1 %v5951_v48  ;;  %v6045_v34 = vcombine.high %v1853_v13, %v1861_v14 }
 0x364   : >> { %5142 = vmatprep.mubr.bf16.mxu0 %v7542_v27  ;;  %5228 = vmatprep.mubr.bf16.mxu1 %v7542_v27  ;;  %v5982_v27 = vcombine.low %v1790_v51, %v1798_v52  ;;  %v1893_v51 = vld [vmem:[%s6818_s7 + $0xcf0] sm:$0xff]  ;;  %v1886_v52 = vld [vmem:[%s6818_s7 + $0xcb8] sm:$0xff] }
 0x366   : >> { %5113 = vmatpush1.bf16.msra.mxu0 %v5948_v43  ;;  %5199 = vmatpush1.bf16.msra.mxu1 %v5950_v44  ;;  %v1878_v43 = vld [vmem:[%s6818_s7 + $0xc78] sm:$0xff]  ;;  %v6044_v44 = vcombine.low %v1853_v13, %v1861_v14  ;;  %v1949_v14 = vld [vmem:[%s6818_s7 + $0xeb0] sm:$0xff] }
 0x367   : >> { %5114 = vmatprep.subr.bf16.mxu0 %v5965_v45  ;;  %5200 = vmatprep.subr.bf16.mxu1 %v5967_v46  ;;  %v6046_v45 = vcombine.low %v1854_v17, %v1862_v18  ;;  %v6061_v46 = vcombine.high %v1869_v39, %v1877_v41  ;;  %v6063_v49 = vcombine.high %v1870_v42, %v1878_v43  ;;  %v1957_v17 = vld [vmem:[%s6818_s7 + $0xef0] sm:$0xff]  ;;  %v1950_v18 = vld [vmem:[%s6818_s7 + $0xeb8] sm:$0xff] }
 0x36a   : >> { %5115 = vmatpush1.bf16.msra.mxu0 %v5964_v1  ;;  %5201 = vmatpush1.bf16.msra.mxu1 %v5966_v53  ;;  %v1894_v1 = vld [vmem:[%s6818_s7 + $0xcf8] sm:$0xff]  ;;  %v6060_v53 = vcombine.low %v1869_v39, %v1877_v41  ;;  %v1965_v41 = vld [vmem:[%s6818_s7 + $0xf30] sm:$0xff] }
 0x36b   : >> { %5116 = vmatprep.subr.bf16.mxu0 %v5981_v54  ;;  %5202 = vmatprep.subr.bf16.mxu1 %v5983_v55  ;;  %v6062_v54 = vcombine.low %v1870_v42, %v1878_v43  ;;  %v6077_v55 = vcombine.high %v1885_v50, %v1893_v51  ;;  %v6079_v56 = vcombine.high %v1886_v52, %v1894_v1  ;;  %v1973_v42 = vld [vmem:[%s6818_s7 + $0xf70] sm:$0xff]  ;;  %v1966_v43 = vld [vmem:[%s6818_s7 + $0xf38] sm:$0xff] }
 0x36e   : >> { %5117 = vmatpush1.bf16.msra.mxu0 %v5980_v60  ;;  %5203 = vmatpush1.bf16.msra.mxu1 %v5982_v27  ;;  %v1910_v60 = vld [vmem:[%s6818_s7 + $0xd78] sm:$0xff]  ;;  %v6076_v27 = vcombine.low %v1885_v50, %v1893_v51  ;;  %v1981_v51 = vld [vmem:[%s6818_s7 + $0xfb0] sm:$0xff] }
 0x36f   : >> { %5118 = vmatprep.subr.bf16.mxu0 %v5997_v61  ;;  %5204 = vmatprep.subr.bf16.mxu1 %v5999_v62  ;;  %v6078_v61 = vcombine.low %v1886_v52, %v1894_v1  ;;  %v6093_v62 = vcombine.high %v1901_v57, %v1909_v58  ;;  %v6095_v63 = vcombine.high %v1902_v59, %v1910_v60  ;;  %v1989_v52 = vld [vmem:[%s6818_s7 + $0xff0] sm:$0xff]  ;;  %v1982_v1 = vld [vmem:[%s6818_s7 + $0xfb8] sm:$0xff] }
 0x372   : >> { %5119 = vmatpush1.bf16.msra.mxu0 %v5996_v47  ;;  %5205 = vmatpush1.bf16.msra.mxu1 %v5998_v0  ;;  %v1926_v47 = vld [vmem:[%s6818_s7 + $0xdf8] sm:$0xff]  ;;  %v6092_v0 = vcombine.low %v1901_v57, %v1909_v58  ;;  %v6172_v58 = vcombine.low %v1981_v51, %v1989_v52 }
 0x373   : >> { %5120 = vmatprep.subr.bf16.mxu0 %v6013_v2  ;;  %5206 = vmatprep.subr.bf16.mxu1 %v6015_v3  ;;  %v6094_v2 = vcombine.low %v1902_v59, %v1910_v60  ;;  %v6109_v3 = vcombine.high %v1917_v28, %v1925_v29  ;;  %v6111_v4 = vcombine.high %v1918_v38, %v1926_v47  ;;  %v1435_v60 = vld [vmem:[%s8052_s26] sm:$0xff] }
 0x374   : >> { %v7992_v11 = vpop.f32.mrb[4].mxu0  ;;  %v7996_v15 = vpop.f32.mrb[4].mxu1 }
 0x375   : >> { %v7998_v16 = vpop.f32.mrb[5].mxu0  ;;  %v8002_v19 = vpop.f32.mrb[5].mxu1 }
 0x376   : >> { %v8004_v21 = vpop.f32.mrb[6].mxu0  ;;  %5121 = vmatpush1.bf16.msra.mxu0 %v6012_v8  ;;  %v8006_v23 = vpop.f32.mrb[6].mxu1  ;;  %5207 = vmatpush1.bf16.msra.mxu1 %v6014_v25  ;;  %v1942_v8 = vld [vmem:[%s6818_s7 + $0xe78] sm:$0xff]  ;;  %v6108_v25 = vcombine.low %v1917_v28, %v1925_v29  ;;  %v1451_v28 = vld [vmem:[%s8052_s26 + $0x80] sm:$0xff] }
 0x377   : >> { %v8008_v32 = vpop.f32.mrb[7].mxu0  ;;  %5122 = vmatprep.subr.bf16.mxu0 %v6029_v9  ;;  %v8010_v48 = vpop.f32.mrb[7].mxu1  ;;  %5208 = vmatprep.subr.bf16.mxu1 %v6031_v12  ;;  %v6110_v9 = vcombine.low %v1918_v38, %v1926_v47  ;;  %v6125_v12 = vcombine.high %v1933_v5, %v1941_v6  ;;  %v6127_v13 = vcombine.high %v1934_v7, %v1942_v8  ;;  %v1453_v38 = vld [vmem:[%s8052_s26 + $0x90] sm:$0xff] }
 0x37a   : >> { %5123 = vmatpush1.bf16.msra.mxu0 %v6028_v22  ;;  %5209 = vmatpush1.bf16.msra.mxu1 %v6030_v33  ;;  %v1958_v22 = vld [vmem:[%s6818_s7 + $0xef8] sm:$0xff]  ;;  %v6124_v33 = vcombine.low %v1933_v5, %v1941_v6  ;;  %v1441_v6 = vld [vmem:[%s8052_s26 + $0x30] sm:$0xff] }
 0x37b   : >> { %5124 = vmatprep.subr.bf16.mxu0 %v6045_v34  ;;  %5210 = vmatprep.subr.bf16.mxu1 %v6047_v37  ;;  %v6126_v34 = vcombine.low %v1934_v7, %v1942_v8  ;;  %v6141_v37 = vcombine.high %v1949_v14, %v1957_v17  ;;  %v6143_v39 = vcombine.high %v1950_v18, %v1958_v22  ;;  %v1440_v8 = vld [vmem:[%s8052_s26 + $0x28] sm:$0xff] }
 0x37e   : >> { %5125 = vmatpush1.bf16.msra.mxu0 %v6044_v44  ;;  %5211 = vmatpush1.bf16.msra.mxu1 %v6046_v45  ;;  %v1974_v44 = vld [vmem:[%s6818_s7 + $0xf78] sm:$0xff]  ;;  %v6140_v45 = vcombine.low %v1949_v14, %v1957_v17  ;;  %v1457_v14 = vld [vmem:[%s8052_s26 + $0xb0] sm:$0xff] }
 0x37f   : >> { %5126 = vmatprep.subr.bf16.mxu0 %v6061_v46  ;;  %5212 = vmatprep.subr.bf16.mxu1 %v6063_v49  ;;  %v6142_v46 = vcombine.low %v1950_v18, %v1958_v22  ;;  %v6157_v49 = vcombine.high %v1965_v41, %v1973_v42  ;;  %v6159_v50 = vcombine.high %v1966_v43, %v1974_v44  ;;  %v1456_v18 = vld [vmem:[%s8052_s26 + $0xa8] sm:$0xff] }
 0x382   : >> { %5127 = vmatpush1.bf16.msra.mxu0 %v6060_v53  ;;  %5213 = vmatpush1.bf16.msra.mxu1 %v6062_v54  ;;  %v1990_v53 = vld [vmem:[%s6818_s7 + $0xff8] sm:$0xff]  ;;  %v6156_v54 = vcombine.low %v1965_v41, %v1973_v42  ;;  %s6591_s7 = smov (%p1424_p2), [#allocation11]  }
 0x383   : >> { %5128 = vmatprep.subr.bf16.mxu0 %v6077_v55  ;;  %5214 = vmatprep.subr.bf16.mxu1 %v6079_v56  ;;  %v6158_v55 = vcombine.low %v1966_v43, %v1974_v44  ;;  %v6173_v56 = vcombine.high %v1981_v51, %v1989_v52  ;;  %v6175_v57 = vcombine.high %v1982_v1, %v1990_v53  ;;  %v1444_v51 = vld [vmem:[%s8052_s26 + $0x48] sm:$0xff]  ;;  %s6492_s22 = sshll.u32 (%p1424_p2), %s6591_s7, 4  ;;  %s6493_s22 = int_to_ptr.vmem [resolvable:$false] %s6492_s22 }
 0x384   : >> { %v6174_v59 = vcombine.low %v1982_v1, %v1990_v53  ;;  %v1446_v53 = vld [vmem:[%s8052_s26 + $0x58] sm:$0xff]  ;;  %s6494_s18 = scalar_lea.vmem (%p1424_p2), %s6493_s22, 8192  ;;  %p6495_p11 = scmp.lt.s32.totalorder (%p1424_p2), %s8114_s12, %s6493_s22 }
 0x385   : > { %p6496_p10 = scmp.lt.s32.totalorder (%p1424_p2), %s6494_s18, %s6488_s8 }
 0x386   : >> { %5129 = vmatpush1.bf16.msra.mxu0 %v6076_v27  ;;  %5215 = vmatpush1.bf16.msra.mxu1 %v6078_v61  ;;  %v1436_v27 = vld [vmem:[%s8052_s26 + $0x8] sm:$0xff]  ;;  %v5239_v61 = vadd.f32 %v7840_v20, %v1435_v60  ;;  %v5257_v20 = vadd.f32 %v7854_v35, %v1453_v38  ;;  %v5244_v35 = vadd.f32 %v7998_v16, %v1440_v8 }
 0x387   : >> { %5130 = vmatprep.subr.bf16.mxu0 %v6093_v62  ;;  %5216 = vmatprep.subr.bf16.mxu1 %v6095_v63  ;;  %v1438_v62 = vld [vmem:[%s8052_s26 + $0x18] sm:$0xff]  ;;  %v5240_v29 = vadd.f32 %v7846_v31, %v1436_v27  ;;  %v5260_v16 = vadd.f32 %v8008_v32, %v1456_v18  ;;  %p6497_p13 = por (%p1424_p2), %p6496_p10, %p6495_p11 }
 0x388   : >> { %v5242_v47 = vadd.f32 %v7850_v24, %v1438_v62  ;;  %v1442_v24 = vld [vmem:[%s8052_s26 + $0x38] sm:$0xff] }
 0x389   : >> { %v5272_v7 = vmul.f32 0.5, %v5240_v29  ;;  %v5246_v17 = vadd.f32 %v8002_v19, %v1442_v24  ;;  %p6498_p7 = pnand (%p1424_p2), %p6497_p13, %p6491_p9 }
 0x38a   : >> { %5131 = vmatpush1.bf16.msra.mxu0 %v6092_v0  ;;  %5217 = vmatpush1.bf16.msra.mxu1 %v6094_v2  ;;  %v1452_v0 = vld [vmem:[%s8052_s26 + $0x88] sm:$0xff]  ;;  %v5271_v2 = vmul.f32 0.5, %v5239_v61  ;;  %v5274_v31 = vmul.f32 0.5, %v5242_v47 }
 0x38b   : >> { %5132 = vmatprep.subr.bf16.mxu0 %v6109_v3  ;;  %5218 = vmatprep.subr.bf16.mxu1 %v6111_v4  ;;  %v5255_v3 = vadd.f32 %v7852_v26, %v1451_v28  ;;  %v1439_v4 = vld [vmem:[%s8052_s26 + $0x20] sm:$0xff]  ;;  %v5245_v26 = vadd.f32 %v7996_v15, %v1441_v6  ;;  %v5261_v15 = vadd.f32 %v8006_v23, %v1457_v14  ;;  %v5306_v41 = vmul.f32 0.5, %v5246_v17 }
 0x38c   : >> { %6318 = vtanh.f32 %v5271_v2  ;;  %v5308_v23 = vmul.f32 0.5, %v5260_v16  ;;  %v1462_v2 = vld [vmem:[%s8052_s26 + $0xd8] sm:$0xff] }
 0x38e   : >> { %5133 = vmatpush1.bf16.msra.mxu0 %v6108_v25  ;;  %5219 = vmatpush1.bf16.msra.mxu1 %v6110_v9  ;;  %v5243_v25 = vadd.f32 %v7992_v11, %v1439_v4  ;;  %v5275_v9 = vmul.f32 0.5, %v5255_v3 }
 0x38f   : >> { %5134 = vmatprep.subr.bf16.mxu0 %v6125_v12  ;;  %5220 = vmatprep.subr.bf16.mxu1 %v6127_v13  ;;  %v1455_v12 = vld [vmem:[%s8052_s26 + $0xa0] sm:$0xff]  ;;  %v5277_v13 = vmul.f32 0.5, %v5257_v20 }
 0x390   : >> { %v5303_v11 = vmul.f32 0.5, %v5243_v25  ;;  %v5259_v22 = vadd.f32 %v8004_v21, %v1455_v12  ;;  %v5309_v21 = vmul.f32 0.5, %v5261_v15 }
 0x392   : >> { %5135 = vmatpush1.bf16.msra.mxu0 %v6124_v33  ;;  %5221 = vmatpush1.bf16.msra.mxu1 %v6126_v34  ;;  %v1458_v33 = vld [vmem:[%s8052_s26 + $0xb8] sm:$0xff]  ;;  %v5305_v34 = vmul.f32 0.5, %v5245_v26  ;;  %v5307_v19 = vmul.f32 0.5, %v5259_v22 }
 0x393   : >> { %5136 = vmatprep.subr.bf16.mxu0 %v6141_v37  ;;  %5222 = vmatprep.subr.bf16.mxu1 %v6143_v39  ;;  %v1454_v37 = vld [vmem:[%s8052_s26 + $0x98] sm:$0xff]  ;;  %v5304_v39 = vmul.f32 0.5, %v5244_v35  ;;  %v5262_v42 = vadd.f32 %v8010_v48, %v1458_v33 }
 0x394   : >> { %v5258_v43 = vadd.f32 %v7858_v40, %v1454_v37  ;;  %v1445_v40 = vld [vmem:[%s8052_s26 + $0x50] sm:$0xff]  ;;  %v5375_v37 = vld [vmem:[#allocation4] sm:$0xff] }
 0x395   : >> { %v5310_v32 = vmul.f32 0.5, %v5262_v42 }
 0x396   : >> { %5137 = vmatpush1.bf16.msra.mxu0 %v6140_v45  ;;  %5223 = vmatpush1.bf16.msra.mxu1 %v6142_v46  ;;  %v6319_v44 = vpop.eup %6318  ;;  %v5278_v48 = vmul.f32 0.5, %v5258_v43  ;;  %v5377_v43 = vld [vmem:[#allocation4 + $0x10] sm:$0xff] }
 0x397   : >> { %5138 = vmatprep.subr.bf16.mxu0 %v6157_v49  ;;  %5224 = vmatprep.subr.bf16.mxu1 %v6159_v50  ;;  %v1443_v49 = vld [vmem:[%s8052_s26 + $0x40] sm:$0xff]  ;;  %v5287_v25 = vmul.f32 0.5, %v6319_v44 }
 0x39a   : >> { %5139 = vmatpush1.bf16.msra.mxu0 %v6156_v54  ;;  %5225 = vmatpush1.bf16.msra.mxu1 %v6158_v55  ;;  %v1459_v54 = vld [vmem:[%s8052_s26 + $0xc0] sm:$0xff] }
 0x39b   : >> { %5140 = vmatprep.subr.bf16.mxu0 %v6173_v56  ;;  %5226 = vmatprep.subr.bf16.mxu1 %v6175_v57 }
 0x39e   : >> { %5141 = vmatpush1.bf16.msra.mxu0 %v6172_v58  ;;  %5227 = vmatpush1.bf16.msra.mxu1 %v6174_v59  ;;  %v1461_v59 = vld [vmem:[%s8052_s26 + $0xd0] sm:$0xff] }
 0x3a1   : >> { %5143 = vmatmul.mubr.bf16.vlgmr.msra.gmra.mrb[12].mxu0 %v7608_v10  ;;  %5229 = vmatmul.mubr.bf16.vlgmr.msra.gmra.mrb[12].mxu1 %v7608_v10  ;;  %v1437_v10 = vld [vmem:[%s8052_s26 + $0x10] sm:$0xff] }
 0x3a2   : >> { %v5241_v63 = vadd.f32 %v7844_v30, %v1437_v10  ;;  %v5256_v30 = vadd.f32 %v7856_v36, %v1452_v0 }
 0x3a4   : >> { %v5273_v5 = vmul.f32 0.5, %v5241_v63  ;;  %v5276_v36 = vmul.f32 0.5, %v5256_v30  ;;  %v1460_v63 = vld [vmem:[%s8052_s26 + $0xc8] sm:$0xff] }
 0x3a6   : >> { %6320 = vtanh.f32 %v5273_v5 }
 0x3a7   : >> { %6322 = vtanh.f32 %v5272_v7 }
 0x3a8   : >> { %6324 = vtanh.f32 %v5274_v31 }
 0x3a9   : >> { %6326 = vtanh.f32 %v5275_v9 }
 0x3aa   : >> { %6328 = vtanh.f32 %v5277_v13 }
 0x3ab   : >> { %6330 = vtanh.f32 %v5276_v36 }
 0x3ac   : >> { %6332 = vtanh.f32 %v5303_v11 }
 0x3ad   : >> { %6334 = vtanh.f32 %v5305_v34  ;;  %v5295_v34 = vadd.f32 0.5, %v5287_v25 }
 0x3ae   : >> { %6336 = vtanh.f32 %v5304_v39 }
 0x3af   : >> { %6338 = vtanh.f32 %v5306_v41 }
 0x3b0   : >> { %v6321_v45 = vpop.eup %6320  ;;  %6340 = vtanh.f32 %v5307_v19 }
 0x3b1   : >> { %v6323_v46 = vpop.eup %6322  ;;  %6342 = vtanh.f32 %v5309_v21  ;;  %v5289_v24 = vmul.f32 0.5, %v6321_v45 }
 0x3b2   : >> { %v6325_v50 = vpop.eup %6324  ;;  %6344 = vtanh.f32 %v5308_v23  ;;  %v5288_v12 = vmul.f32 0.5, %v6323_v46  ;;  %v5376_v46 = vld [vmem:[#allocation4 + $0x8] sm:$0xff] }
 0x3b3   : >> { %v6327_v52 = vpop.eup %6326  ;;  %6346 = vtanh.f32 %v5310_v32  ;;  %v5290_v13 = vmul.f32 0.5, %v6325_v50  ;;  %v5297_v15 = vadd.f32 0.5, %v5289_v24 }
 0x3b4   : >> { %v6329_v55 = vpop.eup %6328  ;;  %6348 = vtanh.f32 %v5278_v48  ;;  %v5291_v36 = vmul.f32 0.5, %v6327_v52  ;;  %v5296_v42 = vadd.f32 0.5, %v5288_v12  ;;  %v5378_v52 = vld [vmem:[#allocation4 + $0x18] sm:$0xff] }
 0x3b5   : >> { %v6331_v60 = vpop.eup %6330  ;;  %v5293_v11 = vmul.f32 0.5, %v6329_v55  ;;  %v5298_v19 = vadd.f32 0.5, %v5290_v13 }
 0x3b6   : >> { %v6333_v28 = vpop.eup %6332  ;;  %v5299_v32 = vadd.f32 0.5, %v5291_v36  ;;  %v5292_v45 = vmul.f32 0.5, %v6331_v60 }
 0x3b7   : >> { %v6335_v3 = vpop.eup %6334  ;;  %v5319_v30 = vmul.f32 0.5, %v6333_v28 }
 0x3b8   : >> { %v6337_v20 = vpop.eup %6336  ;;  %v5321_v9 = vmul.f32 0.5, %v6335_v3 }
 0x3b9   : >> { %v6339_v7 = vpop.eup %6338  ;;  %v5320_v35 = vmul.f32 0.5, %v6337_v20  ;;  %v5327_v22 = vadd.f32 0.5, %v5319_v30  ;;  %v5382_v20 = vld [vmem:[#allocation4 + $0x38] sm:$0xff] }
 0x3ba   : >> { %v6341_v31 = vpop.eup %6340  ;;  %v5322_v17 = vmul.f32 0.5, %v6339_v7  ;;  %v5329_v39 = vadd.f32 0.5, %v5321_v9 }
 0x3bb   : >> { %v6343_v26 = vpop.eup %6342  ;;  %v5323_v33 = vmul.f32 0.5, %v6341_v31  ;;  %v5328_v21 = vadd.f32 0.5, %v5320_v35 }
 0x3bc   : >> { %v6345_v14 = vpop.eup %6344  ;;  %v5325_v16 = vmul.f32 0.5, %v6343_v26  ;;  %v5330_v48 = vadd.f32 0.5, %v5322_v17 }
 0x3bd   : >> { %v6347_v18 = vpop.eup %6346  ;;  %v5324_v23 = vmul.f32 0.5, %v6345_v14 }
 0x3be   : >> { %v6349_v41 = vpop.eup %6348 }
 0x3bf   : >> { %v5294_v55 = vmul.f32 0.5, %v6349_v41 }
 0x3f4   : >> { %v4972_v1 = vpop.f32.mrb[8].mxu0  ;;  %v5058_v57 = vpop.f32.mrb[8].mxu1 }
 0x3f5   : >> { %v5247_v56 = vadd.f32 %v4972_v1, %v1443_v49  ;;  %v4974_v58 = vpop.f32.mrb[9].mxu0  ;;  %v5249_v10 = vadd.f32 %v5058_v57, %v1445_v40  ;;  %v5060_v61 = vpop.f32.mrb[9].mxu1  ;;  %v5326_v49 = vmul.f32 0.5, %v6347_v18  ;;  %v5301_v40 = vadd.f32 0.5, %v5293_v11  ;;  %v5379_v57 = vld [vmem:[#allocation4 + $0x20] sm:$0xff] }
 0x3f6   : >> { %v5248_v27 = vadd.f32 %v4974_v58, %v1444_v51  ;;  %v4976_v62 = vpop.f32.mrb[10].mxu0  ;;  %v5250_v29 = vadd.f32 %v5060_v61, %v1446_v53  ;;  %v5062_v47 = vpop.f32.mrb[10].mxu1  ;;  %v5383_v51 = vmul.f32 %v5375_v37, %v5327_v22  ;;  %v5331_v1 = vadd.f32 0.5, %v5323_v33  ;;  %v5381_v61 = vld [vmem:[#allocation4 + $0x30] sm:$0xff]  ;;  %v1447_v11 = vld [vmem:[%s8052_s26 + $0x60] sm:$0xff]  ;;  %v1448_v33 = vld [vmem:[%s8052_s26 + $0x68] sm:$0xff] }
 0x3f7   : >> { %6350 = vtanh.f32 %v5247_v56  ;;  %v5263_v38 = vadd.f32 %v4976_v62, %v1459_v54  ;;  %v4978_v0 = vpop.f32.mrb[11].mxu0  ;;  %v5265_v4 = vadd.f32 %v5062_v47, %v1461_v59  ;;  %v5064_v5 = vpop.f32.mrb[11].mxu1  ;;  %v5385_v56 = vmul.f32 %v5377_v43, %v5329_v39  ;;  %v1449_v22 = vld [vmem:[%s8052_s26 + $0x70] sm:$0xff]  ;;  %v1463_v37 = vld [vmem:[%s8052_s26 + $0xe0] sm:$0xff] }
 0x3f8   : >> { %6352 = vtanh.f32 %v5249_v10  ;;  %v5264_v6 = vadd.f32 %v4978_v0, %v1460_v63  ;;  %v5266_v8 = vadd.f32 %v5064_v5, %v1462_v2  ;;  %v5333_v58 = vadd.f32 0.5, %v5325_v16 }
 0x3f9   : >> { %6354 = vtanh.f32 %v5248_v27  ;;  %v5384_v27 = vmul.f32 %v5376_v46, %v5328_v21  ;;  %v5332_v62 = vadd.f32 0.5, %v5324_v23  ;;  %v5334_v47 = vadd.f32 0.5, %v5326_v49 }
 0x3fa   : >> { %6356 = vtanh.f32 %v5250_v29  ;;  %v5386_v29 = vmul.f32 %v5378_v52, %v5330_v48  ;;  %v5387_v5 = vmul.f32 %v5379_v57, %v5331_v1  ;;  %v5389_v31 = vmul.f32 %v5381_v61, %v5333_v58 }
 0x3fb   : >> { %6358 = vtanh.f32 %v5263_v38  ;;  %v5380_v38 = vld [vmem:[#allocation4 + $0x28] sm:$0xff]  ;;  %v5390_v35 = vmul.f32 %v5382_v20, %v5334_v47 }
 0x3fc   : >> { %6360 = vtanh.f32 %v5265_v4  ;;  %v5300_v4 = vadd.f32 0.5, %v5292_v45  ;;  %v5388_v26 = vmul.f32 %v5380_v38, %v5332_v62 }
 0x3fd   : >> { %6362 = vtanh.f32 %v5264_v6 }
 0x3fe   : >> { %6364 = vtanh.f32 %v5266_v8  ;;  %v5302_v8 = vadd.f32 0.5, %v5294_v55 }
 0x401   : >> { %v6351_v44 = vpop.eup %6350 }
 0x402   : >> { %v6353_v50 = vpop.eup %6352  ;;  %v5391_v53 = vmul.f32 %v6351_v44, %v5295_v34 }
 0x403   : >> { %v6355_v54 = vpop.eup %6354  ;;  %v5393_v59 = vmul.f32 %v6353_v50, %v5297_v15  ;;  %v1450_v15 = vld [vmem:[%s8052_s26 + $0x78] sm:$0xff] }
 0x404   : >> { %v6357_v10 = vpop.eup %6356  ;;  %v5399_v60 = vadd.f32 %v5391_v53, %v5383_v51  ;;  %v5392_v63 = vmul.f32 %v6355_v54, %v5296_v42  ;;  %v1465_v42 = vld [vmem:[%s8052_s26 + $0xf0] sm:$0xff] }
 0x405   : >> { %v6359_v28 = vpop.eup %6358  ;;  %v5401_v0 = vadd.f32 %v5393_v59, %v5385_v56  ;;  %v5394_v2 = vmul.f32 %v6357_v10, %v5298_v19  ;;  %v1464_v19 = vld [vmem:[%s8052_s26 + $0xe8] sm:$0xff] }
 0x406   : >> { %v6361_v3 = vpop.eup %6360  ;;  %5423 = vst [vmem:[#allocation4] sm:$0xff] %v5399_v60  ;;  %v5400_v6 = vadd.f32 %v5392_v63, %v5384_v27  ;;  %v5395_v7 = vmul.f32 %v6359_v28, %v5299_v32  ;;  %6366 = vtanh.f32 %v5399_v60  ;;  %v1466_v32 = vld [vmem:[%s8052_s26 + $0xf8] sm:$0xff] }
 0x407   : >> { %v6363_v30 = vpop.eup %6362  ;;  %5425 = vst [vmem:[#allocation4 + $0x10] sm:$0xff] %v5401_v0  ;;  %v5402_v25 = vadd.f32 %v5394_v2, %v5386_v29  ;;  %v5397_v24 = vmul.f32 %v6361_v3, %v5301_v40  ;;  %6368 = vtanh.f32 %v5401_v0 }
 0x408   : >> { %v6365_v9 = vpop.eup %6364  ;;  %5424 = vst [vmem:[#allocation4 + $0x8] sm:$0xff] %v5400_v6  ;;  %v5403_v12 = vadd.f32 %v5395_v7, %v5387_v5  ;;  %v5396_v13 = vmul.f32 %v6363_v30, %v5300_v4  ;;  %6370 = vtanh.f32 %v5400_v6 }
 0x409   : >> { %5426 = vst [vmem:[#allocation4 + $0x18] sm:$0xff] %v5402_v25  ;;  %v5405_v14 = vadd.f32 %v5397_v24, %v5389_v31  ;;  %v5398_v36 = vmul.f32 %v6365_v9, %v5302_v8  ;;  %6372 = vtanh.f32 %v5402_v25 }
 0x40a   : >> { %5427 = vst [vmem:[#allocation4 + $0x20] sm:$0xff] %v5403_v12  ;;  %v5404_v17 = vadd.f32 %v5396_v13, %v5388_v26 }
 0x40b   : >> { %5429 = vst [vmem:[#allocation4 + $0x30] sm:$0xff] %v5405_v14  ;;  %v5406_v18 = vadd.f32 %v5398_v36, %v5390_v35 }
 0x40c   : >> { %5428 = vst [vmem:[#allocation4 + $0x28] sm:$0xff] %v5404_v17 }
 0x40d   : >> { %5430 = vst [vmem:[#allocation4 + $0x38] sm:$0xff] %v5406_v18 }
 0x410   : >> { %v6367_v10 = vpop.eup %6366 }
 0x411   : >> { %v6369_v27 = vpop.eup %6368 }
 0x412   : >> { %v6371_v61 = vpop.eup %6370 }
 0x413   : >> { %v6373_v62 = vpop.eup %6372 }
 0x474   : >> { %v5144_v34 = vpop.f32.mrb[12].mxu0  ;;  %v5230_v16 = vpop.f32.mrb[12].mxu1 }
 0x475   : >> { %v5251_v39 = vadd.f32 %v5144_v34, %v1447_v11  ;;  %v5146_v41 = vpop.f32.mrb[13].mxu0  ;;  %v5253_v43 = vadd.f32 %v5230_v16, %v1449_v22  ;;  %v5232_v23 = vpop.f32.mrb[13].mxu1 }
 0x476   : >> { %v5252_v21 = vadd.f32 %v5146_v41, %v1448_v33  ;;  %v5148_v44 = vpop.f32.mrb[14].mxu0  ;;  %v5254_v46 = vadd.f32 %v5232_v23, %v1450_v15  ;;  %v5234_v49 = vpop.f32.mrb[14].mxu1 }
 0x477   : >> { %v5343_v45 = vmul.f32 0.5, %v5251_v39  ;;  %v5267_v48 = vadd.f32 %v5148_v44, %v1463_v37  ;;  %v5150_v50 = vpop.f32.mrb[15].mxu0  ;;  %v5345_v40 = vmul.f32 0.5, %v5253_v43  ;;  %v5269_v52 = vadd.f32 %v5234_v49, %v1465_v42  ;;  %v5236_v53 = vpop.f32.mrb[15].mxu1 }
 0x478   : >> { %v5344_v51 = vmul.f32 0.5, %v5252_v21  ;;  %v5268_v1 = vadd.f32 %v5150_v50, %v1464_v19  ;;  %v5346_v54 = vmul.f32 0.5, %v5254_v46  ;;  %v5270_v56 = vadd.f32 %v5236_v53, %v1466_v32 }
 0x479   : >> { %6374 = vtanh.f32 %v5343_v45  ;;  %v5347_v55 = vmul.f32 0.5, %v5267_v48  ;;  %v5349_v57 = vmul.f32 0.5, %v5269_v52 }
 0x47a   : >> { %6376 = vtanh.f32 %v5345_v40  ;;  %v5348_v58 = vmul.f32 0.5, %v5268_v1  ;;  %v5350_v59 = vmul.f32 0.5, %v5270_v56 }
 0x47b   : >> { %6378 = vtanh.f32 %v5344_v51 }
 0x47c   : >> { %6380 = vtanh.f32 %v5346_v54 }
 0x47d   : >> { %6382 = vtanh.f32 %v5347_v55 }
 0x47e   : >> { %6384 = vtanh.f32 %v5349_v57 }
 0x47f   : >> { %6386 = vtanh.f32 %v5348_v58 }
 0x480   : >> { %6388 = vtanh.f32 %v5350_v59 }
 0x481   : >> { %6390 = vtanh.f32 %v5403_v12 }
 0x482   : >> { %6392 = vtanh.f32 %v5405_v14 }
 0x483   : >> { %v6375_v60 = vpop.eup %6374  ;;  %6394 = vtanh.f32 %v5404_v17 }
 0x484   : >> { %v6377_v63 = vpop.eup %6376  ;;  %6396 = vtanh.f32 %v5406_v18  ;;  %v5359_v28 = vmul.f32 0.5, %v6375_v60 }
 0x485   : >> { %v6379_v29 = vpop.eup %6378  ;;  %v5361_v38 = vmul.f32 0.5, %v6377_v63 }
 0x486   : >> { %v6381_v47 = vpop.eup %6380  ;;  %v5367_v0 = vadd.f32 0.5, %v5359_v28  ;;  %v5360_v2 = vmul.f32 0.5, %v6379_v29 }
 0x487   : >> { %v6383_v3 = vpop.eup %6382  ;;  %v5369_v4 = vadd.f32 0.5, %v5361_v38  ;;  %v5362_v5 = vmul.f32 0.5, %v6381_v47 }
 0x488   : >> { %v6385_v20 = vpop.eup %6384  ;;  %v5415_v6 = vmul.f32 %v6367_v10, %v5367_v0  ;;  %v5368_v7 = vadd.f32 0.5, %v5360_v2  ;;  %v5363_v30 = vmul.f32 0.5, %v6383_v3 }
 0x489   : >> { %v6387_v8 = vpop.eup %6386  ;;  %v5417_v31 = vmul.f32 %v6369_v27, %v5369_v4  ;;  %v5370_v25 = vadd.f32 0.5, %v5362_v5  ;;  %v5365_v24 = vmul.f32 0.5, %v6385_v20 }
 0x48a   : >> { %v6389_v9 = vpop.eup %6388  ;;  %5431 = vst [vmem:[#allocation3] sm:$0xff] %v5415_v6  ;;  %v5416_v26 = vmul.f32 %v6371_v61, %v5368_v7  ;;  %v5371_v12 = vadd.f32 0.5, %v5363_v30  ;;  %v5364_v13 = vmul.f32 0.5, %v6387_v8 }
 0x48b   : >> { %v6391_v35 = vpop.eup %6390  ;;  %5433 = vst [vmem:[#allocation3 + $0x10] sm:$0xff] %v5417_v31  ;;  %v5418_v14 = vmul.f32 %v6373_v62, %v5370_v25  ;;  %v5373_v36 = vadd.f32 0.5, %v5365_v24  ;;  %v5366_v17 = vmul.f32 0.5, %v6389_v9 }
 0x48c   : >> { %v6393_v18 = vpop.eup %6392  ;;  %5432 = vst [vmem:[#allocation3 + $0x8] sm:$0xff] %v5416_v26  ;;  %v6191_v11 = vpack.c.bf16 %v5416_v26, %v5415_v6  ;;  %v5419_v22 = vmul.f32 %v6391_v35, %v5371_v12  ;;  %v5372_v33 = vadd.f32 0.5, %v5364_v13 }
 0x48d   : >> { %v6395_v34 = vpop.eup %6394  ;;  %5434 = vst [vmem:[#allocation3 + $0x18] sm:$0xff] %v5418_v14  ;;  %v6192_v15 = vpack.c.bf16 %v5418_v14, %v5417_v31  ;;  %v5421_v37 = vmul.f32 %v6393_v18, %v5373_v36  ;;  %v5374_v39 = vadd.f32 0.5, %v5366_v17  ;;  %1426 = sbr.rel (!%p1424_p2) target bundleno = 413 (0x19d), region = 121 }
 0x48e   : >> { %v6397_v16 = vpop.eup %6396  ;;  %5466 = vst [vmem:[%s5465_s6] sm:$0xff] %v6191_v11  ;;  %5435 = vst [vmem:[#allocation3 + $0x20] sm:$0xff] %v5419_v22  ;;  %v5420_v41 = vmul.f32 %v6395_v34, %v5372_v33 }
 0x48f   : >> { %5467 = vst [vmem:[%s5465_s6 + $0x8] sm:$0xff] %v6192_v15  ;;  %5437 = vst [vmem:[#allocation3 + $0x30] sm:$0xff] %v5421_v37  ;;  %v5422_v42 = vmul.f32 %v6397_v16, %v5374_v39 }
 0x490   : >> { %5436 = vst [vmem:[#allocation3 + $0x28] sm:$0xff] %v5420_v41  ;;  %v6193_v19 = vpack.c.bf16 %v5420_v41, %v5419_v22 }
 0x491   : >> { %5438 = vst [vmem:[#allocation3 + $0x38] sm:$0xff] %v5422_v42  ;;  %v6194_v43 = vpack.c.bf16 %v5422_v42, %v5421_v37 }
 0x492   : >> { %5468 = vst [vmem:[%s5465_s6 + $0x10] sm:$0xff] %v6193_v19 }
 0x493   : >> { %5469 = vst [vmem:[%s5465_s6 + $0x18] sm:$0xff] %v6194_v43 }
 0x494   : > { %6501 = shalt.err (!%p6498_p7)
}
 0x495   : > { %s6502_s17 = scalar_lea.hbm %s8111_s9, 4096  ;;  %s6506_s21 = scalar_lea.hbm %s8167_s4, 8192 }
 0x496   : > { %p6503_p8 = scmp.ne.s32.totalorder %s8111_s9, %s6502_s17  ;;  %p6507_p1 = scmp.lt.u32.totalorder %s8111_s9, %s8167_s4 }
 0x497   : > { %p6508_p0 = scmp.lt.u32.totalorder %s6506_s21, %s6502_s17  ;;  %p6510_p6 = scmp.lt.u32.totalorder %s6502_s17, %s8111_s9 }
 0x498   : > { %p6504_p3 = pnand %p6503_p8, %p8192_p12 }
 0x499   : > { %p6509_p2 = por %p6508_p0, %p6507_p1 }
 0x49a   : > { %p6505_p5 = pneg %p6504_p3 }
 0x49b   : > { %p6511_p4 = por %p6510_p6, %p6509_p2 }
 0x49d   : > { %p6512_p9 = pnand %p6511_p4, %p6505_p5 }
 0x49f   : > { %6515 = shalt.err (!%p6512_p9)
}
 0x4a0   : > { %s6592_s24 = smov 256   ;;  %s6593_s13 = smov 512  }
 0x4a1   : > { %s6594_s26 = smov 16  }
 0x4a2   : > { %6235 = dma.vmem_to_hbm [thread:$0]  (%p8192_p12), %s8114_s12, 4096, %s8111_s9, %s5471_s19, %s6592_s24, %s6593_s13, %s6594_s26  }
 0x4a3 PF: > { %s5506_s2 = sand.u32 1, %s6558_s15   ;;  %p8193_p11 = scmp.ne.s32.totalorder %s8183_s30, 0 }
 0x4a4   : > { %p8194_p10 = scmp.ge.s32.totalorder %s6578_s20, 2  ;;  %s5507_s6 = scalar_lea.sflag [#allocation7], %s5506_s2 }
 0x4a6   : > { %p6248_p13 = pnand %p8194_p10, %p8193_p11 }
 0x4a8   : > { %6553 = dma.done.wait (!%p6248_p13), %s5507_s6, 4096  }
 0x4a9   : > { %6555 = vsyncadd (!%p6248_p13), %s5507_s6, 4294963200  ;;  %s23_s20 = sadd.s32 1, %s6578_s20   ;;  %s8195_s14 = sld [smem:[#allocation15_spill]] }
 0x4aa   : > { %p20_p7 = scmp.ge.s32.totalorder %s23_s20, 4   ;;  %s8196_s17 = sld [smem:[#allocation18_spill]] }
 0x4ab   : > { %s8197_s18 = sld [smem:[#allocation16_spill]]  ;;  %s8198_s19 = sld [smem:[#allocation17_spill]] }
 0x4ac   : > { %s8199_s15 = smov %s6562_s16  ;;  %22 = sbr.rel (!%p20_p7) target bundleno = 10 (0xa), region = 132 }
 0x4af   : > { %s8200_s16 = smov %s8195_s14 }
 0x4b3   :  { %5512 = vsyncpa [#allocation6], 1 }
 0x4b4   :  { %5514 = vsyncpa [#allocation6 + $0x1], 1 }
 0x4b5   :  { %5515 = vsyncpa [#allocation9], 1 }
 0x4b6   :  { %5517 = vsyncpa [#allocation9 + $0x1], 1 }
 0x4b7   :  { %5518 = vsyncpa [#allocation7], 1 }
 0x4b8   :  { %5520 = vsyncpa [#allocation7 + $0x1], 1 }

</bundles_post_ra>
